<compile_context>
chip_gen: v7x
topology: tpu7x:2x2x1
jax: 0.10.0
libtpu: 0.0.40
codegen_flags: <defaults>
</compile_context>

<pallas_src>
import functools

import numpy as np
import jax
import jax.numpy as jnp
from jax.experimental import pallas as pl
from jax.experimental.pallas import tpu as pltpu

_VMEM_LIMIT = 32 * 1024 * 1024


def _round_up(x, m):
    return -(-x // m) * m


# ---------------------------------------------------------------------------
# Fused conv(3x3, pad=1) + bias + ReLU + 2x2/stride-2 maxpool kernel.
# One bf16 matmul over pooled-window im2col patches; pooling is an XLU-roll max
# over the 4 lane blocks of the matmul output.
# ---------------------------------------------------------------------------
def _conv_relu_pool_kernel(x_ref, w_ref, b_ref, o_ref):
    # x_ref: (TM, 16*Cin)      bf16, TM rows of pooled output pixels
    # w_ref: (16*Cin, 4*Cout)  bf16, column block j = conv taps for 2x2 pos j
    # b_ref: (1, 4*Cout)       f32  (bias tiled over the 4 blocks)
    # o_ref: (TM, Cout)        bf16 pooled output in NHWC raster order
    cout = o_ref.shape[-1]
    acc = jnp.dot(x_ref[...], w_ref[...], preferred_element_type=jnp.float32)
    acc = jnp.maximum(acc + b_ref[...], 0.0)
    # Cyclic rolls (XLU) leave the max over all 4 blocks in every block; keep the
    # lane-aligned block 0.
    m = jnp.maximum(acc, pltpu.roll(acc, 2 * cout, 1))
    m = jnp.maximum(m, pltpu.roll(m, cout, 1))
    # TODO(synk): repack the pooled tile to a lane-dense (TM//4, 4*Cout) store to
    # avoid the masked 32/64-lane vst on the output block.
    o_ref[...] = m[:, :cout].astype(o_ref.dtype)


def conv_relu_pool(x_nhwc, wb, bb, tm=256):
    """x_nhwc: bf16 (N,H,W,Cin); wb: bf16 (16*Cin, 4*Cout); bb: f32 (1, 4*Cout)."""
    n, h, w, cin = x_nhwc.shape
    cout = wb.shape[1] // 4
    ho, wo = h // 2, w // 2
    m = n * ho * wo

    # Pooled-window im2col (already bf16 -> half the bytes): one 4x4xCin patch
    # (stride 2) per pooled output pixel.
    # TODO(synk): build these patches in-kernel from a halo strip at 512x512.
    xp = jnp.pad(x_nhwc, ((0, 0), (1, 1), (1, 1), (0, 0)))
    taps = [xp[:, ty:ty + h:2, tx:tx + w:2, :]
            for ty in range(4) for tx in range(4)]            # each (n, ho, wo, cin)
    patches = jnp.stack(taps, axis=3).reshape(m, 16 * cin)

    # At the real size TM should be sized against VMEM (~512-2048 rows); 256 here
    # so the small demo still runs a multi-step pipelined grid.
    tm = min(tm, _round_up(m, 16))
    m_pad = _round_up(m, tm)
    if m_pad != m:
        patches = jnp.zeros((m_pad, 16 * cin), patches.dtype).at[:m].set(patches)

    out = pl.pallas_call(
        _conv_relu_pool_kernel,
        out_shape=jax.ShapeDtypeStruct((m_pad, cout), jnp.bfloat16),
        grid_spec=pltpu.PrefetchScalarGridSpec(
            num_scalar_prefetch=0,
            grid=(m_pad // tm,),
            in_specs=[
                pl.BlockSpec((tm, 16 * cin), lambda i: (i, 0)),       # streamed
                pl.BlockSpec((16 * cin, 4 * cout), lambda i: (0, 0)),  # resident
                pl.BlockSpec((1, 4 * cout), lambda i: (0, 0)),         # resident
            ],
            out_specs=pl.BlockSpec((tm, cout), lambda i: (i, 0)),
        ),
        compiler_params=pltpu.CompilerParams(
            dimension_semantics=("parallel",),
            vmem_limit_bytes=_VMEM_LIMIT),
    )(patches, wb, bb)
    return out[:m].reshape(n, ho, wo, cout)


# ---------------------------------------------------------------------------
# Fused fc1 + ReLU + fc2 kernel: K-tiled fc1 with a VMEM f32 accumulator,
# ReLU + fc2 fused into the last K step.  bf16 matmuls, f32 accumulation.
# ---------------------------------------------------------------------------
def _mlp_kernel(x_ref, w1_ref, b1_ref, w2_ref, b2_ref, o_ref, acc_ref):
    k = pl.program_id(0)

    @pl.when(k == 0)
    def _():
        acc_ref[...] = jnp.zeros_like(acc_ref)

    acc_ref[...] += jnp.dot(x_ref[...], w1_ref[...],
                            preferred_element_type=jnp.float32)

    @pl.when(k == pl.num_programs(0) - 1)
    def _():
        hid = jnp.maximum(acc_ref[...] + b1_ref[...], 0.0)
        o_ref[...] = (jnp.dot(hid.astype(w2_ref.dtype), w2_ref[...],
                              preferred_element_type=jnp.float32)
                      + b2_ref[...])


def _pick_tk(f, target=1024):
    if f <= target:
        return f
    for tk in range(target, 0, -128):
        if f % tk == 0:
            return tk
    return f


def mlp(x, w1, b1, w2, b2):
    """x: bf16 (N,F); w1: bf16 (F,H1); b1: f32 (1,H1); w2: bf16 (H1,H2p); b2: f32 (1,H2p)."""
    n, f = x.shape
    h1 = w1.shape[1]
    h2p = w2.shape[1]

    n_p = max(16, _round_up(n, 16))                   # bf16 sublane packing
    xb = jnp.zeros((n_p, f), jnp.bfloat16).at[:n].set(x.astype(jnp.bfloat16))

    tk = _pick_tk(f)
    out = pl.pallas_call(
        _mlp_kernel,
        out_shape=jax.ShapeDtypeStruct((n_p, h2p), jnp.float32),
        grid_spec=pltpu.PrefetchScalarGridSpec(
            num_scalar_prefetch=0,
            grid=(f // tk,),
            in_specs=[
                pl.BlockSpec((n_p, tk), lambda k: (0, k)),     # streamed over K
                pl.BlockSpec((tk, h1), lambda k: (k, 0)),      # streamed over K
                pl.BlockSpec((1, h1), lambda k: (0, 0)),       # resident
                pl.BlockSpec((h1, h2p), lambda k: (0, 0)),     # resident
                pl.BlockSpec((1, h2p), lambda k: (0, 0)),      # resident
            ],
            out_specs=pl.BlockSpec((n_p, h2p), lambda k: (0, 0)),
            scratch_shapes=[pltpu.VMEM((n_p, h1), jnp.float32)],
        ),
        compiler_params=pltpu.CompilerParams(
            dimension_semantics=("arbitrary",),
            vmem_limit_bytes=_VMEM_LIMIT),
    )(xb, w1, b1, w2, b2)
    return out[:n]


# ---------------------------------------------------------------------------
# One-time parameter reformatting (hoisted out of the forward pass).
# ---------------------------------------------------------------------------
def _conv_block_weight(w_oihw, b):
    cout, cin = w_oihw.shape[0], w_oihw.shape[1]
    w_hwio = jnp.transpose(w_oihw, (2, 3, 1, 0))              # (3,3,cin,cout)
    # W[(ty*4+tx)*cin + ci, (dy*2+dx)*cout + co] = w[co,ci,ky,kx] with
    # ty = dy+ky, tx = dx+kx; zeros elsewhere.
    wb = jnp.zeros((4, 4, cin, 2, 2, cout), jnp.float32)
    for dy in range(2):
        for dx in range(2):
            for ky in range(3):
                for kx in range(3):
                    wb = wb.at[dy + ky, dx + kx, :, dy, dx, :].set(w_hwio[ky, kx])
    wb = wb.reshape(16 * cin, 4 * cout).astype(jnp.bfloat16)
    bb = jnp.tile(b.reshape(1, cout).astype(jnp.float32), (1, 4))
    return wb, bb


def prepare_params(params, spatial_hw):
    """Reformat torch-layout weights into kernel layouts/dtypes once, off the hot path."""
    h, w = spatial_hw
    ho, wo = h // 4, w // 4                                   # after two 2x2 pools
    c = params["conv2_w"].shape[0]

    wb1, bb1 = _conv_block_weight(params["conv1_w"], params["conv1_b"])
    wb2, bb2 = _conv_block_weight(params["conv2_w"], params["conv2_b"])

    # fc1: absorb torch's NCHW flatten order into a column permutation, transpose
    # to (features, 512) and cast to bf16 once.
    h1 = params["fc1_w"].shape[0]
    w1 = (params["fc1_w"].reshape(h1, c, ho, wo)
          .transpose(0, 2, 3, 1).reshape(h1, ho * wo * c).T).astype(jnp.bfloat16)
    b1 = params["fc1_b"].reshape(1, h1).astype(jnp.float32)

    # fc2: transpose and pad the 2-wide output to a lane-dense 128.
    n_cls = params["fc2_w"].shape[0]
    h2p = _round_up(max(n_cls, 128), 128)
    w2 = jnp.zeros((h1, h2p), jnp.bfloat16).at[:, :n_cls].set(
        params["fc2_w"].T.astype(jnp.bfloat16))
    b2 = jnp.zeros((1, h2p), jnp.float32).at[:, :n_cls].set(
        params["fc2_b"].reshape(1, n_cls).astype(jnp.float32))

    return {"wb1": wb1, "bb1": bb1, "wb2": wb2, "bb2": bb2,
            "w1": w1, "b1": b1, "w2": w2, "b2": b2}


# ---------------------------------------------------------------------------
# Forward pass (layout glue in plain JAX, hot path in Pallas)
# ---------------------------------------------------------------------------
@functools.partial(jax.jit, static_argnames=("num_classes",))
def cnn_forward(x_nchw, prep, num_classes):
    n = x_nchw.shape[0]
    x = jnp.transpose(x_nchw, (0, 2, 3, 1)).astype(jnp.bfloat16)   # NCHW->NHWC, bf16 once
    x = conv_relu_pool(x, prep["wb1"], prep["bb1"])
    x = conv_relu_pool(x, prep["wb2"], prep["bb2"])
    x_flat = x.reshape(n, -1)                                      # NHWC flatten (free)
    out = mlp(x_flat, prep["w1"], prep["b1"], prep["w2"], prep["b2"])
    return out[:, :num_classes]


def init_params(key, feat_dim):
    ks = jax.random.split(key, 8)
    return {
        "conv1_w": jax.random.normal(ks[0], (32, 1, 3, 3), jnp.float32) * 0.2,
        "conv1_b": jax.random.normal(ks[1], (32,), jnp.float32) * 0.1,
        "conv2_w": jax.random.normal(ks[2], (64, 32, 3, 3), jnp.float32) * 0.05,
        "conv2_b": jax.random.normal(ks[3], (64,), jnp.float32) * 0.1,
        "fc1_w": jax.random.normal(ks[4], (512, feat_dim), jnp.float32) * 0.02,
        "fc1_b": jax.random.normal(ks[5], (512,), jnp.float32) * 0.1,
        "fc2_w": jax.random.normal(ks[6], (2, 512), jnp.float32) * 0.05,
        "fc2_b": jax.random.normal(ks[7], (2,), jnp.float32) * 0.1,
    }


def reference_forward(x, p):
    """Pure-JAX f32 reference matching the PyTorch module semantics."""
    def conv(x, w, b):
        y = jax.lax.conv_general_dilated(
            x, w, (1, 1), ((1, 1), (1, 1)),
            dimension_numbers=("NCHW", "OIHW", "NCHW"))
        return jax.nn.relu(y + b[None, :, None, None])

    def pool(x):
        return jax.lax.reduce_window(x, -jnp.inf, jax.lax.max,
                                     (1, 1, 2, 2), (1, 1, 2, 2), "VALID")

    x = pool(conv(x, p["conv1_w"], p["conv1_b"]))
    x = pool(conv(x, p["conv2_w"], p["conv2_b"]))
    x = x.reshape(x.shape[0], -1)
    x = jax.nn.relu(x @ p["fc1_w"].T + p["fc1_b"])
    return x @ p["fc2_w"].T + p["fc2_b"]


if __name__ == "__main__":
    key = jax.random.PRNGKey(0)
    kx, kp = jax.random.split(key)
    # batch=2, 1 input channel, 32x32 spatial -> fc1 input = 64 * 8 * 8
    N, H, W = 2, 32, 32
    x = jax.random.normal(kx, (N, 1, H, W), jnp.float32)
    params = init_params(kp, 64 * (H // 4) * (W // 4))

    prep = jax.block_until_ready(prepare_params(params, (H, W)))   # one-time reformat

    out = cnn_forward(x, prep, num_classes=params["fc2_w"].shape[0])
    out = jax.block_until_ready(out)
    assert out.shape == (N, 2)

    ref = reference_forward(x, params)
    # bf16 matmul operands (f32 accumulation) -> slightly looser tolerance.
    np.testing.assert_allclose(np.asarray(out), np.asarray(ref),
                               rtol=5e-2, atol=5e-2)
    print("KERNEL_OK")
</pallas_src>

<mosaic_0001>
module attributes {stable_mosaic.version = 11 : i64} {
  func.func @_conv_relu_pool_kernel(%arg0: i32, %arg1: memref<256x16xbf16, #tpu.memory_space<vmem>>, %arg2: memref<16x128xbf16, #tpu.memory_space<vmem>>, %arg3: memref<1x128xf32, #tpu.memory_space<vmem>>, %arg4: memref<256x32xbf16, #tpu.memory_space<vmem>>) attributes {dimension_semantics = [#tpu.dimension_semantics<parallel>], iteration_bounds = array<i64: 2>, scalar_prefetch = 0 : i64, scratch_operands = 0 : i64, tpu.core_type = #tpu.core_type<tc>, window_params = [{transform_indices = @transform_0, window_bounds = array<i64: 256, 16>}, {pipeline_mode = #tpu.pipeline_mode<synchronous>, transform_indices = @transform_1, window_bounds = array<i64: 16, 128>}, {pipeline_mode = #tpu.pipeline_mode<synchronous>, transform_indices = @transform_2, window_bounds = array<i64: 1, 128>}, {transform_indices = @transform_3, window_bounds = array<i64: 256, 32>}]} {
    %c0 = arith.constant 0 : index
    %c0_0 = arith.constant 0 : index
    %0 = vector.load %arg1[%c0, %c0_0] : memref<256x16xbf16, #tpu.memory_space<vmem>>, vector<256x16xbf16>
    %c0_1 = arith.constant 0 : index
    %c0_2 = arith.constant 0 : index
    %1 = vector.load %arg2[%c0_1, %c0_2] : memref<16x128xbf16, #tpu.memory_space<vmem>>, vector<16x128xbf16>
    %cst = arith.constant dense<0.000000e+00> : vector<256x128xf32>
    %2 = tpu.matmul %0, %1, %cst {dimension_numbers = #tpu.dot_dimension_numbers<[1], [0], [0], [1], [0, 0, 1, 1], [], []>} : vector<256x16xbf16>, vector<16x128xbf16>, vector<256x128xf32> -> vector<256x128xf32>
    %c0_3 = arith.constant 0 : index
    %c0_4 = arith.constant 0 : index
    %3 = vector.load %arg3[%c0_3, %c0_4] : memref<1x128xf32, #tpu.memory_space<vmem>>, vector<1x128xf32>
    %4 = vector.broadcast %3 : vector<1x128xf32> to vector<256x128xf32>
    %5 = arith.addf %2, %4 : vector<256x128xf32>
    %cst_5 = arith.constant 0.000000e+00 : f32
    %6 = vector.broadcast %cst_5 : f32 to vector<256x128xf32>
    %7 = arith.maximumf %5, %6 : vector<256x128xf32>
    %c64_i32 = arith.constant 64 : i32
    %8 = tpu.dynamic_rotate %7 by %c64_i32 dim 1 : vector<256x128xf32>, i32 -> vector<256x128xf32>
    %9 = arith.maximumf %7, %8 : vector<256x128xf32>
    %c32_i32 = arith.constant 32 : i32
    %10 = tpu.dynamic_rotate %9 by %c32_i32 dim 1 : vector<256x128xf32>, i32 -> vector<256x128xf32>
    %11 = arith.maximumf %9, %10 : vector<256x128xf32>
    %12 = vector.extract_strided_slice %11 {offsets = [0, 0], sizes = [256, 32], strides = [1, 1]} : vector<256x128xf32> to vector<256x32xf32>
    %13 = arith.truncf %12 : vector<256x32xf32> to vector<256x32xbf16>
    %c0_6 = arith.constant 0 : index
    %c0_7 = arith.constant 0 : index
    %14 = vector.load %arg4[%c0_6, %c0_7] : memref<256x32xbf16, #tpu.memory_space<vmem>>, vector<256x32xbf16>
    tpu.vector_store %arg4[%c0_6, %c0_7], %13 {strides = array<i32>} : memref<256x32xbf16, #tpu.memory_space<vmem>>, vector<256x32xbf16>,
    return
  }
  func.func @transform_0(%arg0: i32) -> (i32, i32) {
    %c0_i32 = arith.constant 0 : i32
    %c0_i32_0 = arith.constant 0 : i32
    return %arg0, %c0_i32 : i32, i32
  }
  func.func @transform_1(%arg0: i32) -> (i32, i32) {
    %c0_i32 = arith.constant 0 : i32
    %c0_i32_0 = arith.constant 0 : i32
    %c0_i32_1 = arith.constant 0 : i32
    return %c0_i32, %c0_i32_0 : i32, i32
  }
  func.func @transform_2(%arg0: i32) -> (i32, i32) {
    %c0_i32 = arith.constant 0 : i32
    %c0_i32_0 = arith.constant 0 : i32
    %c0_i32_1 = arith.constant 0 : i32
    return %c0_i32, %c0_i32_0 : i32, i32
  }
  func.func @transform_3(%arg0: i32) -> (i32, i32) {
    %c0_i32 = arith.constant 0 : i32
    %c0_i32_0 = arith.constant 0 : i32
    return %arg0, %c0_i32 : i32, i32
  }
}

module attributes {stable_mosaic.version = 11 : i64} {
  func.func @_conv_relu_pool_kernel(%arg0: i32, %arg1: memref<128x512xbf16, #tpu.memory_space<vmem>>, %arg2: memref<512x256xbf16, #tpu.memory_space<vmem>>, %arg3: memref<1x256xf32, #tpu.memory_space<vmem>>, %arg4: memref<128x64xbf16, #tpu.memory_space<vmem>>) attributes {dimension_semantics = [#tpu.dimension_semantics<parallel>], iteration_bounds = array<i64: 1>, scalar_prefetch = 0 : i64, scratch_operands = 0 : i64, tpu.core_type = #tpu.core_type<tc>, window_params = [{transform_indices = @transform_0, window_bounds = array<i64: 128, 512>}, {pipeline_mode = #tpu.pipeline_mode<synchronous>, transform_indices = @transform_1, window_bounds = array<i64: 512, 256>}, {pipeline_mode = #tpu.pipeline_mode<synchronous>, transform_indices = @transform_2, window_bounds = array<i64: 1, 256>}, {transform_indices = @transform_3, window_bounds = array<i64: 128, 64>}]} {
    %c0 = arith.constant 0 : index
    %c0_0 = arith.constant 0 : index
    %0 = vector.load %arg1[%c0, %c0_0] : memref<128x512xbf16, #tpu.memory_space<vmem>>, vector<128x512xbf16>
    %c0_1 = arith.constant 0 : index
    %c0_2 = arith.constant 0 : index
    %1 = vector.load %arg2[%c0_1, %c0_2] : memref<512x256xbf16, #tpu.memory_space<vmem>>, vector<512x256xbf16>
    %cst = arith.constant dense<0.000000e+00> : vector<128x256xf32>
    %2 = tpu.matmul %0, %1, %cst {dimension_numbers = #tpu.dot_dimension_numbers<[1], [0], [0], [1], [0, 0, 1, 1], [], []>} : vector<128x512xbf16>, vector<512x256xbf16>, vector<128x256xf32> -> vector<128x256xf32>
    %c0_3 = arith.constant 0 : index
    %c0_4 = arith.constant 0 : index
    %3 = vector.load %arg3[%c0_3, %c0_4] : memref<1x256xf32, #tpu.memory_space<vmem>>, vector<1x256xf32>
    %4 = vector.broadcast %3 : vector<1x256xf32> to vector<128x256xf32>
    %5 = arith.addf %2, %4 : vector<128x256xf32>
    %cst_5 = arith.constant 0.000000e+00 : f32
    %6 = vector.broadcast %cst_5 : f32 to vector<128x256xf32>
    %7 = arith.maximumf %5, %6 : vector<128x256xf32>
    %c128_i32 = arith.constant 128 : i32
    %8 = tpu.dynamic_rotate %7 by %c128_i32 dim 1 : vector<128x256xf32>, i32 -> vector<128x256xf32>
    %9 = arith.maximumf %7, %8 : vector<128x256xf32>
    %c64_i32 = arith.constant 64 : i32
    %10 = tpu.dynamic_rotate %9 by %c64_i32 dim 1 : vector<128x256xf32>, i32 -> vector<128x256xf32>
    %11 = arith.maximumf %9, %10 : vector<128x256xf32>
    %12 = vector.extract_strided_slice %11 {offsets = [0, 0], sizes = [128, 64], strides = [1, 1]} : vector<128x256xf32> to vector<128x64xf32>
    %13 = arith.truncf %12 : vector<128x64xf32> to vector<128x64xbf16>
    %c0_6 = arith.constant 0 : index
    %c0_7 = arith.constant 0 : index
    %14 = vector.load %arg4[%c0_6, %c0_7] : memref<128x64xbf16, #tpu.memory_space<vmem>>, vector<128x64xbf16>
    tpu.vector_store %arg4[%c0_6, %c0_7], %13 {strides = array<i32>} : memref<128x64xbf16, #tpu.memory_space<vmem>>, vector<128x64xbf16>,
    return
  }
  func.func @transform_0(%arg0: i32) -> (i32, i32) {
    %c0_i32 = arith.constant 0 : i32
    %c0_i32_0 = arith.constant 0 : i32
    return %arg0, %c0_i32 : i32, i32
  }
  func.func @transform_1(%arg0: i32) -> (i32, i32) {
    %c0_i32 = arith.constant 0 : i32
    %c0_i32_0 = arith.constant 0 : i32
    %c0_i32_1 = arith.constant 0 : i32
    return %c0_i32, %c0_i32_0 : i32, i32
  }
  func.func @transform_2(%arg0: i32) -> (i32, i32) {
    %c0_i32 = arith.constant 0 : i32
    %c0_i32_0 = arith.constant 0 : i32
    %c0_i32_1 = arith.constant 0 : i32
    return %c0_i32, %c0_i32_0 : i32, i32
  }
  func.func @transform_3(%arg0: i32) -> (i32, i32) {
    %c0_i32 = arith.constant 0 : i32
    %c0_i32_0 = arith.constant 0 : i32
    return %arg0, %c0_i32 : i32, i32
  }
}

module attributes {stable_mosaic.version = 11 : i64} {
  func.func @_mlp_kernel(%arg0: i32, %arg1: memref<16x1024xbf16, #tpu.memory_space<vmem>>, %arg2: memref<1024x512xbf16, #tpu.memory_space<vmem>>, %arg3: memref<1x512xf32, #tpu.memory_space<vmem>>, %arg4: memref<512x128xbf16, #tpu.memory_space<vmem>>, %arg5: memref<1x128xf32, #tpu.memory_space<vmem>>, %arg6: memref<16x128xf32, #tpu.memory_space<vmem>>, %arg7: memref<16x512xf32, #tpu.memory_space<vmem>>) attributes {dimension_semantics = [#tpu.dimension_semantics<arbitrary>], iteration_bounds = array<i64: 4>, scalar_prefetch = 0 : i64, scratch_operands = 1 : i64, tpu.core_type = #tpu.core_type<tc>, window_params = [{transform_indices = @transform_0, window_bounds = array<i64: 16, 1024>}, {transform_indices = @transform_1, window_bounds = array<i64: 1024, 512>}, {pipeline_mode = #tpu.pipeline_mode<synchronous>, transform_indices = @transform_2, window_bounds = array<i64: 1, 512>}, {pipeline_mode = #tpu.pipeline_mode<synchronous>, transform_indices = @transform_3, window_bounds = array<i64: 512, 128>}, {pipeline_mode = #tpu.pipeline_mode<synchronous>, transform_indices = @transform_4, window_bounds = array<i64: 1, 128>}, {pipeline_mode = #tpu.pipeline_mode<synchronous>, transform_indices = @transform_5, window_bounds = array<i64: 16, 128>}]} {
    %c0_i32 = arith.constant 0 : i32
    %0 = arith.cmpi eq, %arg0, %c0_i32 : i32
    %1 = arith.extui %0 : i1 to i32
    %c0_i32_0 = arith.constant 0 : i32
    %2 = arith.cmpi ne, %1, %c0_i32_0 : i32
    scf.if %2 {
      %cst_9 = arith.constant 0.000000e+00 : f32
      %12 = vector.broadcast %cst_9 : f32 to vector<16x512xf32>
      %c0_10 = arith.constant 0 : index
      %c0_11 = arith.constant 0 : index
      %13 = vector.load %arg7[%c0_10, %c0_11] : memref<16x512xf32, #tpu.memory_space<vmem>>, vector<16x512xf32>
      tpu.vector_store %arg7[%c0_10, %c0_11], %12 {strides = array<i32>} : memref<16x512xf32, #tpu.memory_space<vmem>>, vector<16x512xf32>,
    } else {
    }
    %c0 = arith.constant 0 : index
    %c0_1 = arith.constant 0 : index
    %3 = vector.load %arg7[%c0, %c0_1] : memref<16x512xf32, #tpu.memory_space<vmem>>, vector<16x512xf32>
    %c0_2 = arith.constant 0 : index
    %c0_3 = arith.constant 0 : index
    %4 = vector.load %arg1[%c0_2, %c0_3] : memref<16x1024xbf16, #tpu.memory_space<vmem>>, vector<16x1024xbf16>
    %c0_4 = arith.constant 0 : index
    %c0_5 = arith.constant 0 : index
    %5 = vector.load %arg2[%c0_4, %c0_5] : memref<1024x512xbf16, #tpu.memory_space<vmem>>, vector<1024x512xbf16>
    %cst = arith.constant dense<0.000000e+00> : vector<16x512xf32>
    %6 = tpu.matmul %4, %5, %cst {dimension_numbers = #tpu.dot_dimension_numbers<[1], [0], [0], [1], [0, 0, 1, 1], [], []>} : vector<16x1024xbf16>, vector<1024x512xbf16>, vector<16x512xf32> -> vector<16x512xf32>
    %7 = arith.addf %3, %6 : vector<16x512xf32>
    %c0_6 = arith.constant 0 : index
    %c0_7 = arith.constant 0 : index
    %8 = vector.load %arg7[%c0_6, %c0_7] : memref<16x512xf32, #tpu.memory_space<vmem>>, vector<16x512xf32>
    tpu.vector_store %arg7[%c0_6, %c0_7], %7 {strides = array<i32>} : memref<16x512xf32, #tpu.memory_space<vmem>>, vector<16x512xf32>,
    %c3_i32 = arith.constant 3 : i32
    %9 = arith.cmpi eq, %arg0, %c3_i32 : i32
    %10 = arith.extui %9 : i1 to i32
    %c0_i32_8 = arith.constant 0 : i32
    %11 = arith.cmpi ne, %10, %c0_i32_8 : i32
    scf.if %11 {
      %c0_9 = arith.constant 0 : index
      %c0_10 = arith.constant 0 : index
      %12 = vector.load %arg7[%c0_9, %c0_10] : memref<16x512xf32, #tpu.memory_space<vmem>>, vector<16x512xf32>
      %c0_11 = arith.constant 0 : index
      %c0_12 = arith.constant 0 : index
      %13 = vector.load %arg3[%c0_11, %c0_12] : memref<1x512xf32, #tpu.memory_space<vmem>>, vector<1x512xf32>
      %14 = vector.broadcast %13 : vector<1x512xf32> to vector<16x512xf32>
      %15 = arith.addf %12, %14 : vector<16x512xf32>
      %cst_13 = arith.constant 0.000000e+00 : f32
      %16 = vector.broadcast %cst_13 : f32 to vector<16x512xf32>
      %17 = arith.maximumf %15, %16 : vector<16x512xf32>
      %18 = arith.truncf %17 : vector<16x512xf32> to vector<16x512xbf16>
      %c0_14 = arith.constant 0 : index
      %c0_15 = arith.constant 0 : index
      %19 = vector.load %arg4[%c0_14, %c0_15] : memref<512x128xbf16, #tpu.memory_space<vmem>>, vector<512x128xbf16>
      %cst_16 = arith.constant dense<0.000000e+00> : vector<16x128xf32>
      %20 = tpu.matmul %18, %19, %cst_16 {dimension_numbers = #tpu.dot_dimension_numbers<[1], [0], [0], [1], [0, 0, 1, 1], [], []>} : vector<16x512xbf16>, vector<512x128xbf16>, vector<16x128xf32> -> vector<16x128xf32>
      %c0_17 = arith.constant 0 : index
      %c0_18 = arith.constant 0 : index
      %21 = vector.load %arg5[%c0_17, %c0_18] : memref<1x128xf32, #tpu.memory_space<vmem>>, vector<1x128xf32>
      %22 = vector.broadcast %21 : vector<1x128xf32> to vector<16x128xf32>
      %23 = arith.addf %20, %22 : vector<16x128xf32>
      %c0_19 = arith.constant 0 : index
      %c0_20 = arith.constant 0 : index
      %24 = vector.load %arg6[%c0_19, %c0_20] : memref<16x128xf32, #tpu.memory_space<vmem>>, vector<16x128xf32>
      tpu.vector_store %arg6[%c0_19, %c0_20], %23 {strides = array<i32>} : memref<16x128xf32, #tpu.memory_space<vmem>>, vector<16x128xf32>,
    } else {
    }
    return
  }
  func.func @transform_0(%arg0: i32) -> (i32, i32) {
    %c0_i32 = arith.constant 0 : i32
    %c0_i32_0 = arith.constant 0 : i32
    return %c0_i32, %arg0 : i32, i32
  }
  func.func @transform_1(%arg0: i32) -> (i32, i32) {
    %c0_i32 = arith.constant 0 : i32
    %c0_i32_0 = arith.constant 0 : i32
    return %arg0, %c0_i32 : i32, i32
  }
  func.func @transform_2(%arg0: i32) -> (i32, i32) {
    %c0_i32 = arith.constant 0 : i32
    %c0_i32_0 = arith.constant 0 : i32
    %c0_i32_1 = arith.constant 0 : i32
    return %c0_i32, %c0_i32_0 : i32, i32
  }
  func.func @transform_3(%arg0: i32) -> (i32, i32) {
    %c0_i32 = arith.constant 0 : i32
    %c0_i32_0 = arith.constant 0 : i32
    %c0_i32_1 = arith.constant 0 : i32
    return %c0_i32, %c0_i32_0 : i32, i32
  }
  func.func @transform_4(%arg0: i32) -> (i32, i32) {
    %c0_i32 = arith.constant 0 : i32
    %c0_i32_0 = arith.constant 0 : i32
    %c0_i32_1 = arith.constant 0 : i32
    return %c0_i32, %c0_i32_0 : i32, i32
  }
  func.func @transform_5(%arg0: i32) -> (i32, i32) {
    %c0_i32 = arith.constant 0 : i32
    %c0_i32_0 = arith.constant 0 : i32
    %c0_i32_1 = arith.constant 0 : i32
    return %c0_i32, %c0_i32_0 : i32, i32
  }
}

</mosaic_0001>

<bundles_post_ra>
// kernel: cnn_forward.3
= control target key start
LH: loop header
LB: loop body
LE: loop exit
PB: predicated region body
PF: predicated region fallthrough
CT: control target
= control target key end

     0   :  { %8 = vsyncpa [#allocation3], 0  ;;  %s2099_s0 = inlined_call_operand.vmem [shape: bf16[512,16], index: 0, kind: input, shape index: {}]   ;;  %s2100_s1 = inlined_call_operand.hbm [shape: bf16[16,128], index: 1, kind: input, shape index: {}]   ;;  %s2101_s2 = inlined_call_operand.hbm [shape: f32[1,128], index: 2, kind: input, shape index: {}]   ;;  %s2102_s3 = inlined_call_operand.vmem [shape: bf16[512,32], index: 3, kind: output, shape index: {}]  }
   0x1   :  { %9 = vsyncpa [#allocation5], 0  ;;  %s1477_s12 = smov 0  }
   0x2 LB: > { %s1003_s13 = sadd.s32 4294967295, %s1449_s12   ;;  %p1005_p0 = scmp.ge.s32.totalorder %s1449_s12, 1  ;;  %s1449_s12 = sphi %s1477_s12, %s15_s12  }
   0x3   : > { %p114_p1 = scmp.lt.s32.totalorder %s1449_s12, 3  ;;  %s1451_s14 = smov [#allocation2]  }
   0x4   : > { %s126_s15 = sshll.u32 %s1451_s14, 4  ;;  %p1491_p3 = scmp.eq.s32.totalorder %s1003_s13, 0  ;;  %s127_s15 = int_to_ptr.vmem [resolvable:$true] %s126_s15 }
   0x5   : > { %p1485_p2 = pnand %p1005_p0, %p114_p1  ;;  %s1452_s18 = smov [#allocation4]  }
   0x6   : > { %s2119_s17 = scalar_select %p1491_p3, 1, 0 }
   0x7   : > { %s2118_s16 = scalar_select %p1485_p2, 1, 0 }
   0x8   : > { %p1177_p4 = pneg %p1485_p2  ;;  %s140_s19 = sshll.u32 %s1452_s18, 4  ;;  %s1503_s19 = int_to_ptr.vmem [resolvable:$true] %s140_s19 }
   0x9   : > { %s1379_s23 = scalar_lea.hbm %s2100_s1, 128 }
   0xa   : > { %p1499_p5 = pnand %p1491_p3, %p1177_p4  ;;  %p1380_p6 = scmp.ne.s32.totalorder %s2100_s1, %s1379_s23 }
   0xb   : > { %p1386_p10 = scmp.lt.u32.totalorder %s1379_s23, %s2100_s1 }
   0xc   : > { %p1381_p7 = pneg %p1499_p5 }
   0xe   : > { %p1382_p8 = pnand %p1381_p7, %p1380_p6 }
  0x10   : > { %p1383_p9 = pneg %p1382_p8 }
  0x12   : > { %p1388_p11 = pnand %p1386_p10, %p1383_p9 }
  0x14   : > { %1391 = shalt.err (!%p1388_p11)
}
  0x15   : > { %s1392_s28 = scalar_lea.vmem %s127_s15, 128  ;;  %p1400_p1 = scmp.lt.s32.totalorder %s127_s15, %s127_s15 }
  0x16   : > { %p1393_p12 = scmp.ne.s32.totalorder %s127_s15, %s1392_s28  ;;  %p1401_p4 = scmp.lt.s32.totalorder %s1392_s28, %s1392_s28 }
  0x18   : > { %p1395_p13 = pnand %p1393_p12, %p1381_p7  ;;  %p1402_p3 = por %p1401_p4, %p1400_p1 }
  0x1a   : > { %p1396_p0 = pneg %p1395_p13 }
  0x1c   : > { %p1403_p2 = pnand %p1402_p3, %p1396_p0 }
  0x1e   : > { %1406 = shalt.err (!%p1403_p2)
}
  0x1f   : > { %s1453_s29 = smov 64   ;;  %s1454_s30 = smov 4  }
  0x20   : > { %1180 = dma.hbm_to_vmem [thread:$0]  (!%p1499_p5), %s2100_s1, 128, %s127_s15, [#allocation3], %s1453_s29, %s1453_s29, %s1454_s30  }
  0x21   : > { %s1407_s8 = scalar_lea.hbm %s2101_s2, 16 }
  0x22   : > { %p1408_p6 = scmp.ne.s32.totalorder %s2101_s2, %s1407_s8  ;;  %p1414_p8 = scmp.lt.u32.totalorder %s1407_s8, %s2101_s2 }
  0x24   : > { %p1410_p2 = pnand %p1408_p6, %p1381_p7 }
  0x26   : > { %p1411_p3 = pneg %p1410_p2 }
  0x28   : > { %p1416_p9 = pnand %p1414_p8, %p1411_p3 }
  0x2a   : > { %1419 = shalt.err (!%p1416_p9)
}
  0x2b   : > { %s1420_s15 = scalar_lea.vmem %s1503_s19, 16  ;;  %s1427_s18 = scalar_lea.vmem %s1503_s19, 32 }
  0x2c   : > { %p1421_p10 = scmp.ne.s32.totalorder %s1503_s19, %s1420_s15  ;;  %p1428_p13 = scmp.lt.s32.totalorder %s1503_s19, %s1503_s19 }
  0x2d   : > { %p1429_p0 = scmp.lt.s32.totalorder %s1427_s18, %s1420_s15 }
  0x2e   : > { %p1423_p11 = pnand %p1421_p10, %p1381_p7 }
  0x2f   : > { %p1430_p1 = por %p1429_p0, %p1428_p13 }
  0x30   : > { %p1424_p12 = pneg %p1423_p11 }
  0x32   : > { %p1431_p4 = pnand %p1430_p1, %p1424_p12 }
  0x34   : > { %1434 = shalt.err (!%p1431_p4)
}
  0x35   : > { %1183 = dma.hbm_to_vmem [thread:$0]  (!%p1499_p5), %s2101_s2, 16, %s1503_s19, [#allocation5]  }
  0x36   : > { %p2121_p6 = scmp.ne.s32.totalorder %s2118_s16, 0 }
  0x37   : > { %p2122_p7 = scmp.ne.s32.totalorder (!%p2121_p6), %s2119_s17, 0 }
  0x38   : > { %162 = sbr.rel (%p2121_p6) target bundleno = 573 (0x23d), region = 32 }
  0x3f   : > { %1440 = dma.done.wait (%p2122_p7), [#allocation3], 128  }
  0x40   : > { %1442 = vsyncadd (%p2122_p7), [#allocation3], 4294967168 }
  0x41   : > { %1444 = dma.done.wait (%p2122_p7), [#allocation5], 16  }
  0x42   : > { %1446 = vsyncadd (%p2122_p7), [#allocation5], 4294967280  ;;  %s1012_s20 = sshll.u32 %s1003_s13, 5  ;;  %v1362_v0 = vld [vmem:[#allocation2] sm:$0xff]   ;;  %vm330_vm0 = vcmask 130048   ;;  %s1455_s13 = smov 64  }
  0x43   : > { %p191_p2 = scmp.lt.s32.totalorder %s1012_s20, 63  ;;  %1133 = vmatprep.subr.bf16.mxu0 %v1362_v0  ;;  %1167 = vmatprep.subr.bf16.mxu1 %v1362_v0  ;;  %v1607_v17 = vld [vmem:[#allocation4] ss:$0 sm:$0xff]  ;;  %s1456_s17 = smov 32   ;;  %vm892_vm1 = vcmask 257024  }
  0x44   : > { %1134 = vmatpush3.bf16.msra.mxu0 %v1362_v0  ;;  %1168 = vmatpush3.bf16.msra.mxu1 %v1362_v0 }
  0x45   : > { %s2136_s20 = smov (!%p191_p2, %s1012_s20), 63 }
  0x46   : > { %s1013_s16 = sshll.u32 %s2136_s20, 2 }
  0x47   : > { %s1573_s24 = scalar_lea.vmem %s2099_s0, %s1013_s16  ;;  %s2000_s27 = scalar_lea.vmem %s2102_s3, %s1013_s16 }
  0x48   : > { %v1363_v1 = vld [vmem:[%s1573_s24] sm:$0xff]   ;;  %v1365_v3 = vld [vmem:[%s1573_s24 + $0x8] sm:$0xff]   ;;  %v1367_v5 = vld [vmem:[%s1573_s24 + $0x10] sm:$0xff]  }
  0x49   : > { %v1364_v2 = vld [vmem:[%s1573_s24 + $0x40] sm:$0xff]   ;;  %1135 = vmatprep.mubr.msk.bf16.mxu0 %vm330_vm0, %v1363_v1  ;;  %v1366_v4 = vld [vmem:[%s1573_s24 + $0x48] sm:$0xff]   ;;  %v1369_v6 = vld [vmem:[%s1573_s24 + $0x50] sm:$0xff]  }
  0x4a   : > { %1151 = vmatprep.mubr.msk.bf16.mxu1 %vm330_vm0, %v1364_v2  ;;  %1136 = vmatmul.mubr.msk.bf16.vlgmr.msra.gmra.mrb[0].mxu0 %vm330_vm0, %v1365_v3  ;;  %v1368_v7 = vld [vmem:[%s1573_s24 + $0x18] sm:$0xff]   ;;  %v1371_v9 = vld [vmem:[%s1573_s24 + $0x20] sm:$0xff]   ;;  %v1372_v11 = vld [vmem:[%s1573_s24 + $0x28] sm:$0xff]  }
  0x4b   : > { %1152 = vmatmul.mubr.msk.bf16.vlgmr.msra.gmra.mrb[0].mxu1 %vm330_vm0, %v1366_v4  ;;  %1139 = vmatprep.mubr.msk.bf16.mxu0 %vm330_vm0, %v1367_v5  ;;  %v1370_v8 = vld [vmem:[%s1573_s24 + $0x58] sm:$0xff]   ;;  %v1373_v10 = vld [vmem:[%s1573_s24 + $0x60] sm:$0xff]   ;;  %v1374_v12 = vld [vmem:[%s1573_s24 + $0x68] sm:$0xff]  }
  0x4c   : > { %1155 = vmatprep.mubr.msk.bf16.mxu1 %vm330_vm0, %v1369_v6  ;;  %v1375_v13 = vld [vmem:[%s1573_s24 + $0x30] sm:$0xff]   ;;  %v1376_v15 = vld [vmem:[%s1573_s24 + $0x38] sm:$0xff]  }
  0x4d   : > { %v1377_v14 = vld [vmem:[%s1573_s24 + $0x70] sm:$0xff]   ;;  %v1378_v16 = vld [vmem:[%s1573_s24 + $0x78] sm:$0xff]  }
  0x52   : > { %1140 = vmatmul.mubr.msk.bf16.gmra.mrb[4].mxu0 %vm330_vm0, %v1368_v7 }
  0x53   : > { %1156 = vmatmul.mubr.msk.bf16.gmra.mrb[4].mxu1 %vm330_vm0, %v1370_v8  ;;  %1143 = vmatprep.mubr.msk.bf16.mxu0 %vm330_vm0, %v1371_v9 }
  0x54   : > { %1159 = vmatprep.mubr.msk.bf16.mxu1 %vm330_vm0, %v1373_v10 }
  0x5a   : > { %1144 = vmatmul.mubr.msk.bf16.gmra.mrb[8].mxu0 %vm330_vm0, %v1372_v11 }
  0x5b   : > { %1160 = vmatmul.mubr.msk.bf16.gmra.mrb[8].mxu1 %vm330_vm0, %v1374_v12  ;;  %1147 = vmatprep.mubr.msk.bf16.mxu0 %vm330_vm0, %v1375_v13 }
  0x5c   : > { %1163 = vmatprep.mubr.msk.bf16.mxu1 %vm330_vm0, %v1377_v14 }
  0x62   : > { %1148 = vmatmul.mubr.msk.bf16.gmra.mrb[12].mxu0 %vm330_vm0, %v1376_v15 }
  0x63   : > { %1164 = vmatmul.mubr.msk.bf16.gmra.mrb[12].mxu1 %vm330_vm0, %v1378_v16 }
 0x11d   : > { %v1137_v18 = vpop.f32.mrb[0].mxu0 }
 0x11e   : > { %v1153_v19 = vpop.f32.mrb[0].mxu1  ;;  %v1610_v20 = vadd.f32 %v1137_v18, %v1607_v17  ;;  %v413_v22 = vpop.f32.mrb[1].mxu0 }
 0x11f   : > { %v1613_v21 = vadd.f32 %v1153_v19, %v1607_v17  ;;  %v477_v23 = vpop.f32.mrb[1].mxu1  ;;  %v1138_v24 = vpop.f32.mrb[2].mxu0  ;;  %v1627_v33 = vadd.f32 %v1607_v17, %v413_v22 }
 0x120   : > { %v1154_v25 = vpop.f32.mrb[2].mxu1  ;;  %v1617_v27 = vadd.f32 %v1138_v24, %v1607_v17  ;;  %v416_v29 = vpop.f32.mrb[3].mxu0  ;;  %v542_v32 = vmax.f32 %v1610_v20, 0.0  ;;  %v1632_v36 = vadd.f32 %v1607_v17, %v477_v23 }
 0x121   : > { %v558_v26 = vmax.f32 %v1613_v21, 0.0  ;;  %v1620_v28 = vadd.f32 %v1154_v25, %v1607_v17  ;;  %v480_v30 = vpop.f32.mrb[3].mxu1  ;;  %v1623_v31 = vadd.f32 %v1607_v17, %v416_v29  ;;  %v540_v43 = vmax.f32 %v1627_v33, 0.0 }
 0x122   : > { %v543_v34 = vmax.f32 %v1617_v27, 0.0  ;;  %v1635_v37 = vadd.f32 %v1607_v17, %v480_v30  ;;  %v556_v47 = vmax.f32 %v1632_v36, 0.0 }
 0x123   : > { %v559_v35 = vmax.f32 %v1620_v28, 0.0  ;;  %v541_v38 = vmax.f32 %v1623_v31, 0.0 }
 0x124   : > { %v1202_v40 = vpack.i.bf16 %v543_v34, %v542_v32  ;;  %v557_v48 = vmax.f32 %v1635_v37, 0.0 }
 0x125   : > { %v1207_v39 = vpack.i.bf16 %v559_v35, %v558_v26  ;;  %v1141_v41 = vpop.f32.mrb[4].mxu0  ;;  %v1212_v52 = vpack.i.bf16 %v541_v38, %v540_v43 }
 0x126   : > { %v1157_v42 = vpop.f32.mrb[4].mxu1  ;;  %v1648_v44 = vadd.f32 %v1141_v41, %v1607_v17  ;;  %1203 = vrot.lane.b32.xlu0 %v1202_v40, %s1455_s13  ;;  %v429_v45 = vpop.f32.mrb[5].mxu0  ;;  %v1217_v61 = vpack.i.bf16 %v557_v48, %v556_v47 }
 0x127   : > { %1208 = vrot.lane.b32.xlu1 %v1207_v39, %s1455_s13  ;;  %v493_v46 = vpop.f32.mrb[5].mxu1  ;;  %v1655_v49 = vadd.f32 %v1157_v42, %v1607_v17  ;;  %v1142_v50 = vpop.f32.mrb[6].mxu0  ;;  %v1692_v6 = vadd.f32 %v1607_v17, %v429_v45 }
 0x128   : > { %v1158_v51 = vpop.f32.mrb[6].mxu1  ;;  %v1662_v53 = vadd.f32 %v1142_v50, %v1607_v17  ;;  %v1665_v54 = vadd.f32 %v1607_v17, %v493_v46  ;;  %v432_v55 = vpop.f32.mrb[7].mxu0  ;;  %v546_v59 = vmax.f32 %v1648_v44, 0.0 }
 0x129   : > { %v1668_v56 = vadd.f32 %v1158_v51, %v1607_v17  ;;  %v496_v57 = vpop.f32.mrb[7].mxu1  ;;  %v562_v62 = vmax.f32 %v1655_v49, 0.0  ;;  %v1682_v63 = vadd.f32 %v1607_v17, %v432_v55  ;;  %v544_v39 = vmax.f32 %v1692_v6, 0.0 }
 0x12a   : > { %v1671_v58 = vadd.f32 %v1607_v17, %v496_v57  ;;  %v547_v60 = vmax.f32 %v1662_v53, 0.0  ;;  %1213 = vrot.lane.b32.xlu0 %v1212_v52, %s1455_s13  ;;  %v560_v1 = vmax.f32 %v1665_v54, 0.0 }
 0x12b   : > { %v563_v2 = vmax.f32 %v1668_v56, 0.0  ;;  %v545_v10 = vmax.f32 %v1682_v63, 0.0 }
 0x12c   : > { %v1222_v0 = vpack.i.bf16 %v547_v60, %v546_v59  ;;  %v561_v3 = vmax.f32 %v1671_v58, 0.0 }
 0x12d   : > { %v1145_v4 = vpop.f32.mrb[8].mxu0  ;;  %v1227_v15 = vpack.i.bf16 %v563_v2, %v562_v62  ;;  %v1232_v50 = vpack.i.bf16 %v545_v10, %v544_v39 }
 0x12e   : > { %v1161_v5 = vpop.f32.mrb[8].mxu1  ;;  %v1695_v7 = vadd.f32 %v1145_v4, %v1607_v17  ;;  %1223 = vrot.lane.b32.xlu1 %v1222_v0, %s1455_s13  ;;  %v445_v8 = vpop.f32.mrb[9].mxu0  ;;  %1218 = vrot.lane.b32.xlu0 %v1217_v61, %s1455_s13  ;;  %v1237_v16 = vpack.i.bf16 %v561_v3, %v560_v1 }
 0x12f   : > { %v509_v9 = vpop.f32.mrb[9].mxu1  ;;  %v1701_v11 = vadd.f32 %v1607_v17, %v445_v8  ;;  %v1146_v12 = vpop.f32.mrb[10].mxu0  ;;  %v1718_v22 = vadd.f32 %v1161_v5, %v1607_v17 }
 0x130   : > { %v1704_v13 = vadd.f32 %v1607_v17, %v509_v9  ;;  %v1162_v14 = vpop.f32.mrb[10].mxu1  ;;  %v1715_v18 = vadd.f32 %v1146_v12, %v1607_v17  ;;  %v448_v19 = vpop.f32.mrb[11].mxu0  ;;  %v550_v40 = vmax.f32 %v1695_v7, 0.0 }
 0x131   : > { %v512_v23 = vpop.f32.mrb[11].mxu1  ;;  %v2108_v24 = vmax.f32 %v1701_v11, 0.0  ;;  %v1722_v25 = vadd.f32 %v1607_v17, %v448_v19  ;;  %v1725_v29 = vadd.f32 %v1162_v14, %v1607_v17  ;;  %v2109_v52 = vmax.f32 %v1718_v22, 0.0 }
 0x132   : > { %v1728_v30 = vadd.f32 %v1607_v17, %v512_v23  ;;  %v551_v41 = vmax.f32 %v1715_v18, 0.0  ;;  %1228 = vrot.lane.b32.xlu1 %v1227_v15, %s1455_s13  ;;  %1238 = vrot.lane.b32.xlu0 %v1237_v16, %s1455_s13  ;;  %v2106_v45 = vmax.f32 %v1704_v13, 0.0  ;;  %v2124_v18 = vmax.f32 %v1701_v11, 0.0 }
 0x133   : > { %v2115_v42 = vmax.f32 %v1722_v25, 0.0  ;;  %v2110_v55 = vmax.f32 %v1725_v29, 0.0 }
 0x134   : > { %v2107_v46 = vmax.f32 %v1728_v30, 0.0  ;;  %v1242_v0 = vpack.i.bf16 %v551_v41, %v550_v40  ;;  %v2127_v11 = vmax.f32 %v1728_v30, 0.0 }
 0x135   : > { %v1252_v51 = vpack.i.bf16 %v2115_v42, %v2108_v24  ;;  %v1149_v57 = vpop.f32.mrb[12].mxu0 }
 0x136   : > { %v1165_v61 = vpop.f32.mrb[12].mxu1  ;;  %v1753_v4 = vadd.f32 %v1149_v57, %v1607_v17  ;;  %v461_v5 = vpop.f32.mrb[13].mxu0  ;;  %1233 = vrot.lane.b32.xlu1 %v1232_v50, %s1455_s13  ;;  %v1257_v9 = vpack.i.bf16 %v2107_v46, %v2106_v45  ;;  %v1247_v57 = vpack.i.bf16 %v2110_v55, %v2109_v52 }
 0x137   : > { %v525_v8 = vpop.f32.mrb[13].mxu1  ;;  %v1761_v12 = vadd.f32 %v1607_v17, %v461_v5  ;;  %v1150_v14 = vpop.f32.mrb[14].mxu0  ;;  %1253 = vrot.lane.b32.xlu0 %v1252_v51, %s1455_s13  ;;  %v1784_v46 = vadd.f32 %v1165_v61, %v1607_v17 }
 0x138   : > { %v1765_v15 = vadd.f32 %v1607_v17, %v525_v8  ;;  %v1166_v16 = vpop.f32.mrb[14].mxu1  ;;  %v1768_v19 = vadd.f32 %v1150_v14, %v1607_v17  ;;  %v464_v23 = vpop.f32.mrb[15].mxu0  ;;  %v2113_v8 = vmax.f32 %v1753_v4, 0.0 }
 0x139   : > { %v528_v50 = vpop.f32.mrb[15].mxu1  ;;  %v2111_v5 = vmax.f32 %v1761_v12, 0.0  ;;  %v1776_v45 = vadd.f32 %v1607_v17, %v464_v23  ;;  %v1788_v24 = vadd.f32 %v1166_v16, %v1607_v17 }
 0x13a   : > { %v1779_v51 = vadd.f32 %v1607_v17, %v528_v50  ;;  %v2114_v14 = vmax.f32 %v1768_v19, 0.0  ;;  %1243 = vrot.lane.b32.xlu1 %v1242_v0, %s1455_s13  ;;  %v2116_v23 = vmax.f32 %v1765_v15, 0.0  ;;  %v570_v17 = vmax.f32 %v1784_v46, 0.0 }
 0x13b   : > { %v2112_v52 = vmax.f32 %v1776_v45, 0.0  ;;  %1258 = vrot.lane.b32.xlu0 %v1257_v9, %s1455_s13  ;;  %v571_v0 = vmax.f32 %v1788_v24, 0.0  ;;  %v2129_v30 = vmax.f32 %v1768_v19, 0.0 }
 0x13c   : > { %v2117_v50 = vmax.f32 %v1779_v51, 0.0  ;;  %v1262_v61 = vpack.i.bf16 %v2114_v14, %v2113_v8 }
 0x13d   : > { %v1267_v55 = vpack.i.bf16 %v2112_v52, %v2111_v5  ;;  %v1277_v16 = vpack.i.bf16 %v571_v0, %v570_v17 }
 0x13e   : > { %1248 = vrot.lane.b32.xlu1 %v1247_v57, %s1455_s13  ;;  %v1272_v9 = vpack.i.bf16 %v2117_v50, %v2116_v23 }
 0x13f   : > { %1268 = vrot.lane.b32.xlu0 %v1267_v55, %s1455_s13 }
 0x142   : > { %1263 = vrot.lane.b32.xlu1 %v1262_v61, %s1455_s13 }
 0x143   : > { %1273 = vrot.lane.b32.xlu0 %v1272_v9, %s1455_s13 }
 0x146   : > { %1278 = vrot.lane.b32.xlu1 %v1277_v16, %s1455_s13 }
 0x198   : > { %v1204_v57 = vpop.permute.xlu0 %1203 }
 0x199   : > { %v1209_v5 = vpop.permute.xlu1 %1208  ;;  %v1206_v14 = vunpack.i.h.bf16 %v1204_v57  ;;  %v1205_v42 = vunpack.i.l.bf16 %v1204_v57 }
 0x19a   : > { %v1211_v52 = vunpack.i.h.bf16 %v1209_v5  ;;  %v1210_v8 = vunpack.i.l.bf16 %v1209_v5 }
 0x19b   : > { %v1819_v55 = vmax.f32 %v543_v34, %v1206_v14  ;;  %v1823_v23 = vmax.f32 %v542_v32, %v1205_v42 }
 0x19c   : > { %v1827_v61 = vmax.f32 %v559_v35, %v1211_v52  ;;  %v1831_v9 = vmax.f32 %v558_v26, %v1210_v8  ;;  %v1214_v16 = vpop.permute.xlu0 %1213 }
 0x19d   : > { %v1216_v5 = vunpack.i.h.bf16 %v1214_v16  ;;  %v1215_v50 = vunpack.i.l.bf16 %v1214_v16  ;;  %v1282_v27 = vpack.i.bf16 %v1819_v55, %v1823_v23 }
 0x19e   : > { %v1287_v28 = vpack.i.bf16 %v1827_v61, %v1831_v9 }
 0x19f   : > { %v1837_v34 = vmax.f32 %v541_v38, %v1216_v5  ;;  %v1841_v20 = vmax.f32 %v540_v43, %v1215_v50  ;;  %1283 = vrot.lane.b32.xlu1 %v1282_v27, %s1456_s17 }
 0x1a0   : > { %v1224_v21 = vpop.permute.xlu1 %1223  ;;  %v1219_v26 = vpop.permute.xlu0 %1218 }
 0x1a1   : > { %v1226_v32 = vunpack.i.h.bf16 %v1224_v21  ;;  %v1225_v35 = vunpack.i.l.bf16 %v1224_v21  ;;  %v1221_v42 = vunpack.i.h.bf16 %v1219_v26  ;;  %v1220_v52 = vunpack.i.l.bf16 %v1219_v26 }
 0x1a2   : > { %v1292_v31 = vpack.i.bf16 %v1837_v34, %v1841_v20 }
 0x1a3   : > { %v1850_v33 = vmax.f32 %v547_v60, %v1226_v32  ;;  %v1854_v38 = vmax.f32 %v546_v59, %v1225_v35  ;;  %v1858_v43 = vmax.f32 %v557_v48, %v1221_v42  ;;  %v1862_v8 = vmax.f32 %v556_v47, %v1220_v52  ;;  %1288 = vrot.lane.b32.xlu1 %v1287_v28, %s1456_s17 }
 0x1a4   : > { %1293 = vrot.lane.b32.xlu0 %v1292_v31, %s1456_s17  ;;  %v1229_v14 = vpop.permute.xlu1 %1228  ;;  %v1239_v53 = vpop.permute.xlu0 %1238 }
 0x1a5   : > { %v1231_v60 = vunpack.i.h.bf16 %v1229_v14  ;;  %v1230_v50 = vunpack.i.l.bf16 %v1229_v14  ;;  %v1302_v44 = vpack.i.bf16 %v1850_v33, %v1854_v38  ;;  %v1297_v37 = vpack.i.bf16 %v1858_v43, %v1862_v8 }
 0x1a6   : > { %v1241_v47 = vunpack.i.h.bf16 %v1239_v53  ;;  %v1240_v59 = vunpack.i.l.bf16 %v1239_v53 }
 0x1a7   : > { %v1872_v48 = vmax.f32 %v563_v2, %v1231_v60  ;;  %v1876_v36 = vmax.f32 %v562_v62, %v1230_v50  ;;  %1303 = vrot.lane.b32.xlu1 %v1302_v44, %s1456_s17  ;;  %v2126_v50 = vmax.f32 %v1718_v22, 0.0 }
 0x1a8   : > { %1298 = vrot.lane.b32.xlu0 %v1297_v37, %s1456_s17  ;;  %v1234_v57 = vpop.permute.xlu1 %1233  ;;  %v1892_v62 = vmax.f32 %v561_v3, %v1241_v47  ;;  %v1896_v2 = vmax.f32 %v560_v1, %v1240_v59  ;;  %v2123_v1 = vmax.f32 %v1722_v25, 0.0  ;;  %v2125_v25 = vmax.f32 %v1725_v29, 0.0 }
 0x1a9   : > { %v1236_v16 = vunpack.i.h.bf16 %v1234_v57  ;;  %v1235_v5 = vunpack.i.l.bf16 %v1234_v57  ;;  %v1254_v27 = vpop.permute.xlu0 %1253  ;;  %v1307_v21 = vpack.i.bf16 %v1872_v48, %v1876_v36  ;;  %v2128_v47 = vmax.f32 %v1704_v13, 0.0 }
 0x1aa   : > { %v1256_v26 = vunpack.i.h.bf16 %v1254_v27  ;;  %v1255_v32 = vunpack.i.l.bf16 %v1254_v27  ;;  %v1317_v31 = vpack.i.bf16 %v1892_v62, %v1896_v2  ;;  %v2130_v13 = vmax.f32 %v1753_v4, 0.0 }
 0x1ab   : > { %v1884_v56 = vmax.f32 %v545_v10, %v1236_v16  ;;  %v1888_v49 = vmax.f32 %v544_v39, %v1235_v5  ;;  %1308 = vrot.lane.b32.xlu1 %v1307_v21, %s1456_s17 }
 0x1ac   : > { %v1244_v28 = vpop.permute.xlu1 %1243  ;;  %v1912_v3 = vmax.f32 %v2123_v1, %v1256_v26 }
 0x1ad   : > { %v1246_v63 = vunpack.i.h.bf16 %v1244_v28  ;;  %v1245_v10 = vunpack.i.l.bf16 %v1244_v28  ;;  %v1259_v35 = vpop.permute.xlu0 %1258  ;;  %v1312_v6 = vpack.i.bf16 %v1884_v56, %v1888_v49 }
 0x1ae   : > { %v1261_v39 = vunpack.i.h.bf16 %v1259_v35  ;;  %v1260_v42 = vunpack.i.l.bf16 %v1259_v35  ;;  %v2132_v35 = vmax.f32 %v1761_v12, 0.0 }
 0x1af   : > { %v1903_v58 = vmax.f32 %v551_v41, %v1246_v63  ;;  %v1907_v54 = vmax.f32 %v550_v40, %v1245_v10  ;;  %1313 = vrot.lane.b32.xlu0 %v1312_v6, %s1456_s17  ;;  %v1918_v41 = vmax.f32 %v2124_v18, %v1255_v32  ;;  %v2131_v63 = vmax.f32 %v1776_v45, 0.0 }
 0x1b0   : > { %v1249_v52 = vpop.permute.xlu1 %1248  ;;  %v1934_v37 = vmax.f32 %v2127_v11, %v1261_v39  ;;  %v1938_v59 = vmax.f32 %v2128_v47, %v1260_v42  ;;  %v2133_v18 = vmax.f32 %v1779_v51, 0.0 }
 0x1b1   : > { %v1251_v14 = vunpack.i.h.bf16 %v1249_v52  ;;  %v1250_v7 = vunpack.i.l.bf16 %v1249_v52  ;;  %v1269_v40 = vpop.permute.xlu0 %1268  ;;  %v1322_v53 = vpack.i.bf16 %v1903_v58, %v1907_v54  ;;  %v1332_v26 = vpack.i.bf16 %v1912_v3, %v1918_v41 }
 0x1b2   : > { %v1271_v57 = vunpack.i.h.bf16 %v1269_v40  ;;  %v1270_v29 = vunpack.i.l.bf16 %v1269_v40  ;;  %v1337_v39 = vpack.i.bf16 %v1934_v37, %v1938_v59 }
 0x1b3   : > { %v1924_v60 = vmax.f32 %v2125_v25, %v1251_v14  ;;  %v1928_v44 = vmax.f32 %v2126_v50, %v1250_v7  ;;  %1323 = vrot.lane.b32.xlu1 %v1322_v53, %s1456_s17  ;;  %1318 = vrot.lane.b32.xlu0 %v1317_v31, %s1456_s17  ;;  %v2134_v7 = vmax.f32 %v1765_v15, 0.0 }
 0x1b4   : > { %v1264_v16 = vpop.permute.xlu1 %1263  ;;  %v1956_v10 = vmax.f32 %v2131_v63, %v1271_v57  ;;  %v1960_v6 = vmax.f32 %v2132_v35, %v1270_v29 }
 0x1b5   : > { %v1266_v5 = vunpack.i.h.bf16 %v1264_v16  ;;  %v1265_v27 = vunpack.i.l.bf16 %v1264_v16  ;;  %v1274_v22 = vpop.permute.xlu0 %1273  ;;  %v1327_v21 = vpack.i.bf16 %v1924_v60, %v1928_v44 }
 0x1b6   : > { %v1276_v1 = vunpack.i.h.bf16 %v1274_v22  ;;  %v1275_v4 = vunpack.i.l.bf16 %v1274_v22  ;;  %v1347_v46 = vpack.i.bf16 %v1956_v10, %v1960_v6 }
 0x1b7   : > { %v1946_v28 = vmax.f32 %v2129_v30, %v1266_v5  ;;  %v1950_v32 = vmax.f32 %v2130_v13, %v1265_v27  ;;  %1328 = vrot.lane.b32.xlu1 %v1327_v21, %s1456_s17  ;;  %1333 = vrot.lane.b32.xlu0 %v1332_v26, %s1456_s17 }
 0x1b8   : > { %v1279_v19 = vpop.permute.xlu1 %1278  ;;  %v1978_v14 = vmax.f32 %v2133_v18, %v1276_v1  ;;  %v1982_v40 = vmax.f32 %v2134_v7, %v1275_v4 }
 0x1b9   : > { %v1281_v42 = vunpack.i.h.bf16 %v1279_v19  ;;  %v1280_v52 = vunpack.i.l.bf16 %v1279_v19  ;;  %v1342_v31 = vpack.i.bf16 %v1946_v28, %v1950_v32 }
 0x1bb   : > { %v1968_v45 = vmax.f32 %v571_v0, %v1281_v42  ;;  %v1972_v12 = vmax.f32 %v570_v17, %v1280_v52  ;;  %1343 = vrot.lane.b32.xlu1 %v1342_v31, %s1456_s17  ;;  %1338 = vrot.lane.b32.xlu0 %v1337_v39, %s1456_s17  ;;  %v1352_v17 = vpack.i.bf16 %v1978_v14, %v1982_v40 }
 0x1bd   : > { %v1357_v24 = vpack.i.bf16 %v1968_v45, %v1972_v12 }
 0x1bf   : > { %1358 = vrot.lane.b32.xlu1 %v1357_v24, %s1456_s17  ;;  %1348 = vrot.lane.b32.xlu0 %v1347_v46, %s1456_s17 }
 0x1c3   : > { %1353 = vrot.lane.b32.xlu0 %v1352_v17, %s1456_s17 }
 0x211   : > { %v1284_v51 = vpop.permute.xlu1 %1283 }
 0x212   : > { %v1286_v0 = vunpack.i.h.bf16 %v1284_v51  ;;  %v1285_v15 = vunpack.i.l.bf16 %v1284_v51 }
 0x214   : > { %v735_v53 = vmax.f32 %v1819_v55, %v1286_v0  ;;  %v734_v25 = vmax.f32 %v1823_v23, %v1285_v15 }
 0x215   : > { %v1289_v50 = vpop.permute.xlu1 %1288 }
 0x216   : > { %v1087_v11 = vpack.c.bf16 %v735_v53, %v735_v53  ;;  %v1086_v47 = vpack.c.bf16 %v734_v25, %v734_v25  ;;  %v1291_v57 = vunpack.i.h.bf16 %v1289_v50  ;;  %v1290_v29 = vunpack.i.l.bf16 %v1289_v50  ;;  %v1294_v16 = vpop.permute.xlu0 %1293 }
 0x217   : > { %v1296_v5 = vunpack.i.h.bf16 %v1294_v16  ;;  %v1295_v55 = vunpack.i.l.bf16 %v1294_v16 }
 0x218   : > { %896 = vst.msk [vmem:[%s2000_s27 + $0xc] sm:$0xf] %vm892_vm1, %v1087_v11  ;;  %895 = vst.msk [vmem:[%s2000_s27 + $0x8] sm:$0xf] %vm892_vm1, %v1086_v47  ;;  %v751_v23 = vmax.f32 %v1827_v61, %v1291_v57  ;;  %v750_v27 = vmax.f32 %v1831_v9, %v1290_v29 }
 0x219   : > { %v733_v22 = vmax.f32 %v1837_v34, %v1296_v5  ;;  %v732_v21 = vmax.f32 %v1841_v20, %v1295_v55  ;;  %v1304_v13 = vpop.permute.xlu1 %1303 }
 0x21a   : > { %v1103_v26 = vpack.c.bf16 %v751_v23, %v751_v23  ;;  %v1102_v30 = vpack.c.bf16 %v750_v27, %v750_v27  ;;  %v1299_v63 = vpop.permute.xlu0 %1298  ;;  %v1306_v19 = vunpack.i.h.bf16 %v1304_v13  ;;  %v1305_v39 = vunpack.i.l.bf16 %v1304_v13 }
 0x21b   : > { %v1085_v35 = vpack.c.bf16 %v733_v22, %v733_v22  ;;  %v1084_v1 = vpack.c.bf16 %v732_v21, %v732_v21  ;;  %v1301_v61 = vunpack.i.h.bf16 %v1299_v63  ;;  %v1300_v9 = vunpack.i.l.bf16 %v1299_v63 }
 0x21c   : > { %912 = vst.msk [vmem:[%s2000_s27 + $0x4c] sm:$0xf] %vm892_vm1, %v1103_v26  ;;  %911 = vst.msk [vmem:[%s2000_s27 + $0x48] sm:$0xf] %vm892_vm1, %v1102_v30  ;;  %v739_v34 = vmax.f32 %v1850_v33, %v1306_v19  ;;  %v738_v20 = vmax.f32 %v1854_v38, %v1305_v39 }
 0x21d   : > { %894 = vst.msk [vmem:[%s2000_s27 + $0x4] sm:$0xf] %vm892_vm1, %v1085_v35  ;;  %893 = vst.msk [vmem:[%s2000_s27] sm:$0xf] %vm892_vm1, %v1084_v1  ;;  %v749_v4 = vmax.f32 %v1858_v43, %v1301_v61  ;;  %v748_v42 = vmax.f32 %v1862_v8, %v1300_v9  ;;  %v1309_v52 = vpop.permute.xlu1 %1308 }
 0x21e   : > { %v1091_v31 = vpack.c.bf16 %v739_v34, %v739_v34  ;;  %v1090_v18 = vpack.c.bf16 %v738_v20, %v738_v20  ;;  %v1311_v7 = vunpack.i.h.bf16 %v1309_v52  ;;  %v1310_v24 = vunpack.i.l.bf16 %v1309_v52 }
 0x21f   : > { %v1101_v46 = vpack.c.bf16 %v749_v4, %v749_v4  ;;  %v1100_v17 = vpack.c.bf16 %v748_v42, %v748_v42 }
 0x220   : > { %900 = vst.msk [vmem:[%s2000_s27 + $0x1c] sm:$0xf] %vm892_vm1, %v1091_v31  ;;  %899 = vst.msk [vmem:[%s2000_s27 + $0x18] sm:$0xf] %vm892_vm1, %v1090_v18  ;;  %v755_v33 = vmax.f32 %v1872_v48, %v1311_v7  ;;  %v754_v38 = vmax.f32 %v1876_v36, %v1310_v24 }
 0x221   : > { %v1314_v43 = vpop.permute.xlu0 %1313  ;;  %910 = vst.msk [vmem:[%s2000_s27 + $0x44] sm:$0xf] %vm892_vm1, %v1101_v46  ;;  %909 = vst.msk [vmem:[%s2000_s27 + $0x40] sm:$0xf] %vm892_vm1, %v1100_v17 }
 0x222   : > { %v1316_v8 = vunpack.i.h.bf16 %v1314_v43  ;;  %v1315_v51 = vunpack.i.l.bf16 %v1314_v43  ;;  %v1107_v0 = vpack.c.bf16 %v755_v33, %v755_v33  ;;  %v1106_v15 = vpack.c.bf16 %v754_v38, %v754_v38 }
 0x224   : > { %v737_v53 = vmax.f32 %v1884_v56, %v1316_v8  ;;  %v736_v25 = vmax.f32 %v1888_v49, %v1315_v51  ;;  %916 = vst.msk [vmem:[%s2000_s27 + $0x5c] sm:$0xf] %vm892_vm1, %v1107_v0  ;;  %915 = vst.msk [vmem:[%s2000_s27 + $0x58] sm:$0xf] %vm892_vm1, %v1106_v15 }
 0x225   : > { %v1324_v48 = vpop.permute.xlu1 %1323  ;;  %v1319_v36 = vpop.permute.xlu0 %1318 }
 0x226   : > { %v1089_v50 = vpack.c.bf16 %v737_v53, %v737_v53  ;;  %v1088_v11 = vpack.c.bf16 %v736_v25, %v736_v25  ;;  %v1326_v47 = vunpack.i.h.bf16 %v1324_v48  ;;  %v1325_v57 = vunpack.i.l.bf16 %v1324_v48 }
 0x227   : > { %v1321_v29 = vunpack.i.h.bf16 %v1319_v36  ;;  %v1320_v16 = vunpack.i.l.bf16 %v1319_v36 }
 0x228   : > { %898 = vst.msk [vmem:[%s2000_s27 + $0x14] sm:$0xf] %vm892_vm1, %v1089_v50  ;;  %897 = vst.msk [vmem:[%s2000_s27 + $0x10] sm:$0xf] %vm892_vm1, %v1088_v11  ;;  %v743_v56 = vmax.f32 %v1903_v58, %v1326_v47  ;;  %v742_v49 = vmax.f32 %v1907_v54, %v1325_v57 }
 0x229   : > { %v753_v5 = vmax.f32 %v1892_v62, %v1321_v29  ;;  %v752_v55 = vmax.f32 %v1896_v2, %v1320_v16  ;;  %v1329_v23 = vpop.permute.xlu1 %1328  ;;  %v1334_v27 = vpop.permute.xlu0 %1333 }
 0x22a   : > { %v1095_v22 = vpack.c.bf16 %v743_v56, %v743_v56  ;;  %v1094_v21 = vpack.c.bf16 %v742_v49, %v742_v49  ;;  %v1331_v26 = vunpack.i.h.bf16 %v1329_v23  ;;  %v1330_v30 = vunpack.i.l.bf16 %v1329_v23 }
 0x22b   : > { %v1105_v13 = vpack.c.bf16 %v753_v5, %v753_v5  ;;  %v1104_v63 = vpack.c.bf16 %v752_v55, %v752_v55  ;;  %v1336_v35 = vunpack.i.h.bf16 %v1334_v27  ;;  %v1335_v1 = vunpack.i.l.bf16 %v1334_v27 }
 0x22c   : > { %904 = vst.msk [vmem:[%s2000_s27 + $0x2c] sm:$0xf] %vm892_vm1, %v1095_v22  ;;  %903 = vst.msk [vmem:[%s2000_s27 + $0x28] sm:$0xf] %vm892_vm1, %v1094_v21  ;;  %v759_v62 = vmax.f32 %v1924_v60, %v1331_v26  ;;  %v758_v2 = vmax.f32 %v1928_v44, %v1330_v30 }
 0x22d   : > { %914 = vst.msk [vmem:[%s2000_s27 + $0x54] sm:$0xf] %vm892_vm1, %v1105_v13  ;;  %913 = vst.msk [vmem:[%s2000_s27 + $0x50] sm:$0xf] %vm892_vm1, %v1104_v63  ;;  %v741_v58 = vmax.f32 %v1912_v3, %v1336_v35  ;;  %v740_v54 = vmax.f32 %v1918_v41, %v1335_v1  ;;  %v1344_v19 = vpop.permute.xlu1 %1343  ;;  %v1339_v39 = vpop.permute.xlu0 %1338 }
 0x22e   : > { %v1111_v61 = vpack.c.bf16 %v759_v62, %v759_v62  ;;  %v1110_v9 = vpack.c.bf16 %v758_v2, %v758_v2  ;;  %v1346_v34 = vunpack.i.h.bf16 %v1344_v19  ;;  %v1345_v60 = vunpack.i.l.bf16 %v1344_v19 }
 0x22f   : > { %v1093_v20 = vpack.c.bf16 %v741_v58, %v741_v58  ;;  %v1092_v4 = vpack.c.bf16 %v740_v54, %v740_v54  ;;  %v1341_v44 = vunpack.i.h.bf16 %v1339_v39  ;;  %v1340_v42 = vunpack.i.l.bf16 %v1339_v39 }
 0x230   : > { %920 = vst.msk [vmem:[%s2000_s27 + $0x6c] sm:$0xf] %vm892_vm1, %v1111_v61  ;;  %919 = vst.msk [vmem:[%s2000_s27 + $0x68] sm:$0xf] %vm892_vm1, %v1110_v9  ;;  %v747_v3 = vmax.f32 %v1946_v28, %v1346_v34  ;;  %v746_v41 = vmax.f32 %v1950_v32, %v1345_v60 }
 0x231   : > { %902 = vst.msk [vmem:[%s2000_s27 + $0x24] sm:$0xf] %vm892_vm1, %v1093_v20  ;;  %901 = vst.msk [vmem:[%s2000_s27 + $0x20] sm:$0xf] %vm892_vm1, %v1092_v4  ;;  %v757_v52 = vmax.f32 %v1934_v37, %v1341_v44  ;;  %v756_v31 = vmax.f32 %v1938_v59, %v1340_v42  ;;  %v1359_v18 = vpop.permute.xlu1 %1358  ;;  %v1349_v7 = vpop.permute.xlu0 %1348 }
 0x232   : > { %v1099_v24 = vpack.c.bf16 %v747_v3, %v747_v3  ;;  %v1098_v46 = vpack.c.bf16 %v746_v41, %v746_v41  ;;  %v1361_v17 = vunpack.i.h.bf16 %v1359_v18  ;;  %v1360_v28 = vunpack.i.l.bf16 %v1359_v18 }
 0x233   : > { %v1109_v33 = vpack.c.bf16 %v757_v52, %v757_v52  ;;  %v1108_v38 = vpack.c.bf16 %v756_v31, %v756_v31  ;;  %v1351_v32 = vunpack.i.h.bf16 %v1349_v7  ;;  %v1350_v43 = vunpack.i.l.bf16 %v1349_v7 }
 0x234   : > { %908 = vst.msk [vmem:[%s2000_s27 + $0x3c] sm:$0xf] %vm892_vm1, %v1099_v24  ;;  %907 = vst.msk [vmem:[%s2000_s27 + $0x38] sm:$0xf] %vm892_vm1, %v1098_v46  ;;  %v763_v37 = vmax.f32 %v1968_v45, %v1361_v17  ;;  %v762_v59 = vmax.f32 %v1972_v12, %v1360_v28 }
 0x235   : > { %918 = vst.msk [vmem:[%s2000_s27 + $0x64] sm:$0xf] %vm892_vm1, %v1109_v33  ;;  %917 = vst.msk [vmem:[%s2000_s27 + $0x60] sm:$0xf] %vm892_vm1, %v1108_v38  ;;  %v745_v8 = vmax.f32 %v1956_v10, %v1351_v32  ;;  %v744_v51 = vmax.f32 %v1960_v6, %v1350_v43  ;;  %v1354_v0 = vpop.permute.xlu0 %1353 }
 0x236   : > { %v1115_v15 = vpack.c.bf16 %v763_v37, %v763_v37  ;;  %v1114_v53 = vpack.c.bf16 %v762_v59, %v762_v59  ;;  %v1356_v25 = vunpack.i.h.bf16 %v1354_v0  ;;  %v1355_v48 = vunpack.i.l.bf16 %v1354_v0 }
 0x237   : > { %v1097_v45 = vpack.c.bf16 %v745_v8, %v745_v8  ;;  %v1096_v36 = vpack.c.bf16 %v744_v51, %v744_v51 }
 0x238   : > { %924 = vst.msk [vmem:[%s2000_s27 + $0x7c] sm:$0xf] %vm892_vm1, %v1115_v15  ;;  %923 = vst.msk [vmem:[%s2000_s27 + $0x78] sm:$0xf] %vm892_vm1, %v1114_v53  ;;  %v761_v12 = vmax.f32 %v1978_v14, %v1356_v25  ;;  %v760_v50 = vmax.f32 %v1982_v40, %v1355_v48 }
 0x239   : > { %906 = vst.msk [vmem:[%s2000_s27 + $0x34] sm:$0xf] %vm892_vm1, %v1097_v45  ;;  %905 = vst.msk [vmem:[%s2000_s27 + $0x30] sm:$0xf] %vm892_vm1, %v1096_v36 }
 0x23a   : > { %v1113_v10 = vpack.c.bf16 %v761_v12, %v761_v12  ;;  %v1112_v6 = vpack.c.bf16 %v760_v50, %v760_v50 }
 0x23c   : > { %922 = vst.msk [vmem:[%s2000_s27 + $0x74] sm:$0xf] %vm892_vm1, %v1113_v10  ;;  %921 = vst.msk [vmem:[%s2000_s27 + $0x70] sm:$0xf] %vm892_vm1, %v1112_v6 }
 0x23d PF: > { %s15_s12 = sadd.s32 1, %s1449_s12  }
 0x23e   : > { %p12_p5 = scmp.ge.s32.totalorder %s15_s12, 4  }
 0x240   :  { %14 = sbr.rel (!%p12_p5) target bundleno = 2 (0x2), region = 71 }
 0x247   :  { %947 = vsyncpa [#allocation3], 1 }
 0x248   :  { %949 = vsyncpa [#allocation3 + $0x1], 1 }
 0x249   :  { %950 = vsyncpa [#allocation5], 1 }

// kernel: cnn_forward.4
= control target key start
LH: loop header
LB: loop body
LE: loop exit
PB: predicated region body
PF: predicated region fallthrough
CT: control target
= control target key end

     0   :  { %vm990_vm0 = vcmask 519168   ;;  %s1872_s1 = inlined_call_operand.vmem [shape: bf16[512,256], index: 1, kind: input, shape index: {}]   ;;  %s1873_s0 = inlined_call_operand.vmem [shape: bf16[128,512], index: 0, kind: input, shape index: {}]   ;;  %s1874_s2 = inlined_call_operand.vmem [shape: f32[1,256], index: 2, kind: input, shape index: {}]   ;;  %s1875_s3 = inlined_call_operand.vmem [shape: bf16[128,64], index: 3, kind: output, shape index: {}]  }
   0x1   :  { %v1244_v0 = vld [vmem:[%s1872_s1 + $0x4] ss:$8 sps:$4 sm:$0xff]   ;;  %v1248_v2 = vld [vmem:[%s1872_s1] ss:$8 sps:$4 sm:$0xff]   ;;  %v1250_v4 = vld [vmem:[%s1872_s1 + $0x14] ss:$8 sps:$4 sm:$0xff]  }
   0x2   :  { %v1246_v1 = vld [vmem:[%s1872_s1 + $0x104] ss:$8 sps:$4 sm:$0xff]   ;;  %602 = vmatprep.subr.bf16.mxu1 %v1244_v0  ;;  %v1249_v3 = vld [vmem:[%s1872_s1 + $0x100] ss:$8 sps:$4 sm:$0xff]   ;;  %v1252_v5 = vld [vmem:[%s1872_s1 + $0x114] ss:$8 sps:$4 sm:$0xff]  }
   0x3   :  { %715 = vmatprep.subr.bf16.mxu0 %v1246_v1  ;;  %603 = vmatpush1.bf16.msra.mxu1 %v1248_v2  ;;  %v1254_v6 = vld [vmem:[%s1872_s1 + $0x10] ss:$8 sps:$4 sm:$0xff]   ;;  %v1256_v8 = vld [vmem:[%s1872_s1 + $0x24] ss:$8 sps:$4 sm:$0xff]   ;;  %v1260_v10 = vld [vmem:[%s1872_s1 + $0x20] ss:$8 sps:$4 sm:$0xff]  }
   0x4   :  { %716 = vmatpush1.bf16.msra.mxu0 %v1249_v3  ;;  %604 = vmatprep.subr.bf16.mxu1 %v1250_v4  ;;  %v1255_v7 = vld [vmem:[%s1872_s1 + $0x110] ss:$8 sps:$4 sm:$0xff]   ;;  %v1258_v9 = vld [vmem:[%s1872_s1 + $0x124] ss:$8 sps:$4 sm:$0xff]   ;;  %v1261_v11 = vld [vmem:[%s1872_s1 + $0x120] ss:$8 sps:$4 sm:$0xff]  }
   0x5   :  { %717 = vmatprep.subr.bf16.mxu0 %v1252_v5  ;;  %v1262_v12 = vld [vmem:[%s1872_s1 + $0x34] ss:$8 sps:$4 sm:$0xff]   ;;  %v1266_v14 = vld [vmem:[%s1872_s1 + $0x30] ss:$8 sps:$4 sm:$0xff]   ;;  %v1268_v16 = vld [vmem:[%s1872_s1 + $0x44] ss:$8 sps:$4 sm:$0xff]  }
   0x6   :  { %v1264_v13 = vld [vmem:[%s1872_s1 + $0x134] ss:$8 sps:$4 sm:$0xff]   ;;  %v1267_v15 = vld [vmem:[%s1872_s1 + $0x130] ss:$8 sps:$4 sm:$0xff]   ;;  %v1270_v17 = vld [vmem:[%s1872_s1 + $0x144] ss:$8 sps:$4 sm:$0xff]  }
   0x7   :  { %605 = vmatpush1.bf16.msra.mxu1 %v1254_v6  ;;  %v1272_v18 = vld [vmem:[%s1872_s1 + $0x40] ss:$8 sps:$4 sm:$0xff]   ;;  %v1274_v20 = vld [vmem:[%s1872_s1 + $0x54] ss:$8 sps:$4 sm:$0xff]   ;;  %v1278_v22 = vld [vmem:[%s1872_s1 + $0x50] ss:$8 sps:$4 sm:$0xff]  }
   0x8   :  { %718 = vmatpush1.bf16.msra.mxu0 %v1255_v7  ;;  %606 = vmatprep.subr.bf16.mxu1 %v1256_v8  ;;  %v1273_v19 = vld [vmem:[%s1872_s1 + $0x140] ss:$8 sps:$4 sm:$0xff]   ;;  %v1276_v21 = vld [vmem:[%s1872_s1 + $0x154] ss:$8 sps:$4 sm:$0xff]   ;;  %v1279_v23 = vld [vmem:[%s1872_s1 + $0x150] ss:$8 sps:$4 sm:$0xff]  }
   0x9   :  { %719 = vmatprep.subr.bf16.mxu0 %v1258_v9  ;;  %v1280_v24 = vld [vmem:[%s1872_s1 + $0x64] ss:$8 sps:$4 sm:$0xff]   ;;  %v1284_v26 = vld [vmem:[%s1872_s1 + $0x60] ss:$8 sps:$4 sm:$0xff]   ;;  %v1286_v28 = vld [vmem:[%s1872_s1 + $0x74] ss:$8 sps:$4 sm:$0xff]  }
   0xa   :  { %v1282_v25 = vld [vmem:[%s1872_s1 + $0x164] ss:$8 sps:$4 sm:$0xff]   ;;  %v1285_v27 = vld [vmem:[%s1872_s1 + $0x160] ss:$8 sps:$4 sm:$0xff]   ;;  %v1288_v29 = vld [vmem:[%s1872_s1 + $0x174] ss:$8 sps:$4 sm:$0xff]  }
   0xb   :  { %607 = vmatpush1.bf16.msra.mxu1 %v1260_v10  ;;  %v1290_v30 = vld [vmem:[%s1872_s1 + $0x70] ss:$8 sps:$4 sm:$0xff]   ;;  %v1292_v32 = vld [vmem:[%s1872_s1 + $0x84] ss:$8 sps:$4 sm:$0xff]   ;;  %v1296_v34 = vld [vmem:[%s1872_s1 + $0x80] ss:$8 sps:$4 sm:$0xff]  }
   0xc   :  { %720 = vmatpush1.bf16.msra.mxu0 %v1261_v11  ;;  %608 = vmatprep.subr.bf16.mxu1 %v1262_v12  ;;  %v1291_v31 = vld [vmem:[%s1872_s1 + $0x170] ss:$8 sps:$4 sm:$0xff]   ;;  %v1294_v33 = vld [vmem:[%s1872_s1 + $0x184] ss:$8 sps:$4 sm:$0xff]   ;;  %v1297_v35 = vld [vmem:[%s1872_s1 + $0x180] ss:$8 sps:$4 sm:$0xff]  }
   0xd   :  { %721 = vmatprep.subr.bf16.mxu0 %v1264_v13  ;;  %v1298_v36 = vld [vmem:[%s1872_s1 + $0x94] ss:$8 sps:$4 sm:$0xff]   ;;  %v1302_v38 = vld [vmem:[%s1872_s1 + $0x90] ss:$8 sps:$4 sm:$0xff]   ;;  %v1304_v40 = vld [vmem:[%s1872_s1 + $0xa4] ss:$8 sps:$4 sm:$0xff]  }
   0xe   :  { %v1300_v37 = vld [vmem:[%s1872_s1 + $0x194] ss:$8 sps:$4 sm:$0xff]   ;;  %v1303_v39 = vld [vmem:[%s1872_s1 + $0x190] ss:$8 sps:$4 sm:$0xff]   ;;  %v1306_v41 = vld [vmem:[%s1872_s1 + $0x1a4] ss:$8 sps:$4 sm:$0xff]  }
   0xf   :  { %609 = vmatpush1.bf16.msra.mxu1 %v1266_v14  ;;  %v1308_v42 = vld [vmem:[%s1872_s1 + $0xa0] ss:$8 sps:$4 sm:$0xff]   ;;  %v1310_v44 = vld [vmem:[%s1872_s1 + $0xb4] ss:$8 sps:$4 sm:$0xff]   ;;  %v1314_v46 = vld [vmem:[%s1872_s1 + $0xb0] ss:$8 sps:$4 sm:$0xff]  }
  0x10   :  { %722 = vmatpush1.bf16.msra.mxu0 %v1267_v15  ;;  %610 = vmatprep.subr.bf16.mxu1 %v1268_v16  ;;  %v1309_v43 = vld [vmem:[%s1872_s1 + $0x1a0] ss:$8 sps:$4 sm:$0xff]   ;;  %v1312_v45 = vld [vmem:[%s1872_s1 + $0x1b4] ss:$8 sps:$4 sm:$0xff]   ;;  %v1315_v47 = vld [vmem:[%s1872_s1 + $0x1b0] ss:$8 sps:$4 sm:$0xff]  }
  0x11   :  { %723 = vmatprep.subr.bf16.mxu0 %v1270_v17  ;;  %v1316_v48 = vld [vmem:[%s1872_s1 + $0xc4] ss:$8 sps:$4 sm:$0xff]   ;;  %v1320_v52 = vld [vmem:[%s1872_s1 + $0xc0] ss:$8 sps:$4 sm:$0xff]   ;;  %v1322_v54 = vld [vmem:[%s1872_s1 + $0xd4] ss:$8 sps:$4 sm:$0xff]  }
  0x12   :  { %v1342_v49 = vld [vmem:[%s1873_s0 + $0x4] ss:$16 sps:$4 sm:$0xff]   ;;  %v1345_v51 = vld [vmem:[%s1873_s0 + $0xc] ss:$16 sps:$4 sm:$0xff]   ;;  %v1321_v53 = vld [vmem:[%s1872_s1 + $0x1c0] ss:$8 sps:$4 sm:$0xff]  }
  0x13   :  { %611 = vmatpush1.bf16.msra.mxu1 %v1272_v18  ;;  %v1318_v50 = vld [vmem:[%s1872_s1 + $0x1c4] ss:$8 sps:$4 sm:$0xff]   ;;  %634 = vmatprep.mubr.bf16.mxu1 %v1342_v49  ;;  %v1324_v55 = vld [vmem:[%s1872_s1 + $0x1d4] ss:$8 sps:$4 sm:$0xff]   ;;  %v1326_v56 = vld [vmem:[%s1872_s1 + $0xd0] ss:$8 sps:$4 sm:$0xff]  }
  0x14   :  { %724 = vmatpush1.bf16.msra.mxu0 %v1273_v19  ;;  %612 = vmatprep.subr.bf16.mxu1 %v1274_v20  ;;  %v1327_v57 = vld [vmem:[%s1872_s1 + $0x1d0] ss:$8 sps:$4 sm:$0xff]   ;;  %v1328_v58 = vld [vmem:[%s1872_s1 + $0xe4] ss:$8 sps:$4 sm:$0xff]   ;;  %v1332_v60 = vld [vmem:[%s1872_s1 + $0xe0] ss:$8 sps:$4 sm:$0xff]  }
  0x15   :  { %725 = vmatprep.subr.bf16.mxu0 %v1276_v21  ;;  %747 = vmatprep.mubr.bf16.mxu0 %v1345_v51  ;;  %v1330_v59 = vld [vmem:[%s1872_s1 + $0x1e4] ss:$8 sps:$4 sm:$0xff]   ;;  %v1333_v61 = vld [vmem:[%s1872_s1 + $0x1e0] ss:$8 sps:$4 sm:$0xff]   ;;  %v1334_v62 = vld [vmem:[%s1872_s1 + $0xf4] ss:$8 sps:$4 sm:$0xff]  }
  0x16   :  { %v1336_v63 = vld [vmem:[%s1872_s1 + $0x1f4] ss:$8 sps:$4 sm:$0xff]   ;;  %v1338_v0 = vld [vmem:[%s1872_s1 + $0xf0] ss:$8 sps:$4 sm:$0xff]  }
  0x17   :  { %613 = vmatpush1.bf16.msra.mxu1 %v1278_v22  ;;  %v1339_v1 = vld [vmem:[%s1872_s1 + $0x1f0] ss:$8 sps:$4 sm:$0xff]   ;;  %v1346_v4 = vld [vmem:[%s1873_s0 + $0x24] ss:$16 sps:$4 sm:$0xff]   ;;  %v1348_v5 = vld [vmem:[%s1873_s0 + $0x2c] ss:$16 sps:$4 sm:$0xff]  }
  0x18   :  { %726 = vmatpush1.bf16.msra.mxu0 %v1279_v23  ;;  %614 = vmatprep.subr.bf16.mxu1 %v1280_v24  ;;  %v1340_v2 = vld [vmem:[%s1873_s0] ss:$16 sps:$4 sm:$0xff]   ;;  %v1343_v3 = vld [vmem:[%s1873_s0 + $0x8] ss:$16 sps:$4 sm:$0xff]   ;;  %v1352_v8 = vld [vmem:[%s1873_s0 + $0x44] ss:$16 sps:$4 sm:$0xff]  }
  0x19   :  { %727 = vmatprep.subr.bf16.mxu0 %v1282_v25  ;;  %v1350_v6 = vld [vmem:[%s1873_s0 + $0x20] ss:$16 sps:$4 sm:$0xff]   ;;  %v1351_v7 = vld [vmem:[%s1873_s0 + $0x28] ss:$16 sps:$4 sm:$0xff]   ;;  %v1354_v9 = vld [vmem:[%s1873_s0 + $0x4c] ss:$16 sps:$4 sm:$0xff]  }
  0x1a   :  { %v1356_v10 = vld [vmem:[%s1873_s0 + $0x40] ss:$16 sps:$4 sm:$0xff]   ;;  %v1357_v11 = vld [vmem:[%s1873_s0 + $0x48] ss:$16 sps:$4 sm:$0xff]   ;;  %v1358_v12 = vld [vmem:[%s1873_s0 + $0x64] ss:$16 sps:$4 sm:$0xff]  }
  0x1b   :  { %615 = vmatpush1.bf16.msra.mxu1 %v1284_v26  ;;  %v1360_v13 = vld [vmem:[%s1873_s0 + $0x6c] ss:$16 sps:$4 sm:$0xff]   ;;  %v1362_v14 = vld [vmem:[%s1873_s0 + $0x60] ss:$16 sps:$4 sm:$0xff]   ;;  %v1363_v15 = vld [vmem:[%s1873_s0 + $0x68] ss:$16 sps:$4 sm:$0xff]  }
  0x1c   :  { %728 = vmatpush1.bf16.msra.mxu0 %v1285_v27  ;;  %616 = vmatprep.subr.bf16.mxu1 %v1286_v28  ;;  %v1364_v16 = vld [vmem:[%s1873_s0 + $0x84] ss:$16 sps:$4 sm:$0xff]   ;;  %v1366_v17 = vld [vmem:[%s1873_s0 + $0x8c] ss:$16 sps:$4 sm:$0xff]   ;;  %v1368_v18 = vld [vmem:[%s1873_s0 + $0x80] ss:$16 sps:$4 sm:$0xff]  }
  0x1d   :  { %729 = vmatprep.subr.bf16.mxu0 %v1288_v29  ;;  %v1369_v19 = vld [vmem:[%s1873_s0 + $0x88] ss:$16 sps:$4 sm:$0xff]   ;;  %v1370_v20 = vld [vmem:[%s1873_s0 + $0xa4] ss:$16 sps:$4 sm:$0xff]   ;;  %v1372_v21 = vld [vmem:[%s1873_s0 + $0xac] ss:$16 sps:$4 sm:$0xff]  }
  0x1e   :  { %v1374_v22 = vld [vmem:[%s1873_s0 + $0xa0] ss:$16 sps:$4 sm:$0xff]   ;;  %v1375_v23 = vld [vmem:[%s1873_s0 + $0xa8] ss:$16 sps:$4 sm:$0xff]   ;;  %v1376_v24 = vld [vmem:[%s1873_s0 + $0xc4] ss:$16 sps:$4 sm:$0xff]  }
  0x1f   :  { %617 = vmatpush1.bf16.msra.mxu1 %v1290_v30  ;;  %v1378_v25 = vld [vmem:[%s1873_s0 + $0xcc] ss:$16 sps:$4 sm:$0xff]   ;;  %v1380_v26 = vld [vmem:[%s1873_s0 + $0xc0] ss:$16 sps:$4 sm:$0xff]   ;;  %v1381_v27 = vld [vmem:[%s1873_s0 + $0xc8] ss:$16 sps:$4 sm:$0xff]  }
  0x20   :  { %730 = vmatpush1.bf16.msra.mxu0 %v1291_v31  ;;  %618 = vmatprep.subr.bf16.mxu1 %v1292_v32  ;;  %v1382_v28 = vld [vmem:[%s1873_s0 + $0xe4] ss:$16 sps:$4 sm:$0xff]   ;;  %v1384_v29 = vld [vmem:[%s1873_s0 + $0xec] ss:$16 sps:$4 sm:$0xff]   ;;  %v1386_v30 = vld [vmem:[%s1873_s0 + $0xe0] ss:$16 sps:$4 sm:$0xff]   ;;  %v112_v32 = vlaneseq }
  0x21   :  { %731 = vmatprep.subr.bf16.mxu0 %v1294_v33  ;;  %v1387_v31 = vld [vmem:[%s1873_s0 + $0xe8] ss:$16 sps:$4 sm:$0xff]   ;;  %s1388_s0 = smov 64  }
  0x22   :  { %v113_v33 = vshrl.u32 %v112_v32, 7 }
  0x23   :  { %619 = vmatpush1.bf16.msra.mxu1 %v1296_v34 }
  0x24   :  { %732 = vmatpush1.bf16.msra.mxu0 %v1297_v35  ;;  %620 = vmatprep.subr.bf16.mxu1 %v1298_v36  ;;  %v114_v34 = vsub.s32 0, %v113_v33  ;;  %v110_v35 = vld [vmem:[%s1874_s2] sm:$0x3]  ;;  %v118_v36 = vsub.s32 1, %v113_v33 }
  0x25   :  { %733 = vmatprep.subr.bf16.mxu0 %v1300_v37 }
  0x26   :  { %v1700_v37 = vrot.slane %v110_v35, %v114_v34 }
  0x27   :  { %621 = vmatpush1.bf16.msra.mxu1 %v1302_v38  ;;  %v1702_v38 = vrot.slane %v110_v35, %v118_v36 }
  0x28   :  { %734 = vmatpush1.bf16.msra.mxu0 %v1303_v39  ;;  %622 = vmatprep.subr.bf16.mxu1 %v1304_v40 }
  0x29   :  { %735 = vmatprep.subr.bf16.mxu0 %v1306_v41 }
  0x2b   :  { %623 = vmatpush1.bf16.msra.mxu1 %v1308_v42 }
  0x2c   :  { %736 = vmatpush1.bf16.msra.mxu0 %v1309_v43  ;;  %624 = vmatprep.subr.bf16.mxu1 %v1310_v44 }
  0x2d   :  { %737 = vmatprep.subr.bf16.mxu0 %v1312_v45 }
  0x2f   :  { %625 = vmatpush1.bf16.msra.mxu1 %v1314_v46 }
  0x30   :  { %738 = vmatpush1.bf16.msra.mxu0 %v1315_v47  ;;  %626 = vmatprep.subr.bf16.mxu1 %v1316_v48 }
  0x31   :  { %739 = vmatprep.subr.bf16.mxu0 %v1318_v50 }
  0x33   :  { %627 = vmatpush1.bf16.msra.mxu1 %v1320_v52 }
  0x34   :  { %740 = vmatpush1.bf16.msra.mxu0 %v1321_v53  ;;  %628 = vmatprep.subr.bf16.mxu1 %v1322_v54 }
  0x35   :  { %741 = vmatprep.subr.bf16.mxu0 %v1324_v55 }
  0x37   :  { %629 = vmatpush1.bf16.msra.mxu1 %v1326_v56 }
  0x38   :  { %742 = vmatpush1.bf16.msra.mxu0 %v1327_v57  ;;  %630 = vmatprep.subr.bf16.mxu1 %v1328_v58 }
  0x39   :  { %743 = vmatprep.subr.bf16.mxu0 %v1330_v59 }
  0x3b   :  { %631 = vmatpush1.bf16.msra.mxu1 %v1332_v60 }
  0x3c   :  { %744 = vmatpush1.bf16.msra.mxu0 %v1333_v61  ;;  %632 = vmatprep.subr.bf16.mxu1 %v1334_v62 }
  0x3d   :  { %745 = vmatprep.subr.bf16.mxu0 %v1336_v63 }
  0x3f   :  { %633 = vmatpush1.bf16.msra.mxu1 %v1338_v0 }
  0x40   :  { %746 = vmatpush1.bf16.msra.mxu0 %v1339_v1 }
  0x42   :  { %635 = vmatmul.mubr.bf16.vlgmr.msra.gmra.mrb[0].mxu1 %v1340_v2 }
  0x43   :  { %748 = vmatmul.mubr.bf16.vlgmr.msra.gmra.mrb[0].mxu0 %v1343_v3  ;;  %644 = vmatprep.mubr.bf16.mxu1 %v1346_v4 }
  0x44   :  { %757 = vmatprep.mubr.bf16.mxu0 %v1348_v5 }
  0x4a   :  { %645 = vmatmul.mubr.bf16.gmra.mrb[4].mxu1 %v1350_v6 }
  0x4b   :  { %758 = vmatmul.mubr.bf16.gmra.mrb[4].mxu0 %v1351_v7  ;;  %654 = vmatprep.mubr.bf16.mxu1 %v1352_v8 }
  0x4c   :  { %767 = vmatprep.mubr.bf16.mxu0 %v1354_v9 }
  0x52   :  { %655 = vmatmul.mubr.bf16.gmra.mrb[8].mxu1 %v1356_v10 }
  0x53   :  { %768 = vmatmul.mubr.bf16.gmra.mrb[8].mxu0 %v1357_v11  ;;  %664 = vmatprep.mubr.bf16.mxu1 %v1358_v12 }
  0x54   :  { %777 = vmatprep.mubr.bf16.mxu0 %v1360_v13 }
  0x5a   :  { %665 = vmatmul.mubr.bf16.gmra.mrb[12].mxu1 %v1362_v14 }
  0x5b   :  { %778 = vmatmul.mubr.bf16.gmra.mrb[12].mxu0 %v1363_v15  ;;  %674 = vmatprep.mubr.bf16.mxu1 %v1364_v16 }
  0x5c   :  { %787 = vmatprep.mubr.bf16.mxu0 %v1366_v17 }
  0x62   :  { %675 = vmatmul.mubr.bf16.gmra.mrb[16].mxu1 %v1368_v18 }
  0x63   :  { %788 = vmatmul.mubr.bf16.gmra.mrb[16].mxu0 %v1369_v19  ;;  %684 = vmatprep.mubr.bf16.mxu1 %v1370_v20 }
  0x64   :  { %797 = vmatprep.mubr.bf16.mxu0 %v1372_v21 }
  0x6a   :  { %685 = vmatmul.mubr.bf16.gmra.mrb[20].mxu1 %v1374_v22 }
  0x6b   :  { %798 = vmatmul.mubr.bf16.gmra.mrb[20].mxu0 %v1375_v23  ;;  %694 = vmatprep.mubr.bf16.mxu1 %v1376_v24 }
  0x6c   :  { %807 = vmatprep.mubr.bf16.mxu0 %v1378_v25 }
  0x72   :  { %695 = vmatmul.mubr.bf16.gmra.mrb[24].mxu1 %v1380_v26 }
  0x73   :  { %808 = vmatmul.mubr.bf16.gmra.mrb[24].mxu0 %v1381_v27  ;;  %704 = vmatprep.mubr.bf16.mxu1 %v1382_v28 }
  0x74   :  { %817 = vmatprep.mubr.bf16.mxu0 %v1384_v29 }
  0x7a   :  { %705 = vmatmul.mubr.bf16.gmra.mrb[28].mxu1 %v1386_v30 }
  0x7b   :  { %818 = vmatmul.mubr.bf16.gmra.mrb[28].mxu0 %v1387_v31 }
 0x115   :  { %v636_v39 = vpop.f32.mrb[0].mxu1 }
 0x116   :  { %v749_v40 = vpop.f32.mrb[0].mxu0  ;;  %v637_v41 = vadd.f32 %v636_v39, %v1700_v37  ;;  %v638_v42 = vpop.f32.mrb[1].mxu1 }
 0x117   :  { %v751_v43 = vpop.f32.mrb[1].mxu0  ;;  %v639_v44 = vadd.f32 %v638_v42, %v1702_v38  ;;  %v640_v45 = vpop.f32.mrb[2].mxu1 }
 0x118   :  { %v753_v46 = vpop.f32.mrb[2].mxu0  ;;  %v750_v47 = vadd.f32 %v749_v40, %v637_v41  ;;  %v641_v48 = vadd.f32 %v640_v45, %v1700_v37  ;;  %v642_v49 = vpop.f32.mrb[3].mxu1 }
 0x119   :  { %v755_v50 = vpop.f32.mrb[3].mxu0  ;;  %v752_v51 = vadd.f32 %v751_v43, %v639_v44  ;;  %v643_v52 = vadd.f32 %v642_v49, %v1702_v38 }
 0x11a   :  { %v828_v53 = vmax.f32 %v750_v47, 0.0  ;;  %v754_v54 = vadd.f32 %v753_v46, %v641_v48 }
 0x11b   :  { %v829_v55 = vmax.f32 %v752_v51, 0.0  ;;  %v756_v56 = vadd.f32 %v755_v50, %v643_v52 }
 0x11c   :  { %v830_v57 = vmax.f32 %v754_v54, 0.0 }
 0x11d   :  { %v1708_v58 = vmax.f32 %v828_v53, %v829_v55  ;;  %v831_v59 = vmax.f32 %v756_v56, 0.0  ;;  %v646_v60 = vpop.f32.mrb[4].mxu1 }
 0x11e   :  { %v759_v61 = vpop.f32.mrb[4].mxu0  ;;  %v647_v62 = vadd.f32 %v646_v60, %v1700_v37  ;;  %v648_v63 = vpop.f32.mrb[5].mxu1 }
 0x11f   :  { %v761_v0 = vpop.f32.mrb[5].mxu0  ;;  %v1711_v1 = vmax.f32 %v830_v57, %v831_v59  ;;  %v649_v2 = vadd.f32 %v648_v63, %v1702_v38  ;;  %v650_v3 = vpop.f32.mrb[6].mxu1 }
 0x120   :  { %v763_v4 = vpop.f32.mrb[6].mxu0  ;;  %v760_v5 = vadd.f32 %v759_v61, %v647_v62  ;;  %v651_v6 = vadd.f32 %v650_v3, %v1700_v37  ;;  %v652_v7 = vpop.f32.mrb[7].mxu1 }
 0x121   :  { %v765_v8 = vpop.f32.mrb[7].mxu0  ;;  %v762_v9 = vadd.f32 %v761_v0, %v649_v2  ;;  %v653_v10 = vadd.f32 %v652_v7, %v1702_v38  ;;  %v1204_v11 = vpack.i.bf16 %v1711_v1, %v1708_v58 }
 0x122   :  { %v832_v12 = vmax.f32 %v760_v5, 0.0  ;;  %v764_v13 = vadd.f32 %v763_v4, %v651_v6 }
 0x123   :  { %v833_v14 = vmax.f32 %v762_v9, 0.0  ;;  %v766_v15 = vadd.f32 %v765_v8, %v653_v10  ;;  %1205 = vrot.lane.b32.xlu0 %v1204_v11, %s1388_s0 }
 0x124   :  { %v834_v16 = vmax.f32 %v764_v13, 0.0 }
 0x125   :  { %v1719_v17 = vmax.f32 %v832_v12, %v833_v14  ;;  %v835_v18 = vmax.f32 %v766_v15, 0.0  ;;  %v656_v19 = vpop.f32.mrb[8].mxu1 }
 0x126   :  { %v769_v20 = vpop.f32.mrb[8].mxu0  ;;  %v657_v21 = vadd.f32 %v656_v19, %v1700_v37  ;;  %v658_v22 = vpop.f32.mrb[9].mxu1 }
 0x127   :  { %v771_v23 = vpop.f32.mrb[9].mxu0  ;;  %v1722_v24 = vmax.f32 %v834_v16, %v835_v18  ;;  %v659_v25 = vadd.f32 %v658_v22, %v1702_v38  ;;  %v660_v26 = vpop.f32.mrb[10].mxu1 }
 0x128   :  { %v773_v27 = vpop.f32.mrb[10].mxu0  ;;  %v770_v28 = vadd.f32 %v769_v20, %v657_v21  ;;  %v661_v29 = vadd.f32 %v660_v26, %v1700_v37  ;;  %v662_v30 = vpop.f32.mrb[11].mxu1 }
 0x129   :  { %v775_v31 = vpop.f32.mrb[11].mxu0  ;;  %v772_v32 = vadd.f32 %v771_v23, %v659_v25  ;;  %v663_v33 = vadd.f32 %v662_v30, %v1702_v38  ;;  %v1209_v34 = vpack.i.bf16 %v1722_v24, %v1719_v17 }
 0x12a   :  { %v836_v35 = vmax.f32 %v770_v28, 0.0  ;;  %v774_v36 = vadd.f32 %v773_v27, %v661_v29 }
 0x12b   :  { %v837_v39 = vmax.f32 %v772_v32, 0.0  ;;  %v776_v40 = vadd.f32 %v775_v31, %v663_v33  ;;  %1210 = vrot.lane.b32.xlu0 %v1209_v34, %s1388_s0 }
 0x12c   :  { %v838_v41 = vmax.f32 %v774_v36, 0.0 }
 0x12d   :  { %v1730_v42 = vmax.f32 %v836_v35, %v837_v39  ;;  %v839_v43 = vmax.f32 %v776_v40, 0.0  ;;  %v666_v44 = vpop.f32.mrb[12].mxu1 }
 0x12e   :  { %v779_v45 = vpop.f32.mrb[12].mxu0  ;;  %v667_v46 = vadd.f32 %v666_v44, %v1700_v37  ;;  %v668_v47 = vpop.f32.mrb[13].mxu1 }
 0x12f   :  { %v781_v48 = vpop.f32.mrb[13].mxu0  ;;  %v1733_v49 = vmax.f32 %v838_v41, %v839_v43  ;;  %v669_v50 = vadd.f32 %v668_v47, %v1702_v38  ;;  %v670_v51 = vpop.f32.mrb[14].mxu1 }
 0x130   :  { %v783_v52 = vpop.f32.mrb[14].mxu0  ;;  %v780_v53 = vadd.f32 %v779_v45, %v667_v46  ;;  %v671_v54 = vadd.f32 %v670_v51, %v1700_v37  ;;  %v672_v55 = vpop.f32.mrb[15].mxu1 }
 0x131   :  { %v785_v56 = vpop.f32.mrb[15].mxu0  ;;  %v782_v57 = vadd.f32 %v781_v48, %v669_v50  ;;  %v673_v59 = vadd.f32 %v672_v55, %v1702_v38  ;;  %v1214_v60 = vpack.i.bf16 %v1733_v49, %v1730_v42 }
 0x132   :  { %v840_v61 = vmax.f32 %v780_v53, 0.0  ;;  %v784_v62 = vadd.f32 %v783_v52, %v671_v54 }
 0x133   :  { %v841_v63 = vmax.f32 %v782_v57, 0.0  ;;  %v786_v0 = vadd.f32 %v785_v56, %v673_v59  ;;  %1215 = vrot.lane.b32.xlu1 %v1214_v60, %s1388_s0 }
 0x134   :  { %v842_v2 = vmax.f32 %v784_v62, 0.0 }
 0x135   :  { %v1741_v3 = vmax.f32 %v840_v61, %v841_v63  ;;  %v843_v4 = vmax.f32 %v786_v0, 0.0  ;;  %v676_v5 = vpop.f32.mrb[16].mxu1 }
 0x136   :  { %v789_v6 = vpop.f32.mrb[16].mxu0  ;;  %v677_v7 = vadd.f32 %v676_v5, %v1700_v37  ;;  %v678_v8 = vpop.f32.mrb[17].mxu1 }
 0x137   :  { %v791_v9 = vpop.f32.mrb[17].mxu0  ;;  %v1744_v10 = vmax.f32 %v842_v2, %v843_v4  ;;  %v679_v11 = vadd.f32 %v678_v8, %v1702_v38  ;;  %v680_v12 = vpop.f32.mrb[18].mxu1 }
 0x138   :  { %v793_v13 = vpop.f32.mrb[18].mxu0  ;;  %v790_v14 = vadd.f32 %v789_v6, %v677_v7  ;;  %v681_v15 = vadd.f32 %v680_v12, %v1700_v37  ;;  %v682_v16 = vpop.f32.mrb[19].mxu1 }
 0x139   :  { %v795_v18 = vpop.f32.mrb[19].mxu0  ;;  %v792_v19 = vadd.f32 %v791_v9, %v679_v11  ;;  %v683_v20 = vadd.f32 %v682_v16, %v1702_v38  ;;  %v1219_v21 = vpack.i.bf16 %v1744_v10, %v1741_v3 }
 0x13a   :  { %v844_v22 = vmax.f32 %v790_v14, 0.0  ;;  %v794_v23 = vadd.f32 %v793_v13, %v681_v15 }
 0x13b   :  { %v845_v25 = vmax.f32 %v792_v19, 0.0  ;;  %v796_v26 = vadd.f32 %v795_v18, %v683_v20  ;;  %1220 = vrot.lane.b32.xlu1 %v1219_v21, %s1388_s0 }
 0x13c   :  { %v846_v27 = vmax.f32 %v794_v23, 0.0 }
 0x13d   :  { %v1752_v28 = vmax.f32 %v844_v22, %v845_v25  ;;  %v847_v29 = vmax.f32 %v796_v26, 0.0  ;;  %v686_v30 = vpop.f32.mrb[20].mxu1 }
 0x13e   :  { %v799_v31 = vpop.f32.mrb[20].mxu0  ;;  %v687_v32 = vadd.f32 %v686_v30, %v1700_v37  ;;  %v688_v33 = vpop.f32.mrb[21].mxu1 }
 0x13f   :  { %v801_v34 = vpop.f32.mrb[21].mxu0  ;;  %v1755_v35 = vmax.f32 %v846_v27, %v847_v29  ;;  %v689_v36 = vadd.f32 %v688_v33, %v1702_v38  ;;  %v690_v39 = vpop.f32.mrb[22].mxu1 }
 0x140   :  { %v803_v40 = vpop.f32.mrb[22].mxu0  ;;  %v800_v41 = vadd.f32 %v799_v31, %v687_v32  ;;  %v691_v43 = vadd.f32 %v690_v39, %v1700_v37  ;;  %v692_v44 = vpop.f32.mrb[23].mxu1 }
 0x141   :  { %v805_v45 = vpop.f32.mrb[23].mxu0  ;;  %v802_v46 = vadd.f32 %v801_v34, %v689_v36  ;;  %v693_v47 = vadd.f32 %v692_v44, %v1702_v38  ;;  %v1224_v48 = vpack.i.bf16 %v1755_v35, %v1752_v28 }
 0x142   :  { %v848_v50 = vmax.f32 %v800_v41, 0.0  ;;  %v804_v51 = vadd.f32 %v803_v40, %v691_v43 }
 0x143   :  { %v849_v52 = vmax.f32 %v802_v46, 0.0  ;;  %v806_v53 = vadd.f32 %v805_v45, %v693_v47  ;;  %1225 = vrot.lane.b32.xlu0 %v1224_v48, %s1388_s0 }
 0x144   :  { %v850_v54 = vmax.f32 %v804_v51, 0.0 }
 0x145   :  { %v1763_v55 = vmax.f32 %v848_v50, %v849_v52  ;;  %v851_v56 = vmax.f32 %v806_v53, 0.0  ;;  %v696_v57 = vpop.f32.mrb[24].mxu1 }
 0x146   :  { %v809_v59 = vpop.f32.mrb[24].mxu0  ;;  %v697_v60 = vadd.f32 %v696_v57, %v1700_v37  ;;  %v698_v61 = vpop.f32.mrb[25].mxu1 }
 0x147   :  { %v811_v62 = vpop.f32.mrb[25].mxu0  ;;  %v1766_v63 = vmax.f32 %v850_v54, %v851_v56  ;;  %v699_v0 = vadd.f32 %v698_v61, %v1702_v38  ;;  %v700_v2 = vpop.f32.mrb[26].mxu1 }
 0x148   :  { %v813_v4 = vpop.f32.mrb[26].mxu0  ;;  %v810_v5 = vadd.f32 %v809_v59, %v697_v60  ;;  %v701_v6 = vadd.f32 %v700_v2, %v1700_v37  ;;  %v702_v7 = vpop.f32.mrb[27].mxu1 }
 0x149   :  { %v815_v8 = vpop.f32.mrb[27].mxu0  ;;  %v812_v9 = vadd.f32 %v811_v62, %v699_v0  ;;  %v703_v11 = vadd.f32 %v702_v7, %v1702_v38  ;;  %v1229_v12 = vpack.i.bf16 %v1766_v63, %v1763_v55 }
 0x14a   :  { %v852_v13 = vmax.f32 %v810_v5, 0.0  ;;  %v814_v14 = vadd.f32 %v813_v4, %v701_v6 }
 0x14b   :  { %v853_v15 = vmax.f32 %v812_v9, 0.0  ;;  %v816_v16 = vadd.f32 %v815_v8, %v703_v11  ;;  %1230 = vrot.lane.b32.xlu1 %v1229_v12, %s1388_s0 }
 0x14c   :  { %v854_v18 = vmax.f32 %v814_v14, 0.0 }
 0x14d   :  { %v1774_v19 = vmax.f32 %v852_v13, %v853_v15  ;;  %v855_v20 = vmax.f32 %v816_v16, 0.0  ;;  %v706_v21 = vpop.f32.mrb[28].mxu1 }
 0x14e   :  { %v819_v22 = vpop.f32.mrb[28].mxu0  ;;  %v707_v23 = vadd.f32 %v706_v21, %v1700_v37  ;;  %v708_v25 = vpop.f32.mrb[29].mxu1 }
 0x14f   :  { %v821_v26 = vpop.f32.mrb[29].mxu0  ;;  %v1777_v27 = vmax.f32 %v854_v18, %v855_v20  ;;  %v709_v29 = vadd.f32 %v708_v25, %v1702_v38  ;;  %v710_v30 = vpop.f32.mrb[30].mxu1 }
 0x150   :  { %v823_v31 = vpop.f32.mrb[30].mxu0  ;;  %v820_v32 = vadd.f32 %v819_v22, %v707_v23  ;;  %v711_v33 = vadd.f32 %v710_v30, %v1700_v37  ;;  %v712_v34 = vpop.f32.mrb[31].mxu1 }
 0x151   :  { %v825_v36 = vpop.f32.mrb[31].mxu0  ;;  %v822_v39 = vadd.f32 %v821_v26, %v709_v29  ;;  %v713_v40 = vadd.f32 %v712_v34, %v1702_v38  ;;  %v1234_v41 = vpack.i.bf16 %v1777_v27, %v1774_v19 }
 0x152   :  { %v856_v43 = vmax.f32 %v820_v32, 0.0  ;;  %v824_v44 = vadd.f32 %v823_v31, %v711_v33 }
 0x153   :  { %v857_v45 = vmax.f32 %v822_v39, 0.0  ;;  %v826_v46 = vadd.f32 %v825_v36, %v713_v40  ;;  %1235 = vrot.lane.b32.xlu0 %v1234_v41, %s1388_s0 }
 0x154   :  { %v858_v47 = vmax.f32 %v824_v44, 0.0 }
 0x155   :  { %v1785_v48 = vmax.f32 %v856_v43, %v857_v45  ;;  %v859_v50 = vmax.f32 %v826_v46, 0.0 }
 0x157   :  { %v1787_v51 = vmax.f32 %v858_v47, %v859_v50 }
 0x159   :  { %v1239_v37 = vpack.i.bf16 %v1787_v51, %v1785_v48 }
 0x15b   :  { %1240 = vrot.lane.b32.xlu1 %v1239_v37, %s1388_s0 }
 0x195   :  { %v1206_v38 = vpop.permute.xlu0 %1205 }
 0x196   :  { %v1208_v52 = vunpack.i.h.bf16 %v1206_v38  ;;  %v1207_v53 = vunpack.i.l.bf16 %v1206_v38 }
 0x198   :  { %v911_v54 = vmax.f32 %v1711_v1, %v1208_v52  ;;  %v910_v56 = vmax.f32 %v1708_v58, %v1207_v53 }
 0x19a   :  { %v1124_v57 = vpack.c.bf16 %v911_v54, %v911_v54  ;;  %v1123_v59 = vpack.c.bf16 %v910_v56, %v910_v56 }
 0x19c   :  { %992 = vst.msk [vmem:[%s1875_s3 + $0x4] sm:$0xf] %vm990_vm0, %v1124_v57  ;;  %991 = vst.msk [vmem:[%s1875_s3] sm:$0xf] %vm990_vm0, %v1123_v59 }
 0x19d   :  { %v1211_v60 = vpop.permute.xlu0 %1210 }
 0x19e   :  { %v1213_v61 = vunpack.i.h.bf16 %v1211_v60  ;;  %v1212_v62 = vunpack.i.l.bf16 %v1211_v60 }
 0x1a0   :  { %v913_v1 = vmax.f32 %v1722_v24, %v1213_v61  ;;  %v912_v58 = vmax.f32 %v1719_v17, %v1212_v62 }
 0x1a2   :  { %v1126_v0 = vpack.c.bf16 %v913_v1, %v913_v1  ;;  %v1125_v2 = vpack.c.bf16 %v912_v58, %v912_v58 }
 0x1a4   :  { %994 = vst.msk [vmem:[%s1875_s3 + $0xc] sm:$0xf] %vm990_vm0, %v1126_v0  ;;  %993 = vst.msk [vmem:[%s1875_s3 + $0x8] sm:$0xf] %vm990_vm0, %v1125_v2 }
 0x1a5   :  { %v1216_v4 = vpop.permute.xlu1 %1215 }
 0x1a6   :  { %v1218_v5 = vunpack.i.h.bf16 %v1216_v4  ;;  %v1217_v6 = vunpack.i.l.bf16 %v1216_v4 }
 0x1a8   :  { %v915_v7 = vmax.f32 %v1733_v49, %v1218_v5  ;;  %v914_v24 = vmax.f32 %v1730_v42, %v1217_v6 }
 0x1aa   :  { %v1128_v17 = vpack.c.bf16 %v915_v7, %v915_v7  ;;  %v1127_v8 = vpack.c.bf16 %v914_v24, %v914_v24 }
 0x1ac   :  { %996 = vst.msk [vmem:[%s1875_s3 + $0x14] sm:$0xf] %vm990_vm0, %v1128_v17  ;;  %995 = vst.msk [vmem:[%s1875_s3 + $0x10] sm:$0xf] %vm990_vm0, %v1127_v8 }
 0x1ad   :  { %v1221_v9 = vpop.permute.xlu1 %1220 }
 0x1ae   :  { %v1223_v11 = vunpack.i.h.bf16 %v1221_v9  ;;  %v1222_v12 = vunpack.i.l.bf16 %v1221_v9 }
 0x1b0   :  { %v917_v13 = vmax.f32 %v1744_v10, %v1223_v11  ;;  %v916_v49 = vmax.f32 %v1741_v3, %v1222_v12 }
 0x1b2   :  { %v1130_v42 = vpack.c.bf16 %v917_v13, %v917_v13  ;;  %v1129_v14 = vpack.c.bf16 %v916_v49, %v916_v49 }
 0x1b4   :  { %998 = vst.msk [vmem:[%s1875_s3 + $0x1c] sm:$0xf] %vm990_vm0, %v1130_v42  ;;  %997 = vst.msk [vmem:[%s1875_s3 + $0x18] sm:$0xf] %vm990_vm0, %v1129_v14 }
 0x1b5   :  { %v1226_v15 = vpop.permute.xlu0 %1225 }
 0x1b6   :  { %v1228_v16 = vunpack.i.h.bf16 %v1226_v15  ;;  %v1227_v18 = vunpack.i.l.bf16 %v1226_v15 }
 0x1b8   :  { %v919_v20 = vmax.f32 %v1755_v35, %v1228_v16  ;;  %v918_v10 = vmax.f32 %v1752_v28, %v1227_v18 }
 0x1ba   :  { %v1132_v3 = vpack.c.bf16 %v919_v20, %v919_v20  ;;  %v1131_v21 = vpack.c.bf16 %v918_v10, %v918_v10 }
 0x1bc   :  { %1000 = vst.msk [vmem:[%s1875_s3 + $0x24] sm:$0xf] %vm990_vm0, %v1132_v3  ;;  %999 = vst.msk [vmem:[%s1875_s3 + $0x20] sm:$0xf] %vm990_vm0, %v1131_v21 }
 0x1bd   :  { %v1231_v22 = vpop.permute.xlu1 %1230 }
 0x1be   :  { %v1233_v23 = vunpack.i.h.bf16 %v1231_v22  ;;  %v1232_v25 = vunpack.i.l.bf16 %v1231_v22 }
 0x1c0   :  { %v921_v26 = vmax.f32 %v1766_v63, %v1233_v23  ;;  %v920_v35 = vmax.f32 %v1763_v55, %v1232_v25 }
 0x1c2   :  { %v1134_v28 = vpack.c.bf16 %v921_v26, %v921_v26  ;;  %v1133_v29 = vpack.c.bf16 %v920_v35, %v920_v35 }
 0x1c4   :  { %1002 = vst.msk [vmem:[%s1875_s3 + $0x2c] sm:$0xf] %vm990_vm0, %v1134_v28  ;;  %1001 = vst.msk [vmem:[%s1875_s3 + $0x28] sm:$0xf] %vm990_vm0, %v1133_v29 }
 0x1c5   :  { %v1236_v30 = vpop.permute.xlu0 %1235 }
 0x1c6   :  { %v1238_v31 = vunpack.i.h.bf16 %v1236_v30  ;;  %v1237_v32 = vunpack.i.l.bf16 %v1236_v30 }
 0x1c8   :  { %v923_v33 = vmax.f32 %v1777_v27, %v1238_v31  ;;  %v922_v63 = vmax.f32 %v1774_v19, %v1237_v32 }
 0x1ca   :  { %v1136_v55 = vpack.c.bf16 %v923_v33, %v923_v33  ;;  %v1135_v34 = vpack.c.bf16 %v922_v63, %v922_v63 }
 0x1cc   :  { %1004 = vst.msk [vmem:[%s1875_s3 + $0x34] sm:$0xf] %vm990_vm0, %v1136_v55  ;;  %1003 = vst.msk [vmem:[%s1875_s3 + $0x30] sm:$0xf] %vm990_vm0, %v1135_v34 }
 0x1cd   :  { %v1241_v36 = vpop.permute.xlu1 %1240 }
 0x1ce   :  { %v1243_v39 = vunpack.i.h.bf16 %v1241_v36  ;;  %v1242_v40 = vunpack.i.l.bf16 %v1241_v36 }
 0x1d0   :  { %v925_v41 = vmax.f32 %v1787_v51, %v1243_v39  ;;  %v924_v27 = vmax.f32 %v1785_v48, %v1242_v40 }
 0x1d2   :  { %v1138_v19 = vpack.c.bf16 %v925_v41, %v925_v41  ;;  %v1137_v43 = vpack.c.bf16 %v924_v27, %v924_v27 }
 0x1d4   :  { %1006 = vst.msk [vmem:[%s1875_s3 + $0x3c] sm:$0xf] %vm990_vm0, %v1138_v19  ;;  %1005 = vst.msk [vmem:[%s1875_s3 + $0x38] sm:$0xf] %vm990_vm0, %v1137_v43 }

// kernel: cnn_forward.5
= control target key start
LH: loop header
LB: loop body
LE: loop exit
PB: predicated region body
PF: predicated region fallthrough
CT: control target
= control target key end

     0   :  { %s3560_s18 = smov 0   ;;  %s3562_s19 = smov 0   ;;  %s4015_s0 = inlined_call_operand.vmem [shape: bf16[16,4096], index: 0, kind: input, shape index: {}]   ;;  %s4016_s1 = inlined_call_operand.vmem [shape: bf16[4096,512], index: 1, kind: input, shape index: {}]   ;;  %s4017_s2 = inlined_call_operand.vmem [shape: f32[1,512], index: 2, kind: input, shape index: {}]   ;;  %s4018_s3 = inlined_call_operand.vmem [shape: bf16[512,128], index: 3, kind: input, shape index: {}]   ;;  %s4019_s4 = inlined_call_operand.vmem [shape: f32[1,128], index: 4, kind: input, shape index: {}]   ;;  %s4020_s5 = inlined_call_operand.vmem [shape: f32[16,128], index: 5, kind: output, shape index: {}]  }
   0x1   :  { %s3564_s20 = smov 0  }
   0x2 LB: > { %s3576_s21 = sadd.s32 4294967295, %s3527_s20   ;;  %s3579_s22 = sadd.s32 1, %s3527_s20   ;;  %s3527_s20 = sphi %s3564_s20, %s4023_s20   ;;  %s3523_s19 = sphi %s3562_s19, %s4022_s19   ;;  %s3519_s18 = sphi %s3560_s18, %s4021_s18  }
   0x3   : > { %s19_s23 = ssub.s32 %s3527_s20, %s3579_s22  ;;  %s22_s24 = sadd.s32 1, %s3523_s19 }
   0x4   : > { %p20_p0 = scmp.eq.s32.totalorder %s19_s23, 0  ;;  %p29_p1 = scmp.ne.s32.totalorder %s3523_s19, %s3519_s18 }
   0x5   : > { %p30_p2 = scmp.eq.s32.totalorder %s3527_s20, 0  ;;  %p2684_p4 = scmp.ge.s32.totalorder %s3527_s20, 4 }
   0x6   : > { %s3588_s25 = scalar_select %p20_p0, %s3523_s19, %s22_s24  }
   0x7   : > { %p31_p3 = por %p30_p2, %p29_p1  ;;  %174 = sbr.rel (%p2684_p4) target bundleno = 22 (0x16), region = 28 }
   0xe   : > { %177 = sbr.rel (!%p31_p3) target bundleno = 22 (0x16), region = 32  ;;  %s179_s26 = sand.u32 (%p31_p3), 1, %s3523_s19  }
   0xf   : > { %s2994_s27 = sshll.u32 (%p31_p3), %s3527_s20, 5  ;;  %s2685_s28 = sshll.u32 (%p31_p3), %s179_s26, 6 }
  0x10   : > { %s184_s6 = scalar_lea.vmem (%p31_p3), %s4015_s0, %s2994_s27  ;;  %s181_s7 = scalar_lea.vmem (%p31_p3), [#allocation3], %s2685_s28 }
  0x11   : > { %v197_v0 = vld [vmem:[%s184_s6] sm:$0xff] (%p31_p3)  ;;  %v199_v1 = vld [vmem:[%s184_s6 + $0x8] sm:$0xff] (%p31_p3)  ;;  %v201_v2 = vld [vmem:[%s184_s6 + $0x10] sm:$0xff] (%p31_p3) }
  0x12   : > { %198 = vst [vmem:[%s181_s7] sm:$0xff] (%p31_p3), %v197_v0  ;;  %200 = vst [vmem:[%s181_s7 + $0x8] sm:$0xff] (%p31_p3), %v199_v1  ;;  %v203_v3 = vld [vmem:[%s184_s6 + $0x18] sm:$0xff] (%p31_p3)  ;;  %v205_v4 = vld [vmem:[%s184_s6 + $0x80] sm:$0xff] (%p31_p3) }
  0x13   : > { %202 = vst [vmem:[%s181_s7 + $0x10] sm:$0xff] (%p31_p3), %v201_v2  ;;  %v207_v5 = vld [vmem:[%s184_s6 + $0x88] sm:$0xff] (%p31_p3)  ;;  %204 = vst [vmem:[%s181_s7 + $0x18] sm:$0xff] (%p31_p3), %v203_v3  ;;  %v209_v6 = vld [vmem:[%s184_s6 + $0x90] sm:$0xff] (%p31_p3) }
  0x14   : > { %206 = vst [vmem:[%s181_s7 + $0x20] sm:$0xff] (%p31_p3), %v205_v4  ;;  %208 = vst [vmem:[%s181_s7 + $0x28] sm:$0xff] (%p31_p3), %v207_v5  ;;  %v211_v7 = vld [vmem:[%s184_s6 + $0x98] sm:$0xff] (%p31_p3) }
  0x15   : > { %210 = vst [vmem:[%s181_s7 + $0x30] sm:$0xff] %v209_v6  ;;  %212 = vst [vmem:[%s181_s7 + $0x38] sm:$0xff] %v211_v7 }
  0x16 PF: > { %p2688_p5 = scmp.ge.s32.totalorder %s3527_s20, 1  ;;  %p227_p6 = scmp.lt.s32.totalorder %s3527_s20, 5 }
  0x18   : > { %p228_p7 = pnand %p2688_p5, %p227_p6 }
  0x19   : > { %s234_s8 = sand.u32 (!%p228_p7), 1, %s3519_s18   ;;  %s2690_s9 = sshll.u32 (!%p228_p7), %s3576_s21, 7 }
  0x1a   : > { %231 = sbr.rel (%p228_p7) target bundleno = 751 (0x2ef), region = 59  ;;  %s2689_s10 = sshll.u32 (!%p228_p7), %s234_s8, 6 }
  0x1b   : > { %p264_p8 = scmp.lt.s32.totalorder (!%p228_p7), %s2690_s9, 511  ;;  %s3605_s15 = scalar_lea.vmem (!%p228_p7), [#allocation3], %s2689_s10 }
  0x1c   : > { %p2693_p9 = scmp.ne.s32.totalorder (!%p228_p7), %s3576_s21, 0 }
  0x21   : > { %s4025_s9 = smov (!%p264_p8, %s2690_s9), 511  ;;  %274 = sbr.rel (%p2693_p9) target bundleno = 40 (0x28), region = 67 }
  0x22   : > { %s2995_s11 = sshll.u32 %s4025_s9, 4  ;;  %v3529_v8 = vmov (!%p2693_p9), 0.0  }
  0x23   : > { %s3603_s14 = scalar_lea.vmem %s4016_s1, %s2995_s11  ;;  %275 = vst [vmem:[#allocation2] sm:$0xff] (!%p2693_p9), %v3529_v8  ;;  %276 = vst [vmem:[#allocation2 + $0x8] sm:$0xff] (!%p2693_p9), %v3529_v8 }
  0x24   : > { %277 = vst [vmem:[#allocation2 + $0x10] sm:$0xff] (!%p2693_p9), %v3529_v8  ;;  %278 = vst [vmem:[#allocation2 + $0x18] sm:$0xff] (!%p2693_p9), %v3529_v8 }
  0x25   : > { %279 = vst [vmem:[#allocation2 + $0x20] sm:$0xff] (!%p2693_p9), %v3529_v8  ;;  %280 = vst [vmem:[#allocation2 + $0x28] sm:$0xff] (!%p2693_p9), %v3529_v8 }
  0x26   : > { %281 = vst [vmem:[#allocation2 + $0x30] sm:$0xff] (!%p2693_p9), %v3529_v8  ;;  %282 = vst [vmem:[#allocation2 + $0x38] sm:$0xff] (!%p2693_p9), %v3529_v8 }
  0x28 PF: > { %v3089_v9 = vld [vmem:[%s3603_s14 + $0x4] ss:$16 sps:$4 sm:$0xff]   ;;  %v3091_v10 = vld [vmem:[%s3603_s14 + $0xc] ss:$16 sps:$4 sm:$0xff]   ;;  %v3093_v11 = vld [vmem:[%s3603_s14] ss:$16 sps:$4 sm:$0xff]  }
  0x29   : > { %1875 = vmatprep.subr.bf16.mxu0 %v3089_v9  ;;  %v3094_v12 = vld [vmem:[%s3603_s14 + $0x8] ss:$16 sps:$4 sm:$0xff]   ;;  %2047 = vmatprep.subr.bf16.mxu1 %v3091_v10  ;;  %v3095_v13 = vld [vmem:[%s3603_s14 + $0x24] ss:$16 sps:$4 sm:$0xff]   ;;  %v3097_v14 = vld [vmem:[%s3603_s14 + $0x2c] ss:$16 sps:$4 sm:$0xff]  }
  0x2a   : > { %1876 = vmatpush1.bf16.msra.mxu0 %v3093_v11  ;;  %2048 = vmatpush1.bf16.msra.mxu1 %v3094_v12  ;;  %v3099_v15 = vld [vmem:[%s3603_s14 + $0x20] ss:$16 sps:$4 sm:$0xff]   ;;  %v3100_v16 = vld [vmem:[%s3603_s14 + $0x28] ss:$16 sps:$4 sm:$0xff]   ;;  %v3101_v17 = vld [vmem:[%s3603_s14 + $0x44] ss:$16 sps:$4 sm:$0xff]  }
  0x2b   : > { %1877 = vmatprep.subr.bf16.mxu0 %v3095_v13  ;;  %2049 = vmatprep.subr.bf16.mxu1 %v3097_v14  ;;  %v3103_v18 = vld [vmem:[%s3603_s14 + $0x4c] ss:$16 sps:$4 sm:$0xff]   ;;  %v3105_v19 = vld [vmem:[%s3603_s14 + $0x40] ss:$16 sps:$4 sm:$0xff]   ;;  %v3106_v20 = vld [vmem:[%s3603_s14 + $0x48] ss:$16 sps:$4 sm:$0xff]  }
  0x2c   : > { %v3107_v21 = vld [vmem:[%s3603_s14 + $0x64] ss:$16 sps:$4 sm:$0xff]   ;;  %v3109_v22 = vld [vmem:[%s3603_s14 + $0x6c] ss:$16 sps:$4 sm:$0xff]   ;;  %v3111_v23 = vld [vmem:[%s3603_s14 + $0x60] ss:$16 sps:$4 sm:$0xff]  }
  0x2d   : > { %v3112_v24 = vld [vmem:[%s3603_s14 + $0x68] ss:$16 sps:$4 sm:$0xff]   ;;  %v3113_v25 = vld [vmem:[%s3603_s14 + $0x84] ss:$16 sps:$4 sm:$0xff]   ;;  %v3115_v26 = vld [vmem:[%s3603_s14 + $0x8c] ss:$16 sps:$4 sm:$0xff]  }
  0x2e   : > { %1878 = vmatpush1.bf16.msra.mxu0 %v3099_v15  ;;  %2050 = vmatpush1.bf16.msra.mxu1 %v3100_v16  ;;  %v3117_v27 = vld [vmem:[%s3603_s14 + $0x80] ss:$16 sps:$4 sm:$0xff]   ;;  %v3118_v28 = vld [vmem:[%s3603_s14 + $0x88] ss:$16 sps:$4 sm:$0xff]   ;;  %v3119_v29 = vld [vmem:[%s3603_s14 + $0xa4] ss:$16 sps:$4 sm:$0xff]  }
  0x2f   : > { %1879 = vmatprep.subr.bf16.mxu0 %v3101_v17  ;;  %2051 = vmatprep.subr.bf16.mxu1 %v3103_v18  ;;  %v3121_v30 = vld [vmem:[%s3603_s14 + $0xac] ss:$16 sps:$4 sm:$0xff]   ;;  %v3123_v31 = vld [vmem:[%s3603_s14 + $0xa0] ss:$16 sps:$4 sm:$0xff]   ;;  %v3124_v32 = vld [vmem:[%s3603_s14 + $0xa8] ss:$16 sps:$4 sm:$0xff]  }
  0x30   : > { %v3125_v33 = vld [vmem:[%s3603_s14 + $0xc4] ss:$16 sps:$4 sm:$0xff]   ;;  %v3127_v34 = vld [vmem:[%s3603_s14 + $0xcc] ss:$16 sps:$4 sm:$0xff]   ;;  %v3129_v35 = vld [vmem:[%s3603_s14 + $0xc0] ss:$16 sps:$4 sm:$0xff]  }
  0x31   : > { %v3130_v36 = vld [vmem:[%s3603_s14 + $0xc8] ss:$16 sps:$4 sm:$0xff]   ;;  %v3131_v37 = vld [vmem:[%s3603_s14 + $0xe4] ss:$16 sps:$4 sm:$0xff]   ;;  %v3133_v38 = vld [vmem:[%s3603_s14 + $0xec] ss:$16 sps:$4 sm:$0xff]  }
  0x32   : > { %1880 = vmatpush1.bf16.msra.mxu0 %v3105_v19  ;;  %2052 = vmatpush1.bf16.msra.mxu1 %v3106_v20  ;;  %v3135_v39 = vld [vmem:[%s3603_s14 + $0xe0] ss:$16 sps:$4 sm:$0xff]   ;;  %v3136_v40 = vld [vmem:[%s3603_s14 + $0xe8] ss:$16 sps:$4 sm:$0xff]   ;;  %v3137_v41 = vld [vmem:[%s3603_s14 + $0x104] ss:$16 sps:$4 sm:$0xff]  }
  0x33   : > { %1881 = vmatprep.subr.bf16.mxu0 %v3107_v21  ;;  %2053 = vmatprep.subr.bf16.mxu1 %v3109_v22  ;;  %v3139_v42 = vld [vmem:[%s3603_s14 + $0x10c] ss:$16 sps:$4 sm:$0xff]   ;;  %v3141_v43 = vld [vmem:[%s3603_s14 + $0x100] ss:$16 sps:$4 sm:$0xff]   ;;  %v3142_v44 = vld [vmem:[%s3603_s14 + $0x108] ss:$16 sps:$4 sm:$0xff]  }
  0x34   : > { %v3143_v45 = vld [vmem:[%s3603_s14 + $0x124] ss:$16 sps:$4 sm:$0xff]   ;;  %v3145_v46 = vld [vmem:[%s3603_s14 + $0x12c] ss:$16 sps:$4 sm:$0xff]   ;;  %v3147_v47 = vld [vmem:[%s3603_s14 + $0x120] ss:$16 sps:$4 sm:$0xff]  }
  0x35   : > { %v3148_v48 = vld [vmem:[%s3603_s14 + $0x128] ss:$16 sps:$4 sm:$0xff]   ;;  %v3149_v49 = vld [vmem:[%s3603_s14 + $0x144] ss:$16 sps:$4 sm:$0xff]   ;;  %v3151_v50 = vld [vmem:[%s3603_s14 + $0x14c] ss:$16 sps:$4 sm:$0xff]  }
  0x36   : > { %1882 = vmatpush1.bf16.msra.mxu0 %v3111_v23  ;;  %2054 = vmatpush1.bf16.msra.mxu1 %v3112_v24  ;;  %v3153_v51 = vld [vmem:[%s3603_s14 + $0x140] ss:$16 sps:$4 sm:$0xff]   ;;  %v3154_v52 = vld [vmem:[%s3603_s14 + $0x148] ss:$16 sps:$4 sm:$0xff]   ;;  %v3155_v53 = vld [vmem:[%s3603_s14 + $0x164] ss:$16 sps:$4 sm:$0xff]  }
  0x37   : > { %1883 = vmatprep.subr.bf16.mxu0 %v3113_v25  ;;  %2055 = vmatprep.subr.bf16.mxu1 %v3115_v26  ;;  %v3157_v54 = vld [vmem:[%s3603_s14 + $0x16c] ss:$16 sps:$4 sm:$0xff]   ;;  %v291_v55 = vld [vmem:[%s3605_s15] sm:$0xff]  ;;  %v3160_v58 = vld [vmem:[%s3603_s14 + $0x168] ss:$16 sps:$4 sm:$0xff]   ;;  %p2958_p10 = scmp.ne.s32.totalorder %s3576_s21, 3 }
  0x38   : > { %v295_v56 = vld [vmem:[%s3605_s15 + $0x20] sm:$0xff]  ;;  %v3163_v61 = vld [vmem:[%s3603_s14 + $0x18c] ss:$16 sps:$4 sm:$0xff]   ;;  %v3166_v63 = vld [vmem:[%s3603_s14 + $0x188] ss:$16 sps:$4 sm:$0xff]  }
  0x39   : > { %v3159_v57 = vld [vmem:[%s3603_s14 + $0x160] ss:$16 sps:$4 sm:$0xff]   ;;  %v2695_v59 = vcombine.high %v291_v55, %v295_v56  ;;  %v3161_v60 = vld [vmem:[%s3603_s14 + $0x184] ss:$16 sps:$4 sm:$0xff]   ;;  %v3169_v1 = vld [vmem:[%s3603_s14 + $0x1ac] ss:$16 sps:$4 sm:$0xff]   ;;  %v2694_v14 = vcombine.low %v291_v55, %v295_v56 }
  0x3a   : > { %1884 = vmatpush1.bf16.msra.mxu0 %v3117_v27  ;;  %2056 = vmatpush1.bf16.msra.mxu1 %v3118_v28  ;;  %v3165_v62 = vld [vmem:[%s3603_s14 + $0x180] ss:$16 sps:$4 sm:$0xff]   ;;  %v3167_v0 = vld [vmem:[%s3603_s14 + $0x1a4] ss:$16 sps:$4 sm:$0xff]   ;;  %v3172_v3 = vld [vmem:[%s3603_s14 + $0x1a8] ss:$16 sps:$4 sm:$0xff]  }
  0x3b   : > { %1885 = vmatprep.subr.bf16.mxu0 %v3119_v29  ;;  %2057 = vmatprep.subr.bf16.mxu1 %v3121_v30  ;;  %v3171_v2 = vld [vmem:[%s3603_s14 + $0x1a0] ss:$16 sps:$4 sm:$0xff]   ;;  %v3173_v4 = vld [vmem:[%s3603_s14 + $0x1c4] ss:$16 sps:$4 sm:$0xff]   ;;  %v3175_v5 = vld [vmem:[%s3603_s14 + $0x1cc] ss:$16 sps:$4 sm:$0xff]  }
  0x3c   : > { %1907 = vmatprep.mubr.bf16.mxu0 %v2695_v59  ;;  %2079 = vmatprep.mubr.bf16.mxu1 %v2695_v59  ;;  %v3177_v6 = vld [vmem:[%s3603_s14 + $0x1c0] ss:$16 sps:$4 sm:$0xff]   ;;  %v3178_v7 = vld [vmem:[%s3603_s14 + $0x1c8] ss:$16 sps:$4 sm:$0xff]   ;;  %v3179_v8 = vld [vmem:[%s3603_s14 + $0x1e4] ss:$16 sps:$4 sm:$0xff]  }
  0x3d   : > { %v3181_v9 = vld [vmem:[%s3603_s14 + $0x1ec] ss:$16 sps:$4 sm:$0xff]   ;;  %v3183_v10 = vld [vmem:[%s3603_s14 + $0x1e0] ss:$16 sps:$4 sm:$0xff]   ;;  %v3184_v11 = vld [vmem:[%s3603_s14 + $0x1e8] ss:$16 sps:$4 sm:$0xff]  }
  0x3e   : > { %1886 = vmatpush1.bf16.msra.mxu0 %v3123_v31  ;;  %2058 = vmatpush1.bf16.msra.mxu1 %v3124_v32  ;;  %v3187_v12 = vld [vmem:[%s3603_s14 + $0x204] ss:$16 sps:$4 sm:$0xff]   ;;  %v3190_v13 = vld [vmem:[%s3603_s14 + $0x20c] ss:$16 sps:$4 sm:$0xff]   ;;  %v3185_v15 = vld [vmem:[%s3603_s14 + $0x200] ss:$16 sps:$4 sm:$0xff]  }
  0x3f   : > { %1887 = vmatprep.subr.bf16.mxu0 %v3125_v33  ;;  %2059 = vmatprep.subr.bf16.mxu1 %v3127_v34  ;;  %v3188_v16 = vld [vmem:[%s3603_s14 + $0x208] ss:$16 sps:$4 sm:$0xff]   ;;  %v3193_v17 = vld [vmem:[%s3603_s14 + $0x224] ss:$16 sps:$4 sm:$0xff]   ;;  %v3196_v18 = vld [vmem:[%s3603_s14 + $0x22c] ss:$16 sps:$4 sm:$0xff]  }
  0x40   : > { %v3191_v19 = vld [vmem:[%s3603_s14 + $0x220] ss:$16 sps:$4 sm:$0xff]   ;;  %v3194_v20 = vld [vmem:[%s3603_s14 + $0x228] ss:$16 sps:$4 sm:$0xff]   ;;  %v3199_v21 = vld [vmem:[%s3603_s14 + $0x244] ss:$16 sps:$4 sm:$0xff]  }
  0x41   : > { %v3202_v22 = vld [vmem:[%s3603_s14 + $0x24c] ss:$16 sps:$4 sm:$0xff]   ;;  %v3197_v23 = vld [vmem:[%s3603_s14 + $0x240] ss:$16 sps:$4 sm:$0xff]   ;;  %v3200_v24 = vld [vmem:[%s3603_s14 + $0x248] ss:$16 sps:$4 sm:$0xff]  }
  0x42   : > { %1888 = vmatpush1.bf16.msra.mxu0 %v3129_v35  ;;  %2060 = vmatpush1.bf16.msra.mxu1 %v3130_v36  ;;  %v3205_v25 = vld [vmem:[%s3603_s14 + $0x264] ss:$16 sps:$4 sm:$0xff]   ;;  %v3208_v26 = vld [vmem:[%s3603_s14 + $0x26c] ss:$16 sps:$4 sm:$0xff]   ;;  %v3203_v27 = vld [vmem:[%s3603_s14 + $0x260] ss:$16 sps:$4 sm:$0xff]  }
  0x43   : > { %1889 = vmatprep.subr.bf16.mxu0 %v3131_v37  ;;  %2061 = vmatprep.subr.bf16.mxu1 %v3133_v38  ;;  %v3206_v28 = vld [vmem:[%s3603_s14 + $0x268] ss:$16 sps:$4 sm:$0xff]   ;;  %v3211_v29 = vld [vmem:[%s3603_s14 + $0x284] ss:$16 sps:$4 sm:$0xff]   ;;  %v3214_v30 = vld [vmem:[%s3603_s14 + $0x28c] ss:$16 sps:$4 sm:$0xff]  }
  0x44   : > { %v3209_v31 = vld [vmem:[%s3603_s14 + $0x280] ss:$16 sps:$4 sm:$0xff]   ;;  %v3212_v32 = vld [vmem:[%s3603_s14 + $0x288] ss:$16 sps:$4 sm:$0xff]   ;;  %v3217_v33 = vld [vmem:[%s3603_s14 + $0x2a4] ss:$16 sps:$4 sm:$0xff]  }
  0x45   : > { %v3220_v34 = vld [vmem:[%s3603_s14 + $0x2ac] ss:$16 sps:$4 sm:$0xff]   ;;  %v3215_v35 = vld [vmem:[%s3603_s14 + $0x2a0] ss:$16 sps:$4 sm:$0xff]   ;;  %v3218_v36 = vld [vmem:[%s3603_s14 + $0x2a8] ss:$16 sps:$4 sm:$0xff]  }
  0x46   : > { %1890 = vmatpush1.bf16.msra.mxu0 %v3135_v39  ;;  %2062 = vmatpush1.bf16.msra.mxu1 %v3136_v40  ;;  %v3223_v37 = vld [vmem:[%s3603_s14 + $0x2c4] ss:$16 sps:$4 sm:$0xff]   ;;  %v3226_v38 = vld [vmem:[%s3603_s14 + $0x2cc] ss:$16 sps:$4 sm:$0xff]   ;;  %v3242_v55 = vld [vmem:[%s3603_s14 + $0x328] ss:$16 sps:$4 sm:$0xff]  }
  0x47   : > { %1891 = vmatprep.subr.bf16.mxu0 %v3137_v41  ;;  %2063 = vmatprep.subr.bf16.mxu1 %v3139_v42  ;;  %v3701_v39 = vld [vmem:[%s3605_s15 + $0x8] sm:$0xff]  ;;  %v3221_v41 = vld [vmem:[%s3603_s14 + $0x2c0] ss:$16 sps:$4 sm:$0xff]   ;;  %v3247_v56 = vld [vmem:[%s3603_s14 + $0x344] ss:$16 sps:$4 sm:$0xff]  }
  0x48   : > { %v3704_v40 = vld [vmem:[%s3605_s15 + $0x28] sm:$0xff] }
  0x49   : > { %v3224_v42 = vld [vmem:[%s3603_s14 + $0x2c8] ss:$16 sps:$4 sm:$0xff]  }
  0x4a   : > { %1892 = vmatpush1.bf16.msra.mxu0 %v3141_v43  ;;  %2064 = vmatpush1.bf16.msra.mxu1 %v3142_v44  ;;  %v2697_v43 = vcombine.high %v3701_v39, %v3704_v40  ;;  %v3229_v44 = vld [vmem:[%s3603_s14 + $0x2e4] ss:$16 sps:$4 sm:$0xff]   ;;  %v3248_v59 = vld [vmem:[%s3603_s14 + $0x348] ss:$16 sps:$4 sm:$0xff]  }
  0x4b   : > { %1893 = vmatprep.subr.bf16.mxu0 %v3143_v45  ;;  %2065 = vmatprep.subr.bf16.mxu1 %v3145_v46  ;;  %v3232_v45 = vld [vmem:[%s3603_s14 + $0x2ec] ss:$16 sps:$4 sm:$0xff]   ;;  %v3227_v46 = vld [vmem:[%s3603_s14 + $0x2e0] ss:$16 sps:$4 sm:$0xff]  }
  0x4e   : > { %1894 = vmatpush1.bf16.msra.mxu0 %v3147_v47  ;;  %2066 = vmatpush1.bf16.msra.mxu1 %v3148_v48  ;;  %v3230_v47 = vld [vmem:[%s3603_s14 + $0x2e8] ss:$16 sps:$4 sm:$0xff]   ;;  %v3235_v48 = vld [vmem:[%s3603_s14 + $0x304] ss:$16 sps:$4 sm:$0xff]  }
  0x4f   : > { %1895 = vmatprep.subr.bf16.mxu0 %v3149_v49  ;;  %2067 = vmatprep.subr.bf16.mxu1 %v3151_v50  ;;  %v3238_v49 = vld [vmem:[%s3603_s14 + $0x30c] ss:$16 sps:$4 sm:$0xff]   ;;  %v3233_v50 = vld [vmem:[%s3603_s14 + $0x300] ss:$16 sps:$4 sm:$0xff]  }
  0x52   : > { %1896 = vmatpush1.bf16.msra.mxu0 %v3153_v51  ;;  %2068 = vmatpush1.bf16.msra.mxu1 %v3154_v52  ;;  %v3236_v51 = vld [vmem:[%s3603_s14 + $0x308] ss:$16 sps:$4 sm:$0xff]   ;;  %v3241_v52 = vld [vmem:[%s3603_s14 + $0x324] ss:$16 sps:$4 sm:$0xff]  }
  0x53   : > { %1897 = vmatprep.subr.bf16.mxu0 %v3155_v53  ;;  %2069 = vmatprep.subr.bf16.mxu1 %v3157_v54  ;;  %v3244_v53 = vld [vmem:[%s3603_s14 + $0x32c] ss:$16 sps:$4 sm:$0xff]   ;;  %v3239_v54 = vld [vmem:[%s3603_s14 + $0x320] ss:$16 sps:$4 sm:$0xff]  }
  0x56   : > { %1898 = vmatpush1.bf16.msra.mxu0 %v3159_v57  ;;  %2070 = vmatpush1.bf16.msra.mxu1 %v3160_v58  ;;  %v3250_v57 = vld [vmem:[%s3603_s14 + $0x34c] ss:$16 sps:$4 sm:$0xff]   ;;  %v3245_v58 = vld [vmem:[%s3603_s14 + $0x340] ss:$16 sps:$4 sm:$0xff]  }
  0x57   : > { %1899 = vmatprep.subr.bf16.mxu0 %v3161_v60  ;;  %2071 = vmatprep.subr.bf16.mxu1 %v3163_v61  ;;  %v3253_v60 = vld [vmem:[%s3603_s14 + $0x364] ss:$16 sps:$4 sm:$0xff]   ;;  %v3256_v61 = vld [vmem:[%s3603_s14 + $0x36c] ss:$16 sps:$4 sm:$0xff]  }
  0x5a   : > { %1900 = vmatpush1.bf16.msra.mxu0 %v3165_v62  ;;  %2072 = vmatpush1.bf16.msra.mxu1 %v3166_v63  ;;  %v3251_v62 = vld [vmem:[%s3603_s14 + $0x360] ss:$16 sps:$4 sm:$0xff]   ;;  %v3254_v63 = vld [vmem:[%s3603_s14 + $0x368] ss:$16 sps:$4 sm:$0xff]  }
  0x5b   : > { %1901 = vmatprep.subr.bf16.mxu0 %v3167_v0  ;;  %2073 = vmatprep.subr.bf16.mxu1 %v3169_v1  ;;  %v3259_v0 = vld [vmem:[%s3603_s14 + $0x384] ss:$16 sps:$4 sm:$0xff]   ;;  %v3262_v1 = vld [vmem:[%s3603_s14 + $0x38c] ss:$16 sps:$4 sm:$0xff]  }
  0x5e   : > { %1902 = vmatpush1.bf16.msra.mxu0 %v3171_v2  ;;  %2074 = vmatpush1.bf16.msra.mxu1 %v3172_v3  ;;  %v3257_v2 = vld [vmem:[%s3603_s14 + $0x380] ss:$16 sps:$4 sm:$0xff]   ;;  %v3260_v3 = vld [vmem:[%s3603_s14 + $0x388] ss:$16 sps:$4 sm:$0xff]  }
  0x5f   : > { %1903 = vmatprep.subr.bf16.mxu0 %v3173_v4  ;;  %2075 = vmatprep.subr.bf16.mxu1 %v3175_v5  ;;  %v3265_v4 = vld [vmem:[%s3603_s14 + $0x3a4] ss:$16 sps:$4 sm:$0xff]   ;;  %v3268_v5 = vld [vmem:[%s3603_s14 + $0x3ac] ss:$16 sps:$4 sm:$0xff]  }
  0x62   : > { %1904 = vmatpush1.bf16.msra.mxu0 %v3177_v6  ;;  %2076 = vmatpush1.bf16.msra.mxu1 %v3178_v7  ;;  %v3263_v6 = vld [vmem:[%s3603_s14 + $0x3a0] ss:$16 sps:$4 sm:$0xff]   ;;  %v3266_v7 = vld [vmem:[%s3603_s14 + $0x3a8] ss:$16 sps:$4 sm:$0xff]  }
  0x63   : > { %1905 = vmatprep.subr.bf16.mxu0 %v3179_v8  ;;  %2077 = vmatprep.subr.bf16.mxu1 %v3181_v9  ;;  %v3271_v8 = vld [vmem:[%s3603_s14 + $0x3c4] ss:$16 sps:$4 sm:$0xff]   ;;  %v3274_v9 = vld [vmem:[%s3603_s14 + $0x3cc] ss:$16 sps:$4 sm:$0xff]  }
  0x66   : > { %1906 = vmatpush1.bf16.msra.mxu0 %v3183_v10  ;;  %2078 = vmatpush1.bf16.msra.mxu1 %v3184_v11  ;;  %v3269_v10 = vld [vmem:[%s3603_s14 + $0x3c0] ss:$16 sps:$4 sm:$0xff]   ;;  %v3272_v11 = vld [vmem:[%s3603_s14 + $0x3c8] ss:$16 sps:$4 sm:$0xff]  }
  0x67   : > { %1918 = vmatprep.subr.bf16.mxu0 %v3187_v12  ;;  %2090 = vmatprep.subr.bf16.mxu1 %v3190_v13  ;;  %v3277_v12 = vld [vmem:[%s3603_s14 + $0x3e4] ss:$16 sps:$4 sm:$0xff]   ;;  %v3280_v13 = vld [vmem:[%s3603_s14 + $0x3ec] ss:$16 sps:$4 sm:$0xff]  }
  0x69   : > { %1908 = vmatmul.mubr.bf16.vlgmr.msra.gmra.mrb[0].mxu0 %v2694_v14  ;;  %2080 = vmatmul.mubr.bf16.vlgmr.msra.gmra.mrb[0].mxu1 %v2694_v14  ;;  %v3275_v14 = vld [vmem:[%s3603_s14 + $0x3e0] ss:$16 sps:$4 sm:$0xff]  }
  0x6a   : > { %1919 = vmatpush1.bf16.msra.mxu0 %v3185_v15  ;;  %2091 = vmatpush1.bf16.msra.mxu1 %v3188_v16  ;;  %v3278_v15 = vld [vmem:[%s3603_s14 + $0x3e8] ss:$16 sps:$4 sm:$0xff]   ;;  %v3283_v16 = vld [vmem:[%s3603_s14 + $0x404] ss:$16 sps:$4 sm:$0xff]  }
  0x6b   : > { %1920 = vmatprep.subr.bf16.mxu0 %v3193_v17  ;;  %2092 = vmatprep.subr.bf16.mxu1 %v3196_v18  ;;  %v3286_v17 = vld [vmem:[%s3603_s14 + $0x40c] ss:$16 sps:$4 sm:$0xff]   ;;  %v2696_v18 = vcombine.low %v3701_v39, %v3704_v40  ;;  %v3308_v39 = vld [vmem:[%s3603_s14 + $0x488] ss:$16 sps:$4 sm:$0xff]   ;;  %v3313_v40 = vld [vmem:[%s3603_s14 + $0x4a4] ss:$16 sps:$4 sm:$0xff]  }
  0x6c   : > { %1950 = vmatprep.mubr.bf16.mxu0 %v2697_v43  ;;  %2122 = vmatprep.mubr.bf16.mxu1 %v2697_v43  ;;  %v3314_v43 = vld [vmem:[%s3603_s14 + $0x4a8] ss:$16 sps:$4 sm:$0xff]  }
  0x6e   : > { %1921 = vmatpush1.bf16.msra.mxu0 %v3191_v19  ;;  %2093 = vmatpush1.bf16.msra.mxu1 %v3194_v20  ;;  %v3281_v19 = vld [vmem:[%s3603_s14 + $0x400] ss:$16 sps:$4 sm:$0xff]   ;;  %v3284_v20 = vld [vmem:[%s3603_s14 + $0x408] ss:$16 sps:$4 sm:$0xff]  }
  0x6f   : > { %1922 = vmatprep.subr.bf16.mxu0 %v3199_v21  ;;  %2094 = vmatprep.subr.bf16.mxu1 %v3202_v22  ;;  %v3289_v21 = vld [vmem:[%s3603_s14 + $0x424] ss:$16 sps:$4 sm:$0xff]   ;;  %v3292_v22 = vld [vmem:[%s3603_s14 + $0x42c] ss:$16 sps:$4 sm:$0xff]  }
  0x72   : > { %1923 = vmatpush1.bf16.msra.mxu0 %v3197_v23  ;;  %2095 = vmatpush1.bf16.msra.mxu1 %v3200_v24  ;;  %v3755_v23 = vld [vmem:[%s3605_s15 + $0x10] sm:$0xff] }
  0x73   : > { %1924 = vmatprep.subr.bf16.mxu0 %v3205_v25  ;;  %2096 = vmatprep.subr.bf16.mxu1 %v3208_v26  ;;  %v3758_v24 = vld [vmem:[%s3605_s15 + $0x30] sm:$0xff] }
  0x74   : > { %v2699_v25 = vcombine.high %v3755_v23, %v3758_v24  ;;  %v3287_v26 = vld [vmem:[%s3603_s14 + $0x420] ss:$16 sps:$4 sm:$0xff]  }
  0x76   : > { %1925 = vmatpush1.bf16.msra.mxu0 %v3203_v27  ;;  %2097 = vmatpush1.bf16.msra.mxu1 %v3206_v28  ;;  %v3290_v27 = vld [vmem:[%s3603_s14 + $0x428] ss:$16 sps:$4 sm:$0xff]   ;;  %v3295_v28 = vld [vmem:[%s3603_s14 + $0x444] ss:$16 sps:$4 sm:$0xff]  }
  0x77   : > { %1926 = vmatprep.subr.bf16.mxu0 %v3211_v29  ;;  %2098 = vmatprep.subr.bf16.mxu1 %v3214_v30  ;;  %v3298_v29 = vld [vmem:[%s3603_s14 + $0x44c] ss:$16 sps:$4 sm:$0xff]   ;;  %v3293_v30 = vld [vmem:[%s3603_s14 + $0x440] ss:$16 sps:$4 sm:$0xff]  }
  0x7a   : > { %1927 = vmatpush1.bf16.msra.mxu0 %v3209_v31  ;;  %2099 = vmatpush1.bf16.msra.mxu1 %v3212_v32  ;;  %v3296_v31 = vld [vmem:[%s3603_s14 + $0x448] ss:$16 sps:$4 sm:$0xff]   ;;  %v3301_v32 = vld [vmem:[%s3603_s14 + $0x464] ss:$16 sps:$4 sm:$0xff]  }
  0x7b   : > { %1928 = vmatprep.subr.bf16.mxu0 %v3217_v33  ;;  %2100 = vmatprep.subr.bf16.mxu1 %v3220_v34  ;;  %v3304_v33 = vld [vmem:[%s3603_s14 + $0x46c] ss:$16 sps:$4 sm:$0xff]   ;;  %v3299_v34 = vld [vmem:[%s3603_s14 + $0x460] ss:$16 sps:$4 sm:$0xff]  }
  0x7e   : > { %1929 = vmatpush1.bf16.msra.mxu0 %v3215_v35  ;;  %2101 = vmatpush1.bf16.msra.mxu1 %v3218_v36  ;;  %v3302_v35 = vld [vmem:[%s3603_s14 + $0x468] ss:$16 sps:$4 sm:$0xff]   ;;  %v3307_v36 = vld [vmem:[%s3603_s14 + $0x484] ss:$16 sps:$4 sm:$0xff]  }
  0x7f   : > { %1930 = vmatprep.subr.bf16.mxu0 %v3223_v37  ;;  %2102 = vmatprep.subr.bf16.mxu1 %v3226_v38  ;;  %v3310_v37 = vld [vmem:[%s3603_s14 + $0x48c] ss:$16 sps:$4 sm:$0xff]   ;;  %v3305_v38 = vld [vmem:[%s3603_s14 + $0x480] ss:$16 sps:$4 sm:$0xff]  }
  0x82   : > { %1931 = vmatpush1.bf16.msra.mxu0 %v3221_v41  ;;  %2103 = vmatpush1.bf16.msra.mxu1 %v3224_v42  ;;  %v3316_v41 = vld [vmem:[%s3603_s14 + $0x4ac] ss:$16 sps:$4 sm:$0xff]   ;;  %v3311_v42 = vld [vmem:[%s3603_s14 + $0x4a0] ss:$16 sps:$4 sm:$0xff]  }
  0x83   : > { %1932 = vmatprep.subr.bf16.mxu0 %v3229_v44  ;;  %2104 = vmatprep.subr.bf16.mxu1 %v3232_v45  ;;  %v3319_v44 = vld [vmem:[%s3603_s14 + $0x4c4] ss:$16 sps:$4 sm:$0xff]   ;;  %v3322_v45 = vld [vmem:[%s3603_s14 + $0x4cc] ss:$16 sps:$4 sm:$0xff]  }
  0x86   : > { %1933 = vmatpush1.bf16.msra.mxu0 %v3227_v46  ;;  %2105 = vmatpush1.bf16.msra.mxu1 %v3230_v47  ;;  %v3317_v46 = vld [vmem:[%s3603_s14 + $0x4c0] ss:$16 sps:$4 sm:$0xff]   ;;  %v3320_v47 = vld [vmem:[%s3603_s14 + $0x4c8] ss:$16 sps:$4 sm:$0xff]  }
  0x87   : > { %1934 = vmatprep.subr.bf16.mxu0 %v3235_v48  ;;  %2106 = vmatprep.subr.bf16.mxu1 %v3238_v49  ;;  %v3325_v48 = vld [vmem:[%s3603_s14 + $0x4e4] ss:$16 sps:$4 sm:$0xff]   ;;  %v3328_v49 = vld [vmem:[%s3603_s14 + $0x4ec] ss:$16 sps:$4 sm:$0xff]  }
  0x8a   : > { %1935 = vmatpush1.bf16.msra.mxu0 %v3233_v50  ;;  %2107 = vmatpush1.bf16.msra.mxu1 %v3236_v51  ;;  %v3323_v50 = vld [vmem:[%s3603_s14 + $0x4e0] ss:$16 sps:$4 sm:$0xff]   ;;  %v3326_v51 = vld [vmem:[%s3603_s14 + $0x4e8] ss:$16 sps:$4 sm:$0xff]  }
  0x8b   : > { %1936 = vmatprep.subr.bf16.mxu0 %v3241_v52  ;;  %2108 = vmatprep.subr.bf16.mxu1 %v3244_v53  ;;  %v3331_v52 = vld [vmem:[%s3603_s14 + $0x504] ss:$16 sps:$4 sm:$0xff]   ;;  %v3334_v53 = vld [vmem:[%s3603_s14 + $0x50c] ss:$16 sps:$4 sm:$0xff]  }
  0x8e   : > { %1937 = vmatpush1.bf16.msra.mxu0 %v3239_v54  ;;  %2109 = vmatpush1.bf16.msra.mxu1 %v3242_v55  ;;  %v3329_v54 = vld [vmem:[%s3603_s14 + $0x500] ss:$16 sps:$4 sm:$0xff]   ;;  %v3332_v55 = vld [vmem:[%s3603_s14 + $0x508] ss:$16 sps:$4 sm:$0xff]  }
  0x8f   : > { %1938 = vmatprep.subr.bf16.mxu0 %v3247_v56  ;;  %2110 = vmatprep.subr.bf16.mxu1 %v3250_v57  ;;  %v3337_v56 = vld [vmem:[%s3603_s14 + $0x524] ss:$16 sps:$4 sm:$0xff]   ;;  %v3340_v57 = vld [vmem:[%s3603_s14 + $0x52c] ss:$16 sps:$4 sm:$0xff]  }
  0x92   : > { %1939 = vmatpush1.bf16.msra.mxu0 %v3245_v58  ;;  %2111 = vmatpush1.bf16.msra.mxu1 %v3248_v59  ;;  %v3335_v58 = vld [vmem:[%s3603_s14 + $0x520] ss:$16 sps:$4 sm:$0xff]   ;;  %v3338_v59 = vld [vmem:[%s3603_s14 + $0x528] ss:$16 sps:$4 sm:$0xff]  }
  0x93   : > { %1940 = vmatprep.subr.bf16.mxu0 %v3253_v60  ;;  %2112 = vmatprep.subr.bf16.mxu1 %v3256_v61  ;;  %v3343_v60 = vld [vmem:[%s3603_s14 + $0x544] ss:$16 sps:$4 sm:$0xff]   ;;  %v3346_v61 = vld [vmem:[%s3603_s14 + $0x54c] ss:$16 sps:$4 sm:$0xff]  }
  0x96   : > { %1941 = vmatpush1.bf16.msra.mxu0 %v3251_v62  ;;  %2113 = vmatpush1.bf16.msra.mxu1 %v3254_v63  ;;  %v3341_v62 = vld [vmem:[%s3603_s14 + $0x540] ss:$16 sps:$4 sm:$0xff]   ;;  %v3344_v63 = vld [vmem:[%s3603_s14 + $0x548] ss:$16 sps:$4 sm:$0xff]  }
  0x97   : > { %1942 = vmatprep.subr.bf16.mxu0 %v3259_v0  ;;  %2114 = vmatprep.subr.bf16.mxu1 %v3262_v1  ;;  %v3349_v0 = vld [vmem:[%s3603_s14 + $0x564] ss:$16 sps:$4 sm:$0xff]   ;;  %v3352_v1 = vld [vmem:[%s3603_s14 + $0x56c] ss:$16 sps:$4 sm:$0xff]  }
  0x9a   : > { %1943 = vmatpush1.bf16.msra.mxu0 %v3257_v2  ;;  %2115 = vmatpush1.bf16.msra.mxu1 %v3260_v3  ;;  %v3347_v2 = vld [vmem:[%s3603_s14 + $0x560] ss:$16 sps:$4 sm:$0xff]   ;;  %v3350_v3 = vld [vmem:[%s3603_s14 + $0x568] ss:$16 sps:$4 sm:$0xff]  }
  0x9b   : > { %1944 = vmatprep.subr.bf16.mxu0 %v3265_v4  ;;  %2116 = vmatprep.subr.bf16.mxu1 %v3268_v5  ;;  %v3355_v4 = vld [vmem:[%s3603_s14 + $0x584] ss:$16 sps:$4 sm:$0xff]   ;;  %v3358_v5 = vld [vmem:[%s3603_s14 + $0x58c] ss:$16 sps:$4 sm:$0xff]  }
  0x9e   : > { %1945 = vmatpush1.bf16.msra.mxu0 %v3263_v6  ;;  %2117 = vmatpush1.bf16.msra.mxu1 %v3266_v7  ;;  %v3353_v6 = vld [vmem:[%s3603_s14 + $0x580] ss:$16 sps:$4 sm:$0xff]   ;;  %v3356_v7 = vld [vmem:[%s3603_s14 + $0x588] ss:$16 sps:$4 sm:$0xff]  }
  0x9f   : > { %1946 = vmatprep.subr.bf16.mxu0 %v3271_v8  ;;  %2118 = vmatprep.subr.bf16.mxu1 %v3274_v9  ;;  %v3361_v8 = vld [vmem:[%s3603_s14 + $0x5a4] ss:$16 sps:$4 sm:$0xff]   ;;  %v3364_v9 = vld [vmem:[%s3603_s14 + $0x5ac] ss:$16 sps:$4 sm:$0xff]  }
  0xa2   : > { %1947 = vmatpush1.bf16.msra.mxu0 %v3269_v10  ;;  %2119 = vmatpush1.bf16.msra.mxu1 %v3272_v11  ;;  %v3359_v10 = vld [vmem:[%s3603_s14 + $0x5a0] ss:$16 sps:$4 sm:$0xff]   ;;  %v3362_v11 = vld [vmem:[%s3603_s14 + $0x5a8] ss:$16 sps:$4 sm:$0xff]  }
  0xa3   : > { %1948 = vmatprep.subr.bf16.mxu0 %v3277_v12  ;;  %2120 = vmatprep.subr.bf16.mxu1 %v3280_v13  ;;  %v3367_v12 = vld [vmem:[%s3603_s14 + $0x5c4] ss:$16 sps:$4 sm:$0xff]   ;;  %v3370_v13 = vld [vmem:[%s3603_s14 + $0x5cc] ss:$16 sps:$4 sm:$0xff]  }
  0xa6   : > { %1949 = vmatpush1.bf16.msra.mxu0 %v3275_v14  ;;  %2121 = vmatpush1.bf16.msra.mxu1 %v3278_v15  ;;  %v3365_v14 = vld [vmem:[%s3603_s14 + $0x5c0] ss:$16 sps:$4 sm:$0xff]   ;;  %v3368_v15 = vld [vmem:[%s3603_s14 + $0x5c8] ss:$16 sps:$4 sm:$0xff]  }
  0xa7   : > { %1961 = vmatprep.subr.bf16.mxu0 %v3283_v16  ;;  %2133 = vmatprep.subr.bf16.mxu1 %v3286_v17  ;;  %v3373_v16 = vld [vmem:[%s3603_s14 + $0x5e4] ss:$16 sps:$4 sm:$0xff]   ;;  %v3376_v17 = vld [vmem:[%s3603_s14 + $0x5ec] ss:$16 sps:$4 sm:$0xff]  }
  0xa9   : > { %1951 = vmatmul.mubr.bf16.vlgmr.msra.gmra.mrb[0].mxu0 %v2696_v18  ;;  %2123 = vmatmul.mubr.bf16.vlgmr.msra.gmra.mrb[0].mxu1 %v2696_v18  ;;  %v3371_v18 = vld [vmem:[%s3603_s14 + $0x5e0] ss:$16 sps:$4 sm:$0xff]  }
  0xaa   : > { %1962 = vmatpush1.bf16.msra.mxu0 %v3281_v19  ;;  %2134 = vmatpush1.bf16.msra.mxu1 %v3284_v20  ;;  %v3374_v19 = vld [vmem:[%s3603_s14 + $0x5e8] ss:$16 sps:$4 sm:$0xff]   ;;  %v3379_v20 = vld [vmem:[%s3603_s14 + $0x604] ss:$16 sps:$4 sm:$0xff]  }
  0xab   : > { %1963 = vmatprep.subr.bf16.mxu0 %v3289_v21  ;;  %2135 = vmatprep.subr.bf16.mxu1 %v3292_v22  ;;  %v3382_v21 = vld [vmem:[%s3603_s14 + $0x60c] ss:$16 sps:$4 sm:$0xff]   ;;  %v2698_v22 = vcombine.low %v3755_v23, %v3758_v24  ;;  %v3383_v24 = vld [vmem:[%s3603_s14 + $0x620] ss:$16 sps:$4 sm:$0xff]  }
  0xac   : > { %1993 = vmatprep.mubr.bf16.mxu0 %v2699_v25  ;;  %2165 = vmatprep.mubr.bf16.mxu1 %v2699_v25  ;;  %v3825_v25 = vld [vmem:[%s3605_s15 + $0x18] sm:$0xff] }
  0xae   : > { %1964 = vmatpush1.bf16.msra.mxu0 %v3287_v26  ;;  %2136 = vmatpush1.bf16.msra.mxu1 %v3290_v27  ;;  %v3828_v26 = vld [vmem:[%s3605_s15 + $0x38] sm:$0xff]  ;;  %v3377_v27 = vld [vmem:[%s3603_s14 + $0x600] ss:$16 sps:$4 sm:$0xff]  }
  0xaf   : > { %1965 = vmatprep.subr.bf16.mxu0 %v3295_v28  ;;  %2137 = vmatprep.subr.bf16.mxu1 %v3298_v29  ;;  %v3380_v28 = vld [vmem:[%s3603_s14 + $0x608] ss:$16 sps:$4 sm:$0xff]   ;;  %v3385_v29 = vld [vmem:[%s3603_s14 + $0x624] ss:$16 sps:$4 sm:$0xff]   ;;  %v2701_v23 = vcombine.high %v3825_v25, %v3828_v26 }
  0xb2   : > { %1966 = vmatpush1.bf16.msra.mxu0 %v3293_v30  ;;  %2138 = vmatpush1.bf16.msra.mxu1 %v3296_v31  ;;  %v3388_v30 = vld [vmem:[%s3603_s14 + $0x62c] ss:$16 sps:$4 sm:$0xff]   ;;  %v3386_v31 = vld [vmem:[%s3603_s14 + $0x628] ss:$16 sps:$4 sm:$0xff]  }
  0xb3   : > { %1967 = vmatprep.subr.bf16.mxu0 %v3301_v32  ;;  %2139 = vmatprep.subr.bf16.mxu1 %v3304_v33  ;;  %v3391_v32 = vld [vmem:[%s3603_s14 + $0x644] ss:$16 sps:$4 sm:$0xff]   ;;  %v3394_v33 = vld [vmem:[%s3603_s14 + $0x64c] ss:$16 sps:$4 sm:$0xff]  }
  0xb6   : > { %1968 = vmatpush1.bf16.msra.mxu0 %v3299_v34  ;;  %2140 = vmatpush1.bf16.msra.mxu1 %v3302_v35  ;;  %v3389_v34 = vld [vmem:[%s3603_s14 + $0x640] ss:$16 sps:$4 sm:$0xff]   ;;  %v3392_v35 = vld [vmem:[%s3603_s14 + $0x648] ss:$16 sps:$4 sm:$0xff]  }
  0xb7   : > { %1969 = vmatprep.subr.bf16.mxu0 %v3307_v36  ;;  %2141 = vmatprep.subr.bf16.mxu1 %v3310_v37  ;;  %v3397_v36 = vld [vmem:[%s3603_s14 + $0x664] ss:$16 sps:$4 sm:$0xff]   ;;  %v3400_v37 = vld [vmem:[%s3603_s14 + $0x66c] ss:$16 sps:$4 sm:$0xff]  }
  0xba   : > { %1970 = vmatpush1.bf16.msra.mxu0 %v3305_v38  ;;  %2142 = vmatpush1.bf16.msra.mxu1 %v3308_v39  ;;  %v3395_v38 = vld [vmem:[%s3603_s14 + $0x660] ss:$16 sps:$4 sm:$0xff]   ;;  %v3398_v39 = vld [vmem:[%s3603_s14 + $0x668] ss:$16 sps:$4 sm:$0xff]  }
  0xbb   : > { %1971 = vmatprep.subr.bf16.mxu0 %v3313_v40  ;;  %2143 = vmatprep.subr.bf16.mxu1 %v3316_v41  ;;  %v3403_v40 = vld [vmem:[%s3603_s14 + $0x684] ss:$16 sps:$4 sm:$0xff]   ;;  %v3406_v41 = vld [vmem:[%s3603_s14 + $0x68c] ss:$16 sps:$4 sm:$0xff]  }
  0xbe   : > { %1972 = vmatpush1.bf16.msra.mxu0 %v3311_v42  ;;  %2144 = vmatpush1.bf16.msra.mxu1 %v3314_v43  ;;  %v3401_v42 = vld [vmem:[%s3603_s14 + $0x680] ss:$16 sps:$4 sm:$0xff]   ;;  %v3404_v43 = vld [vmem:[%s3603_s14 + $0x688] ss:$16 sps:$4 sm:$0xff]  }
  0xbf   : > { %1973 = vmatprep.subr.bf16.mxu0 %v3319_v44  ;;  %2145 = vmatprep.subr.bf16.mxu1 %v3322_v45  ;;  %v3409_v44 = vld [vmem:[%s3603_s14 + $0x6a4] ss:$16 sps:$4 sm:$0xff]   ;;  %v3412_v45 = vld [vmem:[%s3603_s14 + $0x6ac] ss:$16 sps:$4 sm:$0xff]  }
  0xc2   : > { %1974 = vmatpush1.bf16.msra.mxu0 %v3317_v46  ;;  %2146 = vmatpush1.bf16.msra.mxu1 %v3320_v47  ;;  %v3407_v46 = vld [vmem:[%s3603_s14 + $0x6a0] ss:$16 sps:$4 sm:$0xff]   ;;  %v3410_v47 = vld [vmem:[%s3603_s14 + $0x6a8] ss:$16 sps:$4 sm:$0xff]  }
  0xc3   : > { %1975 = vmatprep.subr.bf16.mxu0 %v3325_v48  ;;  %2147 = vmatprep.subr.bf16.mxu1 %v3328_v49  ;;  %v3415_v48 = vld [vmem:[%s3603_s14 + $0x6c4] ss:$16 sps:$4 sm:$0xff]   ;;  %v3418_v49 = vld [vmem:[%s3603_s14 + $0x6cc] ss:$16 sps:$4 sm:$0xff]  }
  0xc6   : > { %1976 = vmatpush1.bf16.msra.mxu0 %v3323_v50  ;;  %2148 = vmatpush1.bf16.msra.mxu1 %v3326_v51  ;;  %v3413_v50 = vld [vmem:[%s3603_s14 + $0x6c0] ss:$16 sps:$4 sm:$0xff]   ;;  %v3416_v51 = vld [vmem:[%s3603_s14 + $0x6c8] ss:$16 sps:$4 sm:$0xff]  }
  0xc7   : > { %1977 = vmatprep.subr.bf16.mxu0 %v3331_v52  ;;  %2149 = vmatprep.subr.bf16.mxu1 %v3334_v53  ;;  %v3421_v52 = vld [vmem:[%s3603_s14 + $0x6e4] ss:$16 sps:$4 sm:$0xff]   ;;  %v3424_v53 = vld [vmem:[%s3603_s14 + $0x6ec] ss:$16 sps:$4 sm:$0xff]  }
  0xca   : > { %1978 = vmatpush1.bf16.msra.mxu0 %v3329_v54  ;;  %2150 = vmatpush1.bf16.msra.mxu1 %v3332_v55  ;;  %v3419_v54 = vld [vmem:[%s3603_s14 + $0x6e0] ss:$16 sps:$4 sm:$0xff]   ;;  %v3422_v55 = vld [vmem:[%s3603_s14 + $0x6e8] ss:$16 sps:$4 sm:$0xff]  }
  0xcb   : > { %1979 = vmatprep.subr.bf16.mxu0 %v3337_v56  ;;  %2151 = vmatprep.subr.bf16.mxu1 %v3340_v57  ;;  %v3427_v56 = vld [vmem:[%s3603_s14 + $0x704] ss:$16 sps:$4 sm:$0xff]   ;;  %v3430_v57 = vld [vmem:[%s3603_s14 + $0x70c] ss:$16 sps:$4 sm:$0xff]  }
  0xce   : > { %1980 = vmatpush1.bf16.msra.mxu0 %v3335_v58  ;;  %2152 = vmatpush1.bf16.msra.mxu1 %v3338_v59  ;;  %v3425_v58 = vld [vmem:[%s3603_s14 + $0x700] ss:$16 sps:$4 sm:$0xff]   ;;  %v3428_v59 = vld [vmem:[%s3603_s14 + $0x708] ss:$16 sps:$4 sm:$0xff]  }
  0xcf   : > { %1981 = vmatprep.subr.bf16.mxu0 %v3343_v60  ;;  %2153 = vmatprep.subr.bf16.mxu1 %v3346_v61  ;;  %v3433_v60 = vld [vmem:[%s3603_s14 + $0x724] ss:$16 sps:$4 sm:$0xff]   ;;  %v3436_v61 = vld [vmem:[%s3603_s14 + $0x72c] ss:$16 sps:$4 sm:$0xff]  }
  0xd2   : > { %1982 = vmatpush1.bf16.msra.mxu0 %v3341_v62  ;;  %2154 = vmatpush1.bf16.msra.mxu1 %v3344_v63  ;;  %v3431_v62 = vld [vmem:[%s3603_s14 + $0x720] ss:$16 sps:$4 sm:$0xff]   ;;  %v3434_v63 = vld [vmem:[%s3603_s14 + $0x728] ss:$16 sps:$4 sm:$0xff]  }
  0xd3   : > { %1983 = vmatprep.subr.bf16.mxu0 %v3349_v0  ;;  %2155 = vmatprep.subr.bf16.mxu1 %v3352_v1  ;;  %v3439_v0 = vld [vmem:[%s3603_s14 + $0x744] ss:$16 sps:$4 sm:$0xff]   ;;  %v3442_v1 = vld [vmem:[%s3603_s14 + $0x74c] ss:$16 sps:$4 sm:$0xff]  }
  0xd6   : > { %1984 = vmatpush1.bf16.msra.mxu0 %v3347_v2  ;;  %2156 = vmatpush1.bf16.msra.mxu1 %v3350_v3  ;;  %v3437_v2 = vld [vmem:[%s3603_s14 + $0x740] ss:$16 sps:$4 sm:$0xff]   ;;  %v3440_v3 = vld [vmem:[%s3603_s14 + $0x748] ss:$16 sps:$4 sm:$0xff]  }
  0xd7   : > { %1985 = vmatprep.subr.bf16.mxu0 %v3355_v4  ;;  %2157 = vmatprep.subr.bf16.mxu1 %v3358_v5  ;;  %v3445_v4 = vld [vmem:[%s3603_s14 + $0x764] ss:$16 sps:$4 sm:$0xff]   ;;  %v3448_v5 = vld [vmem:[%s3603_s14 + $0x76c] ss:$16 sps:$4 sm:$0xff]  }
  0xda   : > { %1986 = vmatpush1.bf16.msra.mxu0 %v3353_v6  ;;  %2158 = vmatpush1.bf16.msra.mxu1 %v3356_v7  ;;  %v3443_v6 = vld [vmem:[%s3603_s14 + $0x760] ss:$16 sps:$4 sm:$0xff]   ;;  %v3446_v7 = vld [vmem:[%s3603_s14 + $0x768] ss:$16 sps:$4 sm:$0xff]  }
  0xdb   : > { %1987 = vmatprep.subr.bf16.mxu0 %v3361_v8  ;;  %2159 = vmatprep.subr.bf16.mxu1 %v3364_v9  ;;  %v3451_v8 = vld [vmem:[%s3603_s14 + $0x784] ss:$16 sps:$4 sm:$0xff]   ;;  %v3454_v9 = vld [vmem:[%s3603_s14 + $0x78c] ss:$16 sps:$4 sm:$0xff]  }
  0xde   : > { %1988 = vmatpush1.bf16.msra.mxu0 %v3359_v10  ;;  %2160 = vmatpush1.bf16.msra.mxu1 %v3362_v11  ;;  %v3449_v10 = vld [vmem:[%s3603_s14 + $0x780] ss:$16 sps:$4 sm:$0xff]   ;;  %v3452_v11 = vld [vmem:[%s3603_s14 + $0x788] ss:$16 sps:$4 sm:$0xff]  }
  0xdf   : > { %1989 = vmatprep.subr.bf16.mxu0 %v3367_v12  ;;  %2161 = vmatprep.subr.bf16.mxu1 %v3370_v13  ;;  %v3457_v12 = vld [vmem:[%s3603_s14 + $0x7a4] ss:$16 sps:$4 sm:$0xff]   ;;  %v3460_v13 = vld [vmem:[%s3603_s14 + $0x7ac] ss:$16 sps:$4 sm:$0xff]  }
  0xe2   : > { %1990 = vmatpush1.bf16.msra.mxu0 %v3365_v14  ;;  %2162 = vmatpush1.bf16.msra.mxu1 %v3368_v15  ;;  %v3455_v14 = vld [vmem:[%s3603_s14 + $0x7a0] ss:$16 sps:$4 sm:$0xff]   ;;  %v3458_v15 = vld [vmem:[%s3603_s14 + $0x7a8] ss:$16 sps:$4 sm:$0xff]  }
  0xe3   : > { %1991 = vmatprep.subr.bf16.mxu0 %v3373_v16  ;;  %2163 = vmatprep.subr.bf16.mxu1 %v3376_v17  ;;  %v3463_v16 = vld [vmem:[%s3603_s14 + $0x7c4] ss:$16 sps:$4 sm:$0xff]   ;;  %v3466_v17 = vld [vmem:[%s3603_s14 + $0x7cc] ss:$16 sps:$4 sm:$0xff]  }
  0xe6   : > { %1992 = vmatpush1.bf16.msra.mxu0 %v3371_v18  ;;  %2164 = vmatpush1.bf16.msra.mxu1 %v3374_v19  ;;  %v3461_v18 = vld [vmem:[%s3603_s14 + $0x7c0] ss:$16 sps:$4 sm:$0xff]   ;;  %v3464_v19 = vld [vmem:[%s3603_s14 + $0x7c8] ss:$16 sps:$4 sm:$0xff]  }
  0xe7   : > { %2004 = vmatprep.subr.bf16.mxu0 %v3379_v20  ;;  %2176 = vmatprep.subr.bf16.mxu1 %v3382_v21  ;;  %v3469_v20 = vld [vmem:[%s3603_s14 + $0x7e4] ss:$16 sps:$4 sm:$0xff]   ;;  %v3472_v21 = vld [vmem:[%s3603_s14 + $0x7ec] ss:$16 sps:$4 sm:$0xff]  }
  0xe9   : > { %1994 = vmatmul.mubr.bf16.vlgmr.msra.gmra.mrb[0].mxu0 %v2698_v22  ;;  %2166 = vmatmul.mubr.bf16.vlgmr.msra.gmra.mrb[0].mxu1 %v2698_v22  ;;  %v3467_v22 = vld [vmem:[%s3603_s14 + $0x7e0] ss:$16 sps:$4 sm:$0xff]  }
  0xea   : > { %2005 = vmatpush1.bf16.msra.mxu0 %v3377_v27  ;;  %2177 = vmatpush1.bf16.msra.mxu1 %v3380_v28  ;;  %v3470_v27 = vld [vmem:[%s3603_s14 + $0x7e8] ss:$16 sps:$4 sm:$0xff]   ;;  %v2700_v28 = vcombine.low %v3825_v25, %v3828_v26 }
  0xeb   : > { %2006 = vmatprep.subr.bf16.mxu0 %v3385_v29  ;;  %2178 = vmatprep.subr.bf16.mxu1 %v3388_v30  ;;  %v283_v29 = vld [vmem:[#allocation2] sm:$0xff]  ;;  %v285_v30 = vld [vmem:[#allocation2 + $0x10] sm:$0xff] }
  0xec   : > { %2036 = vmatprep.mubr.bf16.mxu0 %v2701_v23  ;;  %2208 = vmatprep.mubr.bf16.mxu1 %v2701_v23  ;;  %v284_v23 = vld [vmem:[#allocation2 + $0x8] sm:$0xff] }
  0xee   : > { %2007 = vmatpush1.bf16.msra.mxu0 %v3383_v24  ;;  %2179 = vmatpush1.bf16.msra.mxu1 %v3386_v31  ;;  %v286_v24 = vld [vmem:[#allocation2 + $0x18] sm:$0xff] }
  0xef   : > { %2008 = vmatprep.subr.bf16.mxu0 %v3391_v32  ;;  %2180 = vmatprep.subr.bf16.mxu1 %v3394_v33  ;;  %v287_v33 = vld [vmem:[#allocation2 + $0x20] sm:$0xff] }
  0xf2   : > { %2009 = vmatpush1.bf16.msra.mxu0 %v3389_v34  ;;  %2181 = vmatpush1.bf16.msra.mxu1 %v3392_v35  ;;  %v289_v34 = vld [vmem:[#allocation2 + $0x30] sm:$0xff] }
  0xf3   : > { %2010 = vmatprep.subr.bf16.mxu0 %v3397_v36  ;;  %2182 = vmatprep.subr.bf16.mxu1 %v3400_v37 }
  0xf6   : > { %2011 = vmatpush1.bf16.msra.mxu0 %v3395_v38  ;;  %2183 = vmatpush1.bf16.msra.mxu1 %v3398_v39  ;;  %v288_v39 = vld [vmem:[#allocation2 + $0x28] sm:$0xff] }
  0xf7   : > { %2012 = vmatprep.subr.bf16.mxu0 %v3403_v40  ;;  %2184 = vmatprep.subr.bf16.mxu1 %v3406_v41  ;;  %v290_v40 = vld [vmem:[#allocation2 + $0x38] sm:$0xff] }
  0xfa   : > { %2013 = vmatpush1.bf16.msra.mxu0 %v3401_v42  ;;  %2185 = vmatpush1.bf16.msra.mxu1 %v3404_v43 }
  0xfb   : > { %2014 = vmatprep.subr.bf16.mxu0 %v3409_v44  ;;  %2186 = vmatprep.subr.bf16.mxu1 %v3412_v45 }
  0xfe   : > { %2015 = vmatpush1.bf16.msra.mxu0 %v3407_v46  ;;  %2187 = vmatpush1.bf16.msra.mxu1 %v3410_v47 }
  0xff   : > { %2016 = vmatprep.subr.bf16.mxu0 %v3415_v48  ;;  %2188 = vmatprep.subr.bf16.mxu1 %v3418_v49  ;;  %v3473_v49 = vld [vmem:[%s4018_s3 + $0x40] sm:$0xff] (!%p2958_p10)  }
 0x102   : > { %2017 = vmatpush1.bf16.msra.mxu0 %v3413_v50  ;;  %2189 = vmatpush1.bf16.msra.mxu1 %v3416_v51  ;;  %v3474_v50 = vld [vmem:[%s4018_s3 + $0xc0] sm:$0xff] (!%p2958_p10)  }
 0x103   : > { %2018 = vmatprep.subr.bf16.mxu0 %v3421_v52  ;;  %2190 = vmatprep.subr.bf16.mxu1 %v3424_v53  ;;  %v3475_v51 = vld [vmem:[%s4018_s3] sm:$0xff] (!%p2958_p10)   ;;  %v3477_v53 = vld [vmem:[%s4018_s3 + $0x48] sm:$0xff] (!%p2958_p10)  }
 0x104   : > { %v3476_v52 = vld [vmem:[%s4018_s3 + $0x80] sm:$0xff] (!%p2958_p10)  }
 0x106   : > { %2019 = vmatpush1.bf16.msra.mxu0 %v3419_v54  ;;  %2191 = vmatpush1.bf16.msra.mxu1 %v3422_v55  ;;  %v3478_v54 = vld [vmem:[%s4018_s3 + $0xc8] sm:$0xff] (!%p2958_p10)  }
 0x107   : > { %2020 = vmatprep.subr.bf16.mxu0 %v3427_v56  ;;  %2192 = vmatprep.subr.bf16.mxu1 %v3430_v57  ;;  %v3479_v55 = vld [vmem:[%s4018_s3 + $0x8] sm:$0xff] (!%p2958_p10)   ;;  %v3481_v57 = vld [vmem:[%s4018_s3 + $0x50] sm:$0xff] (!%p2958_p10)  }
 0x108   : > { %v3480_v56 = vld [vmem:[%s4018_s3 + $0x88] sm:$0xff] (!%p2958_p10)  }
 0x10a   : > { %2021 = vmatpush1.bf16.msra.mxu0 %v3425_v58  ;;  %2193 = vmatpush1.bf16.msra.mxu1 %v3428_v59  ;;  %v3482_v58 = vld [vmem:[%s4018_s3 + $0xd0] sm:$0xff] (!%p2958_p10)  }
 0x10b   : > { %2022 = vmatprep.subr.bf16.mxu0 %v3433_v60  ;;  %2194 = vmatprep.subr.bf16.mxu1 %v3436_v61  ;;  %v3483_v59 = vld [vmem:[%s4018_s3 + $0x10] sm:$0xff] (!%p2958_p10)   ;;  %v3485_v61 = vld [vmem:[%s4018_s3 + $0x58] sm:$0xff] (!%p2958_p10)  }
 0x10c   : > { %v3484_v60 = vld [vmem:[%s4018_s3 + $0x90] sm:$0xff] (!%p2958_p10)  }
 0x10e   : > { %2023 = vmatpush1.bf16.msra.mxu0 %v3431_v62  ;;  %2195 = vmatpush1.bf16.msra.mxu1 %v3434_v63  ;;  %v3486_v62 = vld [vmem:[%s4018_s3 + $0xd8] sm:$0xff] (!%p2958_p10)  }
 0x10f   : > { %2024 = vmatprep.subr.bf16.mxu0 %v3439_v0  ;;  %2196 = vmatprep.subr.bf16.mxu1 %v3442_v1  ;;  %v3487_v63 = vld [vmem:[%s4018_s3 + $0x18] sm:$0xff] (!%p2958_p10)   ;;  %v3489_v1 = vld [vmem:[%s4018_s3 + $0x60] sm:$0xff] (!%p2958_p10)  }
 0x110   : > { %v3488_v0 = vld [vmem:[%s4018_s3 + $0x98] sm:$0xff] (!%p2958_p10)  }
 0x112   : > { %2025 = vmatpush1.bf16.msra.mxu0 %v3437_v2  ;;  %2197 = vmatpush1.bf16.msra.mxu1 %v3440_v3  ;;  %v3490_v2 = vld [vmem:[%s4018_s3 + $0xe0] sm:$0xff] (!%p2958_p10)  }
 0x113   : > { %2026 = vmatprep.subr.bf16.mxu0 %v3445_v4  ;;  %2198 = vmatprep.subr.bf16.mxu1 %v3448_v5  ;;  %v3491_v3 = vld [vmem:[%s4018_s3 + $0x20] sm:$0xff] (!%p2958_p10)   ;;  %v2249_v4 = vlaneseq (!%p2958_p10) }
 0x114   : > { %v3492_v5 = vld [vmem:[%s4018_s3 + $0xa0] sm:$0xff] (!%p2958_p10)  }
 0x116   : > { %2027 = vmatpush1.bf16.msra.mxu0 %v3443_v6  ;;  %2199 = vmatpush1.bf16.msra.mxu1 %v3446_v7  ;;  %v3493_v6 = vld [vmem:[%s4018_s3 + $0x68] sm:$0xff] (!%p2958_p10)  }
 0x117   : > { %2028 = vmatprep.subr.bf16.mxu0 %v3451_v8  ;;  %2200 = vmatprep.subr.bf16.mxu1 %v3454_v9  ;;  %v3494_v7 = vld [vmem:[%s4018_s3 + $0xe8] sm:$0xff] (!%p2958_p10)   ;;  %v2250_v9 = vshrl.u32 (!%p2958_p10), %v2249_v4, 7 }
 0x118   : > { %v3495_v8 = vld [vmem:[%s4018_s3 + $0x28] sm:$0xff] (!%p2958_p10)  }
 0x11a   : > { %2029 = vmatpush1.bf16.msra.mxu0 %v3449_v10  ;;  %2201 = vmatpush1.bf16.msra.mxu1 %v3452_v11  ;;  %v3496_v10 = vld [vmem:[%s4018_s3 + $0xa8] sm:$0xff] (!%p2958_p10)   ;;  %v3497_v11 = vld [vmem:[%s4018_s3 + $0x70] sm:$0xff] (!%p2958_p10)  }
 0x11b   : > { %2030 = vmatprep.subr.bf16.mxu0 %v3457_v12  ;;  %2202 = vmatprep.subr.bf16.mxu1 %v3460_v13  ;;  %v3498_v12 = vld [vmem:[%s4018_s3 + $0xf0] sm:$0xff] (!%p2958_p10)  }
 0x11c   : > { %v3499_v13 = vld [vmem:[%s4018_s3 + $0x30] sm:$0xff] (!%p2958_p10)  }
 0x11e   : > { %2031 = vmatpush1.bf16.msra.mxu0 %v3455_v14  ;;  %2203 = vmatpush1.bf16.msra.mxu1 %v3458_v15  ;;  %v2255_v14 = vsub.s32 (!%p2958_p10), 1, %v2250_v9  ;;  %v3500_v15 = vld [vmem:[%s4018_s3 + $0xb0] sm:$0xff] (!%p2958_p10)  }
 0x11f   : > { %2032 = vmatprep.subr.bf16.mxu0 %v3463_v16  ;;  %2204 = vmatprep.subr.bf16.mxu1 %v3466_v17  ;;  %v2263_v16 = vsub.s32 (!%p2958_p10), 3, %v2250_v9  ;;  %v3501_v17 = vld [vmem:[%s4018_s3 + $0x78] sm:$0xff] (!%p2958_p10)  }
 0x122   : > { %2033 = vmatpush1.bf16.msra.mxu0 %v3461_v18  ;;  %2205 = vmatpush1.bf16.msra.mxu1 %v3464_v19  ;;  %v2251_v18 = vsub.s32 (!%p2958_p10), 0, %v2250_v9  ;;  %v3502_v19 = vld [vmem:[%s4018_s3 + $0xf8] sm:$0xff] (!%p2958_p10)  }
 0x123   : > { %2034 = vmatprep.subr.bf16.mxu0 %v3469_v20  ;;  %2206 = vmatprep.subr.bf16.mxu1 %v3472_v21  ;;  %v2259_v20 = vsub.s32 (!%p2958_p10), 2, %v2250_v9  ;;  %v3503_v21 = vld [vmem:[%s4018_s3 + $0x38] sm:$0xff] (!%p2958_p10)  }
 0x126   : > { %2035 = vmatpush1.bf16.msra.mxu0 %v3467_v22  ;;  %2207 = vmatpush1.bf16.msra.mxu1 %v3470_v27  ;;  %v3504_v22 = vld [vmem:[%s4018_s3 + $0xb8] sm:$0xff] (!%p2958_p10)  }
 0x127   : > { %2996 = vmatprep.subr.bf16.mxu0 (!%p2958_p10), %v3473_v49  ;;  %3018 = vmatprep.subr.bf16.mxu1 (!%p2958_p10), %v3474_v50 }
 0x129   : > { %2037 = vmatmul.mubr.bf16.vlgmr.msra.gmra.mrb[0].mxu0 %v2700_v28  ;;  %2209 = vmatmul.mubr.bf16.vlgmr.msra.gmra.mrb[0].mxu1 %v2700_v28 }
 0x12a   : > { %2997 = vmatpush3.bf16.msra.mxu0 (!%p2958_p10), %v3475_v51  ;;  %3019 = vmatpush3.bf16.msra.mxu1 (!%p2958_p10), %v3476_v52 }
 0x12b   : > { %2998 = vmatprep.subr.bf16.mxu0 (!%p2958_p10), %v3477_v53  ;;  %3020 = vmatprep.subr.bf16.mxu1 (!%p2958_p10), %v3478_v54 }
 0x12e   : > { %2999 = vmatpush3.bf16.msra.mxu0 (!%p2958_p10), %v3479_v55  ;;  %3021 = vmatpush3.bf16.msra.mxu1 (!%p2958_p10), %v3480_v56 }
 0x12f   : > { %3000 = vmatprep.subr.bf16.mxu0 (!%p2958_p10), %v3481_v57  ;;  %3022 = vmatprep.subr.bf16.mxu1 (!%p2958_p10), %v3482_v58  ;;  %v2959_v58 = vld [vmem:[%s4019_s4] ss:$0 sm:$0xff] (!%p2958_p10) }
 0x132   : > { %3001 = vmatpush3.bf16.msra.mxu0 (!%p2958_p10), %v3483_v59  ;;  %3023 = vmatpush3.bf16.msra.mxu1 (!%p2958_p10), %v3484_v60 }
 0x133   : > { %3002 = vmatprep.subr.bf16.mxu0 (!%p2958_p10), %v3485_v61  ;;  %3024 = vmatprep.subr.bf16.mxu1 (!%p2958_p10), %v3486_v62 }
 0x136   : > { %3003 = vmatpush3.bf16.msra.mxu0 (!%p2958_p10), %v3487_v63  ;;  %3025 = vmatpush3.bf16.msra.mxu1 (!%p2958_p10), %v3488_v0 }
 0x137   : > { %3004 = vmatprep.subr.bf16.mxu0 (!%p2958_p10), %v3489_v1  ;;  %3026 = vmatprep.subr.bf16.mxu1 (!%p2958_p10), %v3490_v2 }
 0x13a   : > { %3005 = vmatpush3.bf16.msra.mxu0 (!%p2958_p10), %v3491_v3  ;;  %3027 = vmatpush3.bf16.msra.mxu1 (!%p2958_p10), %v3492_v5 }
 0x13b   : > { %3006 = vmatprep.subr.bf16.mxu0 (!%p2958_p10), %v3493_v6  ;;  %3028 = vmatprep.subr.bf16.mxu1 (!%p2958_p10), %v3494_v7 }
 0x13e   : > { %3007 = vmatpush3.bf16.msra.mxu0 (!%p2958_p10), %v3495_v8  ;;  %3029 = vmatpush3.bf16.msra.mxu1 (!%p2958_p10), %v3496_v10 }
 0x13f   : > { %3008 = vmatprep.subr.bf16.mxu0 (!%p2958_p10), %v3497_v11  ;;  %3030 = vmatprep.subr.bf16.mxu1 (!%p2958_p10), %v3498_v12 }
 0x142   : > { %3009 = vmatpush3.bf16.msra.mxu0 (!%p2958_p10), %v3499_v13  ;;  %3031 = vmatpush3.bf16.msra.mxu1 (!%p2958_p10), %v3500_v15 }
 0x143   : > { %3010 = vmatprep.subr.bf16.mxu0 (!%p2958_p10), %v3501_v17  ;;  %3032 = vmatprep.subr.bf16.mxu1 (!%p2958_p10), %v3502_v19 }
 0x146   : > { %3011 = vmatpush3.bf16.msra.mxu0 (!%p2958_p10), %v3503_v21  ;;  %3033 = vmatpush3.bf16.msra.mxu1 (!%p2958_p10), %v3504_v22 }
 0x1fc   : > { %v2038_v31 = vpop.f32.mrb[0].mxu0  ;;  %v2210_v32 = vpop.f32.mrb[0].mxu1  ;;  %2238 = sbr.rel (%p2958_p10) target bundleno = 751 (0x2ef), region = 71 }
 0x1fd   : > { %v2219_v35 = vadd.f32 %v2038_v31, %v283_v29  ;;  %v2221_v36 = vadd.f32 %v2210_v32, %v285_v30  ;;  %v2040_v37 = vpop.f32.mrb[1].mxu0  ;;  %v2212_v38 = vpop.f32.mrb[1].mxu1  ;;  %v2247_v29 = vld [vmem:[%s4017_s2] sm:$0xf] (!%p2958_p10) }
 0x1fe   : > { %v2220_v41 = vadd.f32 %v2040_v37, %v284_v23  ;;  %v2222_v25 = vadd.f32 %v2212_v38, %v286_v24  ;;  %v2042_v26 = vpop.f32.mrb[2].mxu0  ;;  %v2214_v42 = vpop.f32.mrb[2].mxu1  ;;  %v2256_v30 = vrot.slane (!%p2958_p10), %v2247_v29, %v2255_v14  ;;  %v2264_v31 = vrot.slane (!%p2958_p10), %v2247_v29, %v2263_v16 }
 0x1ff   : > { %2227 = vst [vmem:[#allocation2] sm:$0xff] %v2219_v35  ;;  %2229 = vst [vmem:[#allocation2 + $0x10] sm:$0xff] %v2221_v36  ;;  %v2223_v43 = vadd.f32 %v2042_v26, %v287_v33  ;;  %v2225_v44 = vadd.f32 %v2214_v42, %v289_v34  ;;  %v2044_v45 = vpop.f32.mrb[3].mxu0  ;;  %v2216_v46 = vpop.f32.mrb[3].mxu1  ;;  %v2252_v33 = vrot.slane (!%p2958_p10), %v2247_v29, %v2251_v18 }
 0x200   : > { %2228 = vst [vmem:[#allocation2 + $0x8] sm:$0xff] %v2220_v41  ;;  %2230 = vst [vmem:[#allocation2 + $0x18] sm:$0xff] %v2222_v25  ;;  %v2224_v47 = vadd.f32 %v2044_v45, %v288_v39  ;;  %v2226_v48 = vadd.f32 %v2216_v46, %v290_v40  ;;  %v2260_v34 = vrot.slane (!%p2958_p10), %v2247_v29, %v2259_v20 }
 0x201   : > { %2231 = vst [vmem:[#allocation2 + $0x20] sm:$0xff] %v2223_v43  ;;  %2233 = vst [vmem:[#allocation2 + $0x30] sm:$0xff] %v2225_v44 }
 0x202   : > { %2232 = vst [vmem:[#allocation2 + $0x28] sm:$0xff] %v2224_v47  ;;  %2234 = vst [vmem:[#allocation2 + $0x38] sm:$0xff] %v2226_v48 }
 0x206   : > { %v2239_v32 = vld [vmem:[#allocation2] sm:$0xff]  ;;  %v2241_v36 = vld [vmem:[#allocation2 + $0x10] sm:$0xff] }
 0x207   : > { %v2240_v27 = vld [vmem:[#allocation2 + $0x8] sm:$0xff]  ;;  %v2242_v23 = vld [vmem:[#allocation2 + $0x18] sm:$0xff]  ;;  %v2269_v25 = vadd.f32 %v2252_v33, %v2239_v32  ;;  %v2271_v42 = vadd.f32 %v2260_v34, %v2241_v36 }
 0x208   : > { %v2243_v35 = vld [vmem:[#allocation2 + $0x20] sm:$0xff]  ;;  %v2245_v37 = vld [vmem:[#allocation2 + $0x30] sm:$0xff]  ;;  %v2270_v38 = vadd.f32 %v2256_v30, %v2240_v27  ;;  %v2272_v40 = vadd.f32 %v2264_v31, %v2242_v23 }
 0x209   : > { %v2244_v28 = vld [vmem:[#allocation2 + $0x28] sm:$0xff]  ;;  %v2246_v24 = vld [vmem:[#allocation2 + $0x38] sm:$0xff]  ;;  %v2273_v26 = vadd.f32 %v2252_v33, %v2243_v35  ;;  %v2275_v43 = vadd.f32 %v2260_v34, %v2245_v37  ;;  %v2277_v48 = vmax.f32 %v2269_v25, 0.0  ;;  %v2279_v50 = vmax.f32 %v2271_v42, 0.0 }
 0x20a   : > { %v2274_v39 = vadd.f32 %v2256_v30, %v2244_v28  ;;  %v2276_v41 = vadd.f32 %v2264_v31, %v2246_v24  ;;  %v2278_v44 = vmax.f32 %v2270_v38, 0.0  ;;  %v2280_v46 = vmax.f32 %v2272_v40, 0.0 }
 0x20b   : > { %v2281_v49 = vmax.f32 %v2273_v26, 0.0  ;;  %v2283_v51 = vmax.f32 %v2275_v43, 0.0 }
 0x20c   : > { %v2282_v45 = vmax.f32 %v2274_v39, 0.0  ;;  %v2284_v47 = vmax.f32 %v2276_v41, 0.0 }
 0x20d   : > { %v2285_v54 = vpack.c.bf16 %v2281_v49, %v2277_v48  ;;  %v2287_v55 = vpack.c.bf16 %v2283_v51, %v2279_v50 }
 0x20e   : > { %v2286_v52 = vpack.c.bf16 %v2282_v45, %v2278_v44  ;;  %v2288_v53 = vpack.c.bf16 %v2284_v47, %v2280_v46 }
 0x210   : > { %2584 = vmatprep.mubr.bf16.mxu0 %v2286_v52  ;;  %2625 = vmatprep.mubr.bf16.mxu1 %v2288_v53 }
 0x211   : > { %2585 = vmatmul.mubr.bf16.vlgmr.msra.gmra.mrb[0].mxu0 %v2285_v54  ;;  %2626 = vmatmul.mubr.bf16.vlgmr.msra.gmra.mrb[0].mxu1 %v2287_v55 }
 0x2e4   : > { %v3012_v56 = vpop.f32.mrb[0].mxu0  ;;  %v3034_v57 = vpop.f32.mrb[0].mxu1 }
 0x2e5   : > { %v3013_v59 = vpop.f32.mrb[1].mxu0  ;;  %v3035_v60 = vpop.f32.mrb[1].mxu1 }
 0x2e6   : > { %v3014_v61 = vadd.f32 %v3013_v59, %v3012_v56  ;;  %v3036_v62 = vadd.f32 %v3035_v60, %v3034_v57  ;;  %v3015_v63 = vpop.f32.mrb[2].mxu0  ;;  %v3037_v0 = vpop.f32.mrb[2].mxu1 }
 0x2e7   : > { %v3016_v1 = vpop.f32.mrb[3].mxu0  ;;  %v3038_v2 = vpop.f32.mrb[3].mxu1 }
 0x2e8   : > { %v2587_v3 = vadd.f32 %v3014_v61, %v2959_v58  ;;  %v3017_v4 = vadd.f32 %v3016_v1, %v3015_v63  ;;  %v3039_v5 = vadd.f32 %v3038_v2, %v3037_v0 }
 0x2ea   : > { %v2628_v6 = vadd.f32 %v3036_v62, %v2587_v3  ;;  %v2590_v7 = vadd.f32 %v3017_v4, %v2959_v58 }
 0x2ec   : > { %2634 = vst [vmem:[%s4020_s5] sm:$0xff] %v2628_v6  ;;  %v2631_v8 = vadd.f32 %v3039_v5, %v2590_v7 }
 0x2ee   : > { %2635 = vst [vmem:[%s4020_s5 + $0x8] sm:$0xff] %v2631_v8 }
 0x2ef PF: > { %p12_p11 = scmp.ge.s32.totalorder %s3579_s22, 6   ;;  %s4021_s18 = smov %s3523_s19 }
 0x2f0   : > { %s4022_s19 = smov %s3588_s25  ;;  %s4023_s20 = smov %s3579_s22 }
 0x2f1   :  { %14 = sbr.rel (!%p12_p11) target bundleno = 2 (0x2), region = 105 }

</bundles_post_ra>
